<compile_context>
chip_gen: v5e
topology: v5e:2x2
jax: 0.10.0
libtpu: 0.0.40
codegen_flags: <defaults>
</compile_context>

<pallas_src>
import functools

import jax
import jax.numpy as jnp
from jax import lax
from jax.experimental import pallas as pl
from jax.experimental.pallas import tpu as pltpu

EPS = 1e-5


def resblock_kernel(x_ref, sup_ref, sdn_ref, b1_ref, g1_ref, be1_ref,
                    b2_ref, g2_ref, be2_ref, pool_ref, o_ref, *, inv_m):
    """Fused residual block.

    x_ref    : (N*H, W*C)   f32   input slab (lane-dense), also the skip connection
    sup/sdn  : (N*H, N*H)   f32   constant h -> h-1 / h -> h+1 shift matrices
    b1/b2    : (3*W*C, W*C) bf16  banded conv weights (W taps + W padding folded in)
    g*/be*   : (1, W*C)     f32   BN gamma / beta, pre-tiled over w
    pool     : (W*C, W*C)   f32   0/1 per-channel pooling matrix
    o_ref    : (N*H, W*C)   f32   output slab
    """
    x2 = x_ref[...]                                                   # (NH, WC) f32

    def conv3x3(act, b_ref):
        # Rows shifted by -1 / +1 in h (zeros at image boundaries are built into S).
        up = jnp.dot(sup_ref[...], act, preferred_element_type=jnp.float32)
        dn = jnp.dot(sdn_ref[...], act, preferred_element_type=jnp.float32)
        # One fused matmul per conv: (NH, 3*WC) bf16  x  (3*WC, WC) bf16 -> f32.
        lhs = jnp.concatenate([up, act, dn], axis=1).astype(jnp.bfloat16)
        return jnp.dot(lhs, b_ref[...], preferred_element_type=jnp.float32)

    def batchnorm(y, g_ref, be_ref):
        pool = pool_ref[...]
        # Per-channel mean over N,H,W: pool over the w-groups of columns (matmul with the
        # 0/1 matrix), then reduce over rows.  Result is already broadcast to (1, WC).
        mean = jnp.sum(jnp.dot(y, pool, preferred_element_type=jnp.float32),
                       axis=0, keepdims=True) * inv_m
        cen = y - mean
        var = jnp.sum(jnp.dot(cen * cen, pool, preferred_element_type=jnp.float32),
                      axis=0, keepdims=True) * inv_m
        scale = g_ref[...] * lax.rsqrt(var + EPS)
        return cen * scale + be_ref[...]

    h1 = jnp.maximum(batchnorm(conv3x3(x2, b1_ref), g1_ref, be1_ref), 0.0)
    h2 = batchnorm(conv3x3(h1, b2_ref), g2_ref, be2_ref)
    o_ref[...] = jnp.maximum(h2 + x2, 0.0)                            # skip + ReLU


def _build_banded_rhs(w_hwio, W):
    """(3, 3, Cin, Cout) HWIO -> (3*W*Cin, W*Cout) banded matrix.

    Row index  = kh*(W*Cin) + w_in*Cin + cin   (matches LHS column [x(h+kh-1)](w_in, cin))
    Col index  = w_out*Cout + cout
    Entry      = K[kh, w_in - w_out + 1, cin, cout] inside the band, 0 outside
    (out-of-range w automatically implements the W zero padding).
    """
    kh, kw, cin, cout = w_hwio.shape
    b = jnp.zeros((kh, W, cin, W, cout), jnp.float32)
    for dw in range(kw):
        for w_out in range(W):
            w_in = w_out + dw - 1
            if 0 <= w_in < W:
                b = b.at[:, w_in, :, w_out, :].set(w_hwio[:, dw, :, :])
    return b.reshape(kh * W * cin, W * cout)


@jax.jit
def residual_block(x_nchw, w1, g1, b1, w2, g2, b2):
    """x_nchw: (N, C, H, W) f32; w1/w2: (3, 3, C, C) HWIO conv weights (bias-free)."""
    N, C, H, W = x_nchw.shape
    NH, WC = N * H, W * C

    # Lane-dense activation slab (layout plumbing stays in the wrapper / XLA).
    x2d = jnp.transpose(x_nchw, (0, 2, 3, 1)).reshape(NH, WC)

    # Banded conv weights (bf16 for the MXU).
    rhs1 = _build_banded_rhs(w1, W).astype(jnp.bfloat16)
    rhs2 = _build_banded_rhs(w2, W).astype(jnp.bfloat16)

    # h -> h-1 / h -> h+1 shift matrices with zeros across image boundaries.
    idx = jnp.arange(NH)
    same_img = (idx[:, None] // H) == (idx[None, :] // H)
    s_up = ((idx[None, :] == idx[:, None] - 1) & same_img).astype(jnp.float32)
    s_dn = ((idx[None, :] == idx[:, None] + 1) & same_img).astype(jnp.float32)

    # Per-channel pooling matrix and pre-tiled BN affine params.
    pool = jnp.tile(jnp.eye(C, dtype=jnp.float32), (W, W))            # (WC, WC)
    g1wc = jnp.tile(g1.reshape(1, C).astype(jnp.float32), (1, W))
    b1wc = jnp.tile(b1.reshape(1, C).astype(jnp.float32), (1, W))
    g2wc = jnp.tile(g2.reshape(1, C).astype(jnp.float32), (1, W))
    b2wc = jnp.tile(b2.reshape(1, C).astype(jnp.float32), (1, W))

    kernel = functools.partial(resblock_kernel, inv_m=1.0 / float(N * H * W))

    out2d = pl.pallas_call(
        kernel,
        out_shape=jax.ShapeDtypeStruct((NH, WC), jnp.float32),
        in_specs=[pl.BlockSpec(memory_space=pltpu.MemorySpace.VMEM)] * 10,
        out_specs=pl.BlockSpec(memory_space=pltpu.MemorySpace.VMEM),
    )(x2d, s_up, s_dn, rhs1, g1wc, b1wc, rhs2, g2wc, b2wc, pool)

    return jnp.transpose(out2d.reshape(N, H, W, C), (0, 3, 1, 2))     # back to NCHW


def residual_block_ref(x_nchw, w1, g1, b1, w2, g2, b2):
    """Pure-JAX f32 reference (training-mode BN) for the correctness check."""
    x = jnp.transpose(x_nchw, (0, 2, 3, 1))
    C = x.shape[-1]
    dn = ('NHWC', 'HWIO', 'NHWC')

    def bn(y, g, b):
        m = jnp.mean(y, axis=(0, 1, 2), keepdims=True)
        v = jnp.mean((y - m) ** 2, axis=(0, 1, 2), keepdims=True)
        return (y - m) * lax.rsqrt(v + EPS) * g.reshape(1, 1, 1, C) + b.reshape(1, 1, 1, C)

    h = lax.conv_general_dilated(x, w1, (1, 1), 'SAME', dimension_numbers=dn,
                                 precision=lax.Precision.HIGHEST)
    h = jnp.maximum(bn(h, g1, b1), 0.0)
    h = lax.conv_general_dilated(h, w2, (1, 1), 'SAME', dimension_numbers=dn,
                                 precision=lax.Precision.HIGHEST)
    out = jnp.maximum(bn(h, g2, b2) + x, 0.0)
    return jnp.transpose(out, (0, 3, 1, 2))


if __name__ == "__main__":
    # Chess-like shapes: batch=2, channels=32, 8x8 board.
    N, C, H, W = 2, 32, 8, 8

    key = jax.random.PRNGKey(0)
    kx, kw1, kw2, kg1, kb1, kg2, kb2 = jax.random.split(key, 7)

    x = jax.random.normal(kx, (N, C, H, W), dtype=jnp.float32)        # NCHW, like PyTorch

    # Conv weights generated directly in HWIO (PyTorch OIHW would map via transpose(2,3,1,0)).
    w1 = 0.1 * jax.random.normal(kw1, (3, 3, C, C), dtype=jnp.float32)
    w2 = 0.1 * jax.random.normal(kw2, (3, 3, C, C), dtype=jnp.float32)

    # BatchNorm affine params (deterministic, non-trivial).
    g1 = 1.0 + 0.3 * jax.random.normal(kg1, (C,), dtype=jnp.float32)
    b1 = 0.1 * jax.random.normal(kb1, (C,), dtype=jnp.float32)
    g2 = 1.0 + 0.3 * jax.random.normal(kg2, (C,), dtype=jnp.float32)
    b2 = 0.1 * jax.random.normal(kb2, (C,), dtype=jnp.float32)

    out = jax.block_until_ready(residual_block(x, w1, g1, b1, w2, g2, b2))
    ref = jax.block_until_ready(residual_block_ref(x, w1, g1, b1, w2, g2, b2))

    assert out.shape == (N, C, H, W)
    # Convs run on the MXU in bf16 (f32 accumulation); tolerance covers bf16 input rounding.
    assert jnp.allclose(out, ref, rtol=3e-2, atol=3e-2), "mismatch vs. JAX reference"

    print("KERNEL_OK")
</pallas_src>

<mosaic_0001>
module attributes {stable_mosaic.version = 11 : i64} {
  func.func @resblock_kernel(%arg0: memref<16x256xf32, #tpu.memory_space<vmem>>, %arg1: memref<16x16xf32, #tpu.memory_space<vmem>>, %arg2: memref<16x16xf32, #tpu.memory_space<vmem>>, %arg3: memref<768x256xbf16, #tpu.memory_space<vmem>>, %arg4: memref<1x256xf32, #tpu.memory_space<vmem>>, %arg5: memref<1x256xf32, #tpu.memory_space<vmem>>, %arg6: memref<768x256xbf16, #tpu.memory_space<vmem>>, %arg7: memref<1x256xf32, #tpu.memory_space<vmem>>, %arg8: memref<1x256xf32, #tpu.memory_space<vmem>>, %arg9: memref<256x256xf32, #tpu.memory_space<vmem>>, %arg10: memref<16x256xf32, #tpu.memory_space<vmem>>) attributes {dimension_semantics = [], scalar_prefetch = 0 : i64, scratch_operands = 0 : i64, tpu.core_type = #tpu.core_type<tc>} {
    %c0 = arith.constant 0 : index
    %c0_0 = arith.constant 0 : index
    %0 = vector.load %arg0[%c0, %c0_0] : memref<16x256xf32, #tpu.memory_space<vmem>>, vector<16x256xf32>
    %c0_1 = arith.constant 0 : index
    %c0_2 = arith.constant 0 : index
    %1 = vector.load %arg1[%c0_1, %c0_2] : memref<16x16xf32, #tpu.memory_space<vmem>>, vector<16x16xf32>
    %cst = arith.constant dense<0.000000e+00> : vector<16x256xf32>
    %2 = tpu.matmul %1, %0, %cst {dimension_numbers = #tpu.dot_dimension_numbers<[1], [0], [0], [1], [0, 0, 1, 1], [], []>} : vector<16x16xf32>, vector<16x256xf32>, vector<16x256xf32> -> vector<16x256xf32>
    %c0_3 = arith.constant 0 : index
    %c0_4 = arith.constant 0 : index
    %3 = vector.load %arg2[%c0_3, %c0_4] : memref<16x16xf32, #tpu.memory_space<vmem>>, vector<16x16xf32>
    %cst_5 = arith.constant dense<0.000000e+00> : vector<16x256xf32>
    %4 = tpu.matmul %3, %0, %cst_5 {dimension_numbers = #tpu.dot_dimension_numbers<[1], [0], [0], [1], [0, 0, 1, 1], [], []>} : vector<16x16xf32>, vector<16x256xf32>, vector<16x256xf32> -> vector<16x256xf32>
    %5 = tpu.concatenate %2, %0, %4 in 1 : vector<16x256xf32>, vector<16x256xf32>, vector<16x256xf32> -> vector<16x768xf32>
    %6 = arith.truncf %5 : vector<16x768xf32> to vector<16x768xbf16>
    %c0_6 = arith.constant 0 : index
    %c0_7 = arith.constant 0 : index
    %7 = vector.load %arg3[%c0_6, %c0_7] : memref<768x256xbf16, #tpu.memory_space<vmem>>, vector<768x256xbf16>
    %cst_8 = arith.constant dense<0.000000e+00> : vector<16x256xf32>
    %8 = tpu.matmul %6, %7, %cst_8 {dimension_numbers = #tpu.dot_dimension_numbers<[1], [0], [0], [1], [0, 0, 1, 1], [], []>} : vector<16x768xbf16>, vector<768x256xbf16>, vector<16x256xf32> -> vector<16x256xf32>
    %c0_9 = arith.constant 0 : index
    %c0_10 = arith.constant 0 : index
    %9 = vector.load %arg9[%c0_9, %c0_10] : memref<256x256xf32, #tpu.memory_space<vmem>>, vector<256x256xf32>
    %cst_11 = arith.constant dense<0.000000e+00> : vector<16x256xf32>
    %10 = tpu.matmul %8, %9, %cst_11 {dimension_numbers = #tpu.dot_dimension_numbers<[1], [0], [0], [1], [0, 0, 1, 1], [], []>} : vector<16x256xf32>, vector<256x256xf32>, vector<16x256xf32> -> vector<16x256xf32>
    %cst_12 = arith.constant dense<0.000000e+00> : vector<256xf32>
    %11 = vector.multi_reduction <add>, %10, %cst_12 [0] : vector<16x256xf32> to vector<256xf32>
    %12 = vector.shape_cast %11 : vector<256xf32> to vector<1x256xf32>
    %cst_13 = arith.constant 7.812500e-03 : f32
    %13 = vector.broadcast %cst_13 : f32 to vector<1x256xf32>
    %14 = arith.mulf %12, %13 : vector<1x256xf32>
    %15 = vector.broadcast %14 : vector<1x256xf32> to vector<16x256xf32>
    %16 = arith.subf %8, %15 : vector<16x256xf32>
    %17 = arith.mulf %16, %16 : vector<16x256xf32>
    %cst_14 = arith.constant dense<0.000000e+00> : vector<16x256xf32>
    %18 = tpu.matmul %17, %9, %cst_14 {dimension_numbers = #tpu.dot_dimension_numbers<[1], [0], [0], [1], [0, 0, 1, 1], [], []>} : vector<16x256xf32>, vector<256x256xf32>, vector<16x256xf32> -> vector<16x256xf32>
    %cst_15 = arith.constant dense<0.000000e+00> : vector<256xf32>
    %19 = vector.multi_reduction <add>, %18, %cst_15 [0] : vector<16x256xf32> to vector<256xf32>
    %20 = vector.shape_cast %19 : vector<256xf32> to vector<1x256xf32>
    %cst_16 = arith.constant 7.812500e-03 : f32
    %21 = vector.broadcast %cst_16 : f32 to vector<1x256xf32>
    %22 = arith.mulf %20, %21 : vector<1x256xf32>
    %c0_17 = arith.constant 0 : index
    %c0_18 = arith.constant 0 : index
    %23 = vector.load %arg4[%c0_17, %c0_18] : memref<1x256xf32, #tpu.memory_space<vmem>>, vector<1x256xf32>
    %cst_19 = arith.constant 9.99999974E-6 : f32
    %24 = vector.broadcast %cst_19 : f32 to vector<1x256xf32>
    %25 = arith.addf %22, %24 : vector<1x256xf32>
    %26 = math.rsqrt %25 : vector<1x256xf32>
    %27 = arith.mulf %23, %26 : vector<1x256xf32>
    %28 = vector.broadcast %27 : vector<1x256xf32> to vector<16x256xf32>
    %29 = arith.mulf %16, %28 : vector<16x256xf32>
    %c0_20 = arith.constant 0 : index
    %c0_21 = arith.constant 0 : index
    %30 = vector.load %arg5[%c0_20, %c0_21] : memref<1x256xf32, #tpu.memory_space<vmem>>, vector<1x256xf32>
    %31 = vector.broadcast %30 : vector<1x256xf32> to vector<16x256xf32>
    %32 = arith.addf %29, %31 : vector<16x256xf32>
    %cst_22 = arith.constant 0.000000e+00 : f32
    %33 = vector.broadcast %cst_22 : f32 to vector<16x256xf32>
    %34 = arith.maximumf %32, %33 : vector<16x256xf32>
    %c0_23 = arith.constant 0 : index
    %c0_24 = arith.constant 0 : index
    %35 = vector.load %arg1[%c0_23, %c0_24] : memref<16x16xf32, #tpu.memory_space<vmem>>, vector<16x16xf32>
    %cst_25 = arith.constant dense<0.000000e+00> : vector<16x256xf32>
    %36 = tpu.matmul %35, %34, %cst_25 {dimension_numbers = #tpu.dot_dimension_numbers<[1], [0], [0], [1], [0, 0, 1, 1], [], []>} : vector<16x16xf32>, vector<16x256xf32>, vector<16x256xf32> -> vector<16x256xf32>
    %c0_26 = arith.constant 0 : index
    %c0_27 = arith.constant 0 : index
    %37 = vector.load %arg2[%c0_26, %c0_27] : memref<16x16xf32, #tpu.memory_space<vmem>>, vector<16x16xf32>
    %cst_28 = arith.constant dense<0.000000e+00> : vector<16x256xf32>
    %38 = tpu.matmul %37, %34, %cst_28 {dimension_numbers = #tpu.dot_dimension_numbers<[1], [0], [0], [1], [0, 0, 1, 1], [], []>} : vector<16x16xf32>, vector<16x256xf32>, vector<16x256xf32> -> vector<16x256xf32>
    %39 = tpu.concatenate %36, %34, %38 in 1 : vector<16x256xf32>, vector<16x256xf32>, vector<16x256xf32> -> vector<16x768xf32>
    %40 = arith.truncf %39 : vector<16x768xf32> to vector<16x768xbf16>
    %c0_29 = arith.constant 0 : index
    %c0_30 = arith.constant 0 : index
    %41 = vector.load %arg6[%c0_29, %c0_30] : memref<768x256xbf16, #tpu.memory_space<vmem>>, vector<768x256xbf16>
    %cst_31 = arith.constant dense<0.000000e+00> : vector<16x256xf32>
    %42 = tpu.matmul %40, %41, %cst_31 {dimension_numbers = #tpu.dot_dimension_numbers<[1], [0], [0], [1], [0, 0, 1, 1], [], []>} : vector<16x768xbf16>, vector<768x256xbf16>, vector<16x256xf32> -> vector<16x256xf32>
    %c0_32 = arith.constant 0 : index
    %c0_33 = arith.constant 0 : index
    %43 = vector.load %arg9[%c0_32, %c0_33] : memref<256x256xf32, #tpu.memory_space<vmem>>, vector<256x256xf32>
    %cst_34 = arith.constant dense<0.000000e+00> : vector<16x256xf32>
    %44 = tpu.matmul %42, %43, %cst_34 {dimension_numbers = #tpu.dot_dimension_numbers<[1], [0], [0], [1], [0, 0, 1, 1], [], []>} : vector<16x256xf32>, vector<256x256xf32>, vector<16x256xf32> -> vector<16x256xf32>
    %cst_35 = arith.constant dense<0.000000e+00> : vector<256xf32>
    %45 = vector.multi_reduction <add>, %44, %cst_35 [0] : vector<16x256xf32> to vector<256xf32>
    %46 = vector.shape_cast %45 : vector<256xf32> to vector<1x256xf32>
    %cst_36 = arith.constant 7.812500e-03 : f32
    %47 = vector.broadcast %cst_36 : f32 to vector<1x256xf32>
    %48 = arith.mulf %46, %47 : vector<1x256xf32>
    %49 = vector.broadcast %48 : vector<1x256xf32> to vector<16x256xf32>
    %50 = arith.subf %42, %49 : vector<16x256xf32>
    %51 = arith.mulf %50, %50 : vector<16x256xf32>
    %cst_37 = arith.constant dense<0.000000e+00> : vector<16x256xf32>
    %52 = tpu.matmul %51, %43, %cst_37 {dimension_numbers = #tpu.dot_dimension_numbers<[1], [0], [0], [1], [0, 0, 1, 1], [], []>} : vector<16x256xf32>, vector<256x256xf32>, vector<16x256xf32> -> vector<16x256xf32>
    %cst_38 = arith.constant dense<0.000000e+00> : vector<256xf32>
    %53 = vector.multi_reduction <add>, %52, %cst_38 [0] : vector<16x256xf32> to vector<256xf32>
    %54 = vector.shape_cast %53 : vector<256xf32> to vector<1x256xf32>
    %cst_39 = arith.constant 7.812500e-03 : f32
    %55 = vector.broadcast %cst_39 : f32 to vector<1x256xf32>
    %56 = arith.mulf %54, %55 : vector<1x256xf32>
    %c0_40 = arith.constant 0 : index
    %c0_41 = arith.constant 0 : index
    %57 = vector.load %arg7[%c0_40, %c0_41] : memref<1x256xf32, #tpu.memory_space<vmem>>, vector<1x256xf32>
    %cst_42 = arith.constant 9.99999974E-6 : f32
    %58 = vector.broadcast %cst_42 : f32 to vector<1x256xf32>
    %59 = arith.addf %56, %58 : vector<1x256xf32>
    %60 = math.rsqrt %59 : vector<1x256xf32>
    %61 = arith.mulf %57, %60 : vector<1x256xf32>
    %62 = vector.broadcast %61 : vector<1x256xf32> to vector<16x256xf32>
    %63 = arith.mulf %50, %62 : vector<16x256xf32>
    %c0_43 = arith.constant 0 : index
    %c0_44 = arith.constant 0 : index
    %64 = vector.load %arg8[%c0_43, %c0_44] : memref<1x256xf32, #tpu.memory_space<vmem>>, vector<1x256xf32>
    %65 = vector.broadcast %64 : vector<1x256xf32> to vector<16x256xf32>
    %66 = arith.addf %63, %65 : vector<16x256xf32>
    %67 = arith.addf %66, %0 : vector<16x256xf32>
    %cst_45 = arith.constant 0.000000e+00 : f32
    %68 = vector.broadcast %cst_45 : f32 to vector<16x256xf32>
    %69 = arith.maximumf %67, %68 : vector<16x256xf32>
    %c0_46 = arith.constant 0 : index
    %c0_47 = arith.constant 0 : index
    %70 = vector.load %arg10[%c0_46, %c0_47] : memref<16x256xf32, #tpu.memory_space<vmem>>, vector<16x256xf32>
    tpu.vector_store %arg10[%c0_46, %c0_47], %69 {strides = array<i32>} : memref<16x256xf32, #tpu.memory_space<vmem>>, vector<16x256xf32>,
    return
  }
}

</mosaic_0001>

<bundles_post_ra>
// kernel: tile.24
= control target key start
LH: loop header
LB: loop body
LE: loop exit
PB: predicated region body
PF: predicated region fallthrough
CT: control target
= control target key end

     0   :  { %s1780_s0 = inlined_call_operand.vmem [shape: f32[32,32], index: 0, kind: input, shape index: {}]   ;;  %s1781_s1 = inlined_call_operand.vmem [shape: f32[8,32,8,32], index: 1, kind: output, shape index: {}]  }
   0x1   :  { %v4_v0 = vld [vmem:[%s1780_s0] ss:$0 sm:$0xff]  ;;  %v627_v1 = vld [vmem:[%s1780_s0 + $0x1] ss:$0 sm:$0xff]  ;;  %v636_v2 = vld [vmem:[%s1780_s0 + $0x2] ss:$0 sm:$0xff] }
   0x2   :  { %5 = vst [vmem:[%s1781_s1] sm:$0xff] %v4_v0  ;;  %v645_v3 = vld [vmem:[%s1780_s0 + $0x3] ss:$0 sm:$0xff]  ;;  %v654_v4 = vld [vmem:[%s1780_s0 + $0x4] ss:$0 sm:$0xff]  ;;  %v663_v5 = vld [vmem:[%s1780_s0 + $0x5] ss:$0 sm:$0xff] }
   0x3   :  { %620 = vst [vmem:[%s1781_s1 + $0x100] sm:$0xff] %v4_v0  ;;  %v672_v6 = vld [vmem:[%s1780_s0 + $0x6] ss:$0 sm:$0xff]  ;;  %v681_v7 = vld [vmem:[%s1780_s0 + $0x7] ss:$0 sm:$0xff] }
   0x4   :  { %621 = vst [vmem:[%s1781_s1 + $0x200] sm:$0xff] %v4_v0  ;;  %v690_v8 = vld [vmem:[%s1780_s0 + $0x8] ss:$0 sm:$0xff]  ;;  %v699_v9 = vld [vmem:[%s1780_s0 + $0x9] ss:$0 sm:$0xff] }
   0x5   :  { %622 = vst [vmem:[%s1781_s1 + $0x300] sm:$0xff] %v4_v0  ;;  %v708_v10 = vld [vmem:[%s1780_s0 + $0xa] ss:$0 sm:$0xff]  ;;  %v717_v11 = vld [vmem:[%s1780_s0 + $0xb] ss:$0 sm:$0xff] }
   0x6   :  { %623 = vst [vmem:[%s1781_s1 + $0x400] sm:$0xff] %v4_v0  ;;  %v726_v12 = vld [vmem:[%s1780_s0 + $0xc] ss:$0 sm:$0xff]  ;;  %v735_v13 = vld [vmem:[%s1780_s0 + $0xd] ss:$0 sm:$0xff] }
   0x7   :  { %624 = vst [vmem:[%s1781_s1 + $0x500] sm:$0xff] %v4_v0  ;;  %v744_v14 = vld [vmem:[%s1780_s0 + $0xe] ss:$0 sm:$0xff]  ;;  %v753_v15 = vld [vmem:[%s1780_s0 + $0xf] ss:$0 sm:$0xff] }
   0x8   :  { %625 = vst [vmem:[%s1781_s1 + $0x600] sm:$0xff] %v4_v0  ;;  %v762_v16 = vld [vmem:[%s1780_s0 + $0x10] ss:$0 sm:$0xff]  ;;  %v771_v17 = vld [vmem:[%s1780_s0 + $0x11] ss:$0 sm:$0xff] }
   0x9   :  { %626 = vst [vmem:[%s1781_s1 + $0x700] sm:$0xff] %v4_v0  ;;  %v780_v18 = vld [vmem:[%s1780_s0 + $0x12] ss:$0 sm:$0xff]  ;;  %v789_v19 = vld [vmem:[%s1780_s0 + $0x13] ss:$0 sm:$0xff] }
   0xa   :  { %628 = vst [vmem:[%s1781_s1 + $0x8] sm:$0xff] %v627_v1  ;;  %v798_v20 = vld [vmem:[%s1780_s0 + $0x14] ss:$0 sm:$0xff]  ;;  %v807_v21 = vld [vmem:[%s1780_s0 + $0x15] ss:$0 sm:$0xff] }
   0xb   :  { %629 = vst [vmem:[%s1781_s1 + $0x108] sm:$0xff] %v627_v1  ;;  %v816_v22 = vld [vmem:[%s1780_s0 + $0x16] ss:$0 sm:$0xff]  ;;  %v825_v23 = vld [vmem:[%s1780_s0 + $0x17] ss:$0 sm:$0xff] }
   0xc   :  { %630 = vst [vmem:[%s1781_s1 + $0x208] sm:$0xff] %v627_v1  ;;  %v834_v24 = vld [vmem:[%s1780_s0 + $0x18] ss:$0 sm:$0xff]  ;;  %v843_v25 = vld [vmem:[%s1780_s0 + $0x19] ss:$0 sm:$0xff] }
   0xd   :  { %631 = vst [vmem:[%s1781_s1 + $0x308] sm:$0xff] %v627_v1  ;;  %v852_v26 = vld [vmem:[%s1780_s0 + $0x1a] ss:$0 sm:$0xff]  ;;  %v861_v27 = vld [vmem:[%s1780_s0 + $0x1b] ss:$0 sm:$0xff] }
   0xe   :  { %632 = vst [vmem:[%s1781_s1 + $0x408] sm:$0xff] %v627_v1  ;;  %v870_v28 = vld [vmem:[%s1780_s0 + $0x1c] ss:$0 sm:$0xff]  ;;  %v879_v29 = vld [vmem:[%s1780_s0 + $0x1d] ss:$0 sm:$0xff] }
   0xf   :  { %633 = vst [vmem:[%s1781_s1 + $0x508] sm:$0xff] %v627_v1  ;;  %v888_v30 = vld [vmem:[%s1780_s0 + $0x1e] ss:$0 sm:$0xff]  ;;  %v897_v31 = vld [vmem:[%s1780_s0 + $0x1f] ss:$0 sm:$0xff] }
  0x10   :  { %634 = vst [vmem:[%s1781_s1 + $0x608] sm:$0xff] %v627_v1 }
  0x11   :  { %635 = vst [vmem:[%s1781_s1 + $0x708] sm:$0xff] %v627_v1 }
  0x12   :  { %637 = vst [vmem:[%s1781_s1 + $0x10] sm:$0xff] %v636_v2 }
  0x13   :  { %638 = vst [vmem:[%s1781_s1 + $0x110] sm:$0xff] %v636_v2 }
  0x14   :  { %639 = vst [vmem:[%s1781_s1 + $0x210] sm:$0xff] %v636_v2 }
  0x15   :  { %640 = vst [vmem:[%s1781_s1 + $0x310] sm:$0xff] %v636_v2 }
  0x16   :  { %641 = vst [vmem:[%s1781_s1 + $0x410] sm:$0xff] %v636_v2 }
  0x17   :  { %642 = vst [vmem:[%s1781_s1 + $0x510] sm:$0xff] %v636_v2 }
  0x18   :  { %643 = vst [vmem:[%s1781_s1 + $0x610] sm:$0xff] %v636_v2 }
  0x19   :  { %644 = vst [vmem:[%s1781_s1 + $0x710] sm:$0xff] %v636_v2 }
  0x1a   :  { %646 = vst [vmem:[%s1781_s1 + $0x18] sm:$0xff] %v645_v3 }
  0x1b   :  { %647 = vst [vmem:[%s1781_s1 + $0x118] sm:$0xff] %v645_v3 }
  0x1c   :  { %648 = vst [vmem:[%s1781_s1 + $0x218] sm:$0xff] %v645_v3 }
  0x1d   :  { %649 = vst [vmem:[%s1781_s1 + $0x318] sm:$0xff] %v645_v3 }
  0x1e   :  { %650 = vst [vmem:[%s1781_s1 + $0x418] sm:$0xff] %v645_v3 }
  0x1f   :  { %651 = vst [vmem:[%s1781_s1 + $0x518] sm:$0xff] %v645_v3 }
  0x20   :  { %652 = vst [vmem:[%s1781_s1 + $0x618] sm:$0xff] %v645_v3 }
  0x21   :  { %653 = vst [vmem:[%s1781_s1 + $0x718] sm:$0xff] %v645_v3 }
  0x22   :  { %655 = vst [vmem:[%s1781_s1 + $0x20] sm:$0xff] %v654_v4 }
  0x23   :  { %656 = vst [vmem:[%s1781_s1 + $0x120] sm:$0xff] %v654_v4 }
  0x24   :  { %657 = vst [vmem:[%s1781_s1 + $0x220] sm:$0xff] %v654_v4 }
  0x25   :  { %658 = vst [vmem:[%s1781_s1 + $0x320] sm:$0xff] %v654_v4 }
  0x26   :  { %659 = vst [vmem:[%s1781_s1 + $0x420] sm:$0xff] %v654_v4 }
  0x27   :  { %660 = vst [vmem:[%s1781_s1 + $0x520] sm:$0xff] %v654_v4 }
  0x28   :  { %661 = vst [vmem:[%s1781_s1 + $0x620] sm:$0xff] %v654_v4 }
  0x29   :  { %662 = vst [vmem:[%s1781_s1 + $0x720] sm:$0xff] %v654_v4 }
  0x2a   :  { %664 = vst [vmem:[%s1781_s1 + $0x28] sm:$0xff] %v663_v5 }
  0x2b   :  { %665 = vst [vmem:[%s1781_s1 + $0x128] sm:$0xff] %v663_v5 }
  0x2c   :  { %666 = vst [vmem:[%s1781_s1 + $0x228] sm:$0xff] %v663_v5 }
  0x2d   :  { %667 = vst [vmem:[%s1781_s1 + $0x328] sm:$0xff] %v663_v5 }
  0x2e   :  { %668 = vst [vmem:[%s1781_s1 + $0x428] sm:$0xff] %v663_v5 }
  0x2f   :  { %669 = vst [vmem:[%s1781_s1 + $0x528] sm:$0xff] %v663_v5 }
  0x30   :  { %670 = vst [vmem:[%s1781_s1 + $0x628] sm:$0xff] %v663_v5 }
  0x31   :  { %671 = vst [vmem:[%s1781_s1 + $0x728] sm:$0xff] %v663_v5 }
  0x32   :  { %673 = vst [vmem:[%s1781_s1 + $0x30] sm:$0xff] %v672_v6 }
  0x33   :  { %674 = vst [vmem:[%s1781_s1 + $0x130] sm:$0xff] %v672_v6 }
  0x34   :  { %675 = vst [vmem:[%s1781_s1 + $0x230] sm:$0xff] %v672_v6 }
  0x35   :  { %676 = vst [vmem:[%s1781_s1 + $0x330] sm:$0xff] %v672_v6 }
  0x36   :  { %677 = vst [vmem:[%s1781_s1 + $0x430] sm:$0xff] %v672_v6 }
  0x37   :  { %678 = vst [vmem:[%s1781_s1 + $0x530] sm:$0xff] %v672_v6 }
  0x38   :  { %679 = vst [vmem:[%s1781_s1 + $0x630] sm:$0xff] %v672_v6 }
  0x39   :  { %680 = vst [vmem:[%s1781_s1 + $0x730] sm:$0xff] %v672_v6 }
  0x3a   :  { %682 = vst [vmem:[%s1781_s1 + $0x38] sm:$0xff] %v681_v7 }
  0x3b   :  { %683 = vst [vmem:[%s1781_s1 + $0x138] sm:$0xff] %v681_v7 }
  0x3c   :  { %684 = vst [vmem:[%s1781_s1 + $0x238] sm:$0xff] %v681_v7 }
  0x3d   :  { %685 = vst [vmem:[%s1781_s1 + $0x338] sm:$0xff] %v681_v7 }
  0x3e   :  { %686 = vst [vmem:[%s1781_s1 + $0x438] sm:$0xff] %v681_v7 }
  0x3f   :  { %687 = vst [vmem:[%s1781_s1 + $0x538] sm:$0xff] %v681_v7 }
  0x40   :  { %688 = vst [vmem:[%s1781_s1 + $0x638] sm:$0xff] %v681_v7 }
  0x41   :  { %689 = vst [vmem:[%s1781_s1 + $0x738] sm:$0xff] %v681_v7 }
  0x42   :  { %691 = vst [vmem:[%s1781_s1 + $0x40] sm:$0xff] %v690_v8 }
  0x43   :  { %692 = vst [vmem:[%s1781_s1 + $0x140] sm:$0xff] %v690_v8 }
  0x44   :  { %693 = vst [vmem:[%s1781_s1 + $0x240] sm:$0xff] %v690_v8 }
  0x45   :  { %694 = vst [vmem:[%s1781_s1 + $0x340] sm:$0xff] %v690_v8 }
  0x46   :  { %695 = vst [vmem:[%s1781_s1 + $0x440] sm:$0xff] %v690_v8 }
  0x47   :  { %696 = vst [vmem:[%s1781_s1 + $0x540] sm:$0xff] %v690_v8 }
  0x48   :  { %697 = vst [vmem:[%s1781_s1 + $0x640] sm:$0xff] %v690_v8 }
  0x49   :  { %698 = vst [vmem:[%s1781_s1 + $0x740] sm:$0xff] %v690_v8 }
  0x4a   :  { %700 = vst [vmem:[%s1781_s1 + $0x48] sm:$0xff] %v699_v9 }
  0x4b   :  { %701 = vst [vmem:[%s1781_s1 + $0x148] sm:$0xff] %v699_v9 }
  0x4c   :  { %702 = vst [vmem:[%s1781_s1 + $0x248] sm:$0xff] %v699_v9 }
  0x4d   :  { %703 = vst [vmem:[%s1781_s1 + $0x348] sm:$0xff] %v699_v9 }
  0x4e   :  { %704 = vst [vmem:[%s1781_s1 + $0x448] sm:$0xff] %v699_v9 }
  0x4f   :  { %705 = vst [vmem:[%s1781_s1 + $0x548] sm:$0xff] %v699_v9 }
  0x50   :  { %706 = vst [vmem:[%s1781_s1 + $0x648] sm:$0xff] %v699_v9 }
  0x51   :  { %707 = vst [vmem:[%s1781_s1 + $0x748] sm:$0xff] %v699_v9 }
  0x52   :  { %709 = vst [vmem:[%s1781_s1 + $0x50] sm:$0xff] %v708_v10 }
  0x53   :  { %710 = vst [vmem:[%s1781_s1 + $0x150] sm:$0xff] %v708_v10 }
  0x54   :  { %711 = vst [vmem:[%s1781_s1 + $0x250] sm:$0xff] %v708_v10 }
  0x55   :  { %712 = vst [vmem:[%s1781_s1 + $0x350] sm:$0xff] %v708_v10 }
  0x56   :  { %713 = vst [vmem:[%s1781_s1 + $0x450] sm:$0xff] %v708_v10 }
  0x57   :  { %714 = vst [vmem:[%s1781_s1 + $0x550] sm:$0xff] %v708_v10 }
  0x58   :  { %715 = vst [vmem:[%s1781_s1 + $0x650] sm:$0xff] %v708_v10 }
  0x59   :  { %716 = vst [vmem:[%s1781_s1 + $0x750] sm:$0xff] %v708_v10 }
  0x5a   :  { %718 = vst [vmem:[%s1781_s1 + $0x58] sm:$0xff] %v717_v11 }
  0x5b   :  { %719 = vst [vmem:[%s1781_s1 + $0x158] sm:$0xff] %v717_v11 }
  0x5c   :  { %720 = vst [vmem:[%s1781_s1 + $0x258] sm:$0xff] %v717_v11 }
  0x5d   :  { %721 = vst [vmem:[%s1781_s1 + $0x358] sm:$0xff] %v717_v11 }
  0x5e   :  { %722 = vst [vmem:[%s1781_s1 + $0x458] sm:$0xff] %v717_v11 }
  0x5f   :  { %723 = vst [vmem:[%s1781_s1 + $0x558] sm:$0xff] %v717_v11 }
  0x60   :  { %724 = vst [vmem:[%s1781_s1 + $0x658] sm:$0xff] %v717_v11 }
  0x61   :  { %725 = vst [vmem:[%s1781_s1 + $0x758] sm:$0xff] %v717_v11 }
  0x62   :  { %727 = vst [vmem:[%s1781_s1 + $0x60] sm:$0xff] %v726_v12 }
  0x63   :  { %728 = vst [vmem:[%s1781_s1 + $0x160] sm:$0xff] %v726_v12 }
  0x64   :  { %729 = vst [vmem:[%s1781_s1 + $0x260] sm:$0xff] %v726_v12 }
  0x65   :  { %730 = vst [vmem:[%s1781_s1 + $0x360] sm:$0xff] %v726_v12 }
  0x66   :  { %731 = vst [vmem:[%s1781_s1 + $0x460] sm:$0xff] %v726_v12 }
  0x67   :  { %732 = vst [vmem:[%s1781_s1 + $0x560] sm:$0xff] %v726_v12 }
  0x68   :  { %733 = vst [vmem:[%s1781_s1 + $0x660] sm:$0xff] %v726_v12 }
  0x69   :  { %734 = vst [vmem:[%s1781_s1 + $0x760] sm:$0xff] %v726_v12 }
  0x6a   :  { %736 = vst [vmem:[%s1781_s1 + $0x68] sm:$0xff] %v735_v13 }
  0x6b   :  { %737 = vst [vmem:[%s1781_s1 + $0x168] sm:$0xff] %v735_v13 }
  0x6c   :  { %738 = vst [vmem:[%s1781_s1 + $0x268] sm:$0xff] %v735_v13 }
  0x6d   :  { %739 = vst [vmem:[%s1781_s1 + $0x368] sm:$0xff] %v735_v13 }
  0x6e   :  { %740 = vst [vmem:[%s1781_s1 + $0x468] sm:$0xff] %v735_v13 }
  0x6f   :  { %741 = vst [vmem:[%s1781_s1 + $0x568] sm:$0xff] %v735_v13 }
  0x70   :  { %742 = vst [vmem:[%s1781_s1 + $0x668] sm:$0xff] %v735_v13 }
  0x71   :  { %743 = vst [vmem:[%s1781_s1 + $0x768] sm:$0xff] %v735_v13 }
  0x72   :  { %745 = vst [vmem:[%s1781_s1 + $0x70] sm:$0xff] %v744_v14 }
  0x73   :  { %746 = vst [vmem:[%s1781_s1 + $0x170] sm:$0xff] %v744_v14 }
  0x74   :  { %747 = vst [vmem:[%s1781_s1 + $0x270] sm:$0xff] %v744_v14 }
  0x75   :  { %748 = vst [vmem:[%s1781_s1 + $0x370] sm:$0xff] %v744_v14 }
  0x76   :  { %749 = vst [vmem:[%s1781_s1 + $0x470] sm:$0xff] %v744_v14 }
  0x77   :  { %750 = vst [vmem:[%s1781_s1 + $0x570] sm:$0xff] %v744_v14 }
  0x78   :  { %751 = vst [vmem:[%s1781_s1 + $0x670] sm:$0xff] %v744_v14 }
  0x79   :  { %752 = vst [vmem:[%s1781_s1 + $0x770] sm:$0xff] %v744_v14 }
  0x7a   :  { %754 = vst [vmem:[%s1781_s1 + $0x78] sm:$0xff] %v753_v15 }
  0x7b   :  { %755 = vst [vmem:[%s1781_s1 + $0x178] sm:$0xff] %v753_v15 }
  0x7c   :  { %756 = vst [vmem:[%s1781_s1 + $0x278] sm:$0xff] %v753_v15 }
  0x7d   :  { %757 = vst [vmem:[%s1781_s1 + $0x378] sm:$0xff] %v753_v15 }
  0x7e   :  { %758 = vst [vmem:[%s1781_s1 + $0x478] sm:$0xff] %v753_v15 }
  0x7f   :  { %759 = vst [vmem:[%s1781_s1 + $0x578] sm:$0xff] %v753_v15 }
  0x80   :  { %760 = vst [vmem:[%s1781_s1 + $0x678] sm:$0xff] %v753_v15 }
  0x81   :  { %761 = vst [vmem:[%s1781_s1 + $0x778] sm:$0xff] %v753_v15 }
  0x82   :  { %763 = vst [vmem:[%s1781_s1 + $0x80] sm:$0xff] %v762_v16 }
  0x83   :  { %764 = vst [vmem:[%s1781_s1 + $0x180] sm:$0xff] %v762_v16 }
  0x84   :  { %765 = vst [vmem:[%s1781_s1 + $0x280] sm:$0xff] %v762_v16 }
  0x85   :  { %766 = vst [vmem:[%s1781_s1 + $0x380] sm:$0xff] %v762_v16 }
  0x86   :  { %767 = vst [vmem:[%s1781_s1 + $0x480] sm:$0xff] %v762_v16 }
  0x87   :  { %768 = vst [vmem:[%s1781_s1 + $0x580] sm:$0xff] %v762_v16 }
  0x88   :  { %769 = vst [vmem:[%s1781_s1 + $0x680] sm:$0xff] %v762_v16 }
  0x89   :  { %770 = vst [vmem:[%s1781_s1 + $0x780] sm:$0xff] %v762_v16 }
  0x8a   :  { %772 = vst [vmem:[%s1781_s1 + $0x88] sm:$0xff] %v771_v17 }
  0x8b   :  { %773 = vst [vmem:[%s1781_s1 + $0x188] sm:$0xff] %v771_v17 }
  0x8c   :  { %774 = vst [vmem:[%s1781_s1 + $0x288] sm:$0xff] %v771_v17 }
  0x8d   :  { %775 = vst [vmem:[%s1781_s1 + $0x388] sm:$0xff] %v771_v17 }
  0x8e   :  { %776 = vst [vmem:[%s1781_s1 + $0x488] sm:$0xff] %v771_v17 }
  0x8f   :  { %777 = vst [vmem:[%s1781_s1 + $0x588] sm:$0xff] %v771_v17 }
  0x90   :  { %778 = vst [vmem:[%s1781_s1 + $0x688] sm:$0xff] %v771_v17 }
  0x91   :  { %779 = vst [vmem:[%s1781_s1 + $0x788] sm:$0xff] %v771_v17 }
  0x92   :  { %781 = vst [vmem:[%s1781_s1 + $0x90] sm:$0xff] %v780_v18 }
  0x93   :  { %782 = vst [vmem:[%s1781_s1 + $0x190] sm:$0xff] %v780_v18 }
  0x94   :  { %783 = vst [vmem:[%s1781_s1 + $0x290] sm:$0xff] %v780_v18 }
  0x95   :  { %784 = vst [vmem:[%s1781_s1 + $0x390] sm:$0xff] %v780_v18 }
  0x96   :  { %785 = vst [vmem:[%s1781_s1 + $0x490] sm:$0xff] %v780_v18 }
  0x97   :  { %786 = vst [vmem:[%s1781_s1 + $0x590] sm:$0xff] %v780_v18 }
  0x98   :  { %787 = vst [vmem:[%s1781_s1 + $0x690] sm:$0xff] %v780_v18 }
  0x99   :  { %788 = vst [vmem:[%s1781_s1 + $0x790] sm:$0xff] %v780_v18 }
  0x9a   :  { %790 = vst [vmem:[%s1781_s1 + $0x98] sm:$0xff] %v789_v19 }
  0x9b   :  { %791 = vst [vmem:[%s1781_s1 + $0x198] sm:$0xff] %v789_v19 }
  0x9c   :  { %792 = vst [vmem:[%s1781_s1 + $0x298] sm:$0xff] %v789_v19 }
  0x9d   :  { %793 = vst [vmem:[%s1781_s1 + $0x398] sm:$0xff] %v789_v19 }
  0x9e   :  { %794 = vst [vmem:[%s1781_s1 + $0x498] sm:$0xff] %v789_v19 }
  0x9f   :  { %795 = vst [vmem:[%s1781_s1 + $0x598] sm:$0xff] %v789_v19 }
  0xa0   :  { %796 = vst [vmem:[%s1781_s1 + $0x698] sm:$0xff] %v789_v19 }
  0xa1   :  { %797 = vst [vmem:[%s1781_s1 + $0x798] sm:$0xff] %v789_v19 }
  0xa2   :  { %799 = vst [vmem:[%s1781_s1 + $0xa0] sm:$0xff] %v798_v20 }
  0xa3   :  { %800 = vst [vmem:[%s1781_s1 + $0x1a0] sm:$0xff] %v798_v20 }
  0xa4   :  { %801 = vst [vmem:[%s1781_s1 + $0x2a0] sm:$0xff] %v798_v20 }
  0xa5   :  { %802 = vst [vmem:[%s1781_s1 + $0x3a0] sm:$0xff] %v798_v20 }
  0xa6   :  { %803 = vst [vmem:[%s1781_s1 + $0x4a0] sm:$0xff] %v798_v20 }
  0xa7   :  { %804 = vst [vmem:[%s1781_s1 + $0x5a0] sm:$0xff] %v798_v20 }
  0xa8   :  { %805 = vst [vmem:[%s1781_s1 + $0x6a0] sm:$0xff] %v798_v20 }
  0xa9   :  { %806 = vst [vmem:[%s1781_s1 + $0x7a0] sm:$0xff] %v798_v20 }
  0xaa   :  { %808 = vst [vmem:[%s1781_s1 + $0xa8] sm:$0xff] %v807_v21 }
  0xab   :  { %809 = vst [vmem:[%s1781_s1 + $0x1a8] sm:$0xff] %v807_v21 }
  0xac   :  { %810 = vst [vmem:[%s1781_s1 + $0x2a8] sm:$0xff] %v807_v21 }
  0xad   :  { %811 = vst [vmem:[%s1781_s1 + $0x3a8] sm:$0xff] %v807_v21 }
  0xae   :  { %812 = vst [vmem:[%s1781_s1 + $0x4a8] sm:$0xff] %v807_v21 }
  0xaf   :  { %813 = vst [vmem:[%s1781_s1 + $0x5a8] sm:$0xff] %v807_v21 }
  0xb0   :  { %814 = vst [vmem:[%s1781_s1 + $0x6a8] sm:$0xff] %v807_v21 }
  0xb1   :  { %815 = vst [vmem:[%s1781_s1 + $0x7a8] sm:$0xff] %v807_v21 }
  0xb2   :  { %817 = vst [vmem:[%s1781_s1 + $0xb0] sm:$0xff] %v816_v22 }
  0xb3   :  { %818 = vst [vmem:[%s1781_s1 + $0x1b0] sm:$0xff] %v816_v22 }
  0xb4   :  { %819 = vst [vmem:[%s1781_s1 + $0x2b0] sm:$0xff] %v816_v22 }
  0xb5   :  { %820 = vst [vmem:[%s1781_s1 + $0x3b0] sm:$0xff] %v816_v22 }
  0xb6   :  { %821 = vst [vmem:[%s1781_s1 + $0x4b0] sm:$0xff] %v816_v22 }
  0xb7   :  { %822 = vst [vmem:[%s1781_s1 + $0x5b0] sm:$0xff] %v816_v22 }
  0xb8   :  { %823 = vst [vmem:[%s1781_s1 + $0x6b0] sm:$0xff] %v816_v22 }
  0xb9   :  { %824 = vst [vmem:[%s1781_s1 + $0x7b0] sm:$0xff] %v816_v22 }
  0xba   :  { %826 = vst [vmem:[%s1781_s1 + $0xb8] sm:$0xff] %v825_v23 }
  0xbb   :  { %827 = vst [vmem:[%s1781_s1 + $0x1b8] sm:$0xff] %v825_v23 }
  0xbc   :  { %828 = vst [vmem:[%s1781_s1 + $0x2b8] sm:$0xff] %v825_v23 }
  0xbd   :  { %829 = vst [vmem:[%s1781_s1 + $0x3b8] sm:$0xff] %v825_v23 }
  0xbe   :  { %830 = vst [vmem:[%s1781_s1 + $0x4b8] sm:$0xff] %v825_v23 }
  0xbf   :  { %831 = vst [vmem:[%s1781_s1 + $0x5b8] sm:$0xff] %v825_v23 }
  0xc0   :  { %832 = vst [vmem:[%s1781_s1 + $0x6b8] sm:$0xff] %v825_v23 }
  0xc1   :  { %833 = vst [vmem:[%s1781_s1 + $0x7b8] sm:$0xff] %v825_v23 }
  0xc2   :  { %835 = vst [vmem:[%s1781_s1 + $0xc0] sm:$0xff] %v834_v24 }
  0xc3   :  { %836 = vst [vmem:[%s1781_s1 + $0x1c0] sm:$0xff] %v834_v24 }
  0xc4   :  { %837 = vst [vmem:[%s1781_s1 + $0x2c0] sm:$0xff] %v834_v24 }
  0xc5   :  { %838 = vst [vmem:[%s1781_s1 + $0x3c0] sm:$0xff] %v834_v24 }
  0xc6   :  { %839 = vst [vmem:[%s1781_s1 + $0x4c0] sm:$0xff] %v834_v24 }
  0xc7   :  { %840 = vst [vmem:[%s1781_s1 + $0x5c0] sm:$0xff] %v834_v24 }
  0xc8   :  { %841 = vst [vmem:[%s1781_s1 + $0x6c0] sm:$0xff] %v834_v24 }
  0xc9   :  { %842 = vst [vmem:[%s1781_s1 + $0x7c0] sm:$0xff] %v834_v24 }
  0xca   :  { %844 = vst [vmem:[%s1781_s1 + $0xc8] sm:$0xff] %v843_v25 }
  0xcb   :  { %845 = vst [vmem:[%s1781_s1 + $0x1c8] sm:$0xff] %v843_v25 }
  0xcc   :  { %846 = vst [vmem:[%s1781_s1 + $0x2c8] sm:$0xff] %v843_v25 }
  0xcd   :  { %847 = vst [vmem:[%s1781_s1 + $0x3c8] sm:$0xff] %v843_v25 }
  0xce   :  { %848 = vst [vmem:[%s1781_s1 + $0x4c8] sm:$0xff] %v843_v25 }
  0xcf   :  { %849 = vst [vmem:[%s1781_s1 + $0x5c8] sm:$0xff] %v843_v25 }
  0xd0   :  { %850 = vst [vmem:[%s1781_s1 + $0x6c8] sm:$0xff] %v843_v25 }
  0xd1   :  { %851 = vst [vmem:[%s1781_s1 + $0x7c8] sm:$0xff] %v843_v25 }
  0xd2   :  { %853 = vst [vmem:[%s1781_s1 + $0xd0] sm:$0xff] %v852_v26 }
  0xd3   :  { %854 = vst [vmem:[%s1781_s1 + $0x1d0] sm:$0xff] %v852_v26 }
  0xd4   :  { %855 = vst [vmem:[%s1781_s1 + $0x2d0] sm:$0xff] %v852_v26 }
  0xd5   :  { %856 = vst [vmem:[%s1781_s1 + $0x3d0] sm:$0xff] %v852_v26 }
  0xd6   :  { %857 = vst [vmem:[%s1781_s1 + $0x4d0] sm:$0xff] %v852_v26 }
  0xd7   :  { %858 = vst [vmem:[%s1781_s1 + $0x5d0] sm:$0xff] %v852_v26 }
  0xd8   :  { %859 = vst [vmem:[%s1781_s1 + $0x6d0] sm:$0xff] %v852_v26 }
  0xd9   :  { %860 = vst [vmem:[%s1781_s1 + $0x7d0] sm:$0xff] %v852_v26 }
  0xda   :  { %862 = vst [vmem:[%s1781_s1 + $0xd8] sm:$0xff] %v861_v27 }
  0xdb   :  { %863 = vst [vmem:[%s1781_s1 + $0x1d8] sm:$0xff] %v861_v27 }
  0xdc   :  { %864 = vst [vmem:[%s1781_s1 + $0x2d8] sm:$0xff] %v861_v27 }
  0xdd   :  { %865 = vst [vmem:[%s1781_s1 + $0x3d8] sm:$0xff] %v861_v27 }
  0xde   :  { %866 = vst [vmem:[%s1781_s1 + $0x4d8] sm:$0xff] %v861_v27 }
  0xdf   :  { %867 = vst [vmem:[%s1781_s1 + $0x5d8] sm:$0xff] %v861_v27 }
  0xe0   :  { %868 = vst [vmem:[%s1781_s1 + $0x6d8] sm:$0xff] %v861_v27 }
  0xe1   :  { %869 = vst [vmem:[%s1781_s1 + $0x7d8] sm:$0xff] %v861_v27 }
  0xe2   :  { %871 = vst [vmem:[%s1781_s1 + $0xe0] sm:$0xff] %v870_v28 }
  0xe3   :  { %872 = vst [vmem:[%s1781_s1 + $0x1e0] sm:$0xff] %v870_v28 }
  0xe4   :  { %873 = vst [vmem:[%s1781_s1 + $0x2e0] sm:$0xff] %v870_v28 }
  0xe5   :  { %874 = vst [vmem:[%s1781_s1 + $0x3e0] sm:$0xff] %v870_v28 }
  0xe6   :  { %875 = vst [vmem:[%s1781_s1 + $0x4e0] sm:$0xff] %v870_v28 }
  0xe7   :  { %876 = vst [vmem:[%s1781_s1 + $0x5e0] sm:$0xff] %v870_v28 }
  0xe8   :  { %877 = vst [vmem:[%s1781_s1 + $0x6e0] sm:$0xff] %v870_v28 }
  0xe9   :  { %878 = vst [vmem:[%s1781_s1 + $0x7e0] sm:$0xff] %v870_v28 }
  0xea   :  { %880 = vst [vmem:[%s1781_s1 + $0xe8] sm:$0xff] %v879_v29 }
  0xeb   :  { %881 = vst [vmem:[%s1781_s1 + $0x1e8] sm:$0xff] %v879_v29 }
  0xec   :  { %882 = vst [vmem:[%s1781_s1 + $0x2e8] sm:$0xff] %v879_v29 }
  0xed   :  { %883 = vst [vmem:[%s1781_s1 + $0x3e8] sm:$0xff] %v879_v29 }
  0xee   :  { %884 = vst [vmem:[%s1781_s1 + $0x4e8] sm:$0xff] %v879_v29 }
  0xef   :  { %885 = vst [vmem:[%s1781_s1 + $0x5e8] sm:$0xff] %v879_v29 }
  0xf0   :  { %886 = vst [vmem:[%s1781_s1 + $0x6e8] sm:$0xff] %v879_v29 }
  0xf1   :  { %887 = vst [vmem:[%s1781_s1 + $0x7e8] sm:$0xff] %v879_v29 }
  0xf2   :  { %889 = vst [vmem:[%s1781_s1 + $0xf0] sm:$0xff] %v888_v30 }
  0xf3   :  { %890 = vst [vmem:[%s1781_s1 + $0x1f0] sm:$0xff] %v888_v30 }
  0xf4   :  { %891 = vst [vmem:[%s1781_s1 + $0x2f0] sm:$0xff] %v888_v30 }
  0xf5   :  { %892 = vst [vmem:[%s1781_s1 + $0x3f0] sm:$0xff] %v888_v30 }
  0xf6   :  { %893 = vst [vmem:[%s1781_s1 + $0x4f0] sm:$0xff] %v888_v30 }
  0xf7   :  { %894 = vst [vmem:[%s1781_s1 + $0x5f0] sm:$0xff] %v888_v30 }
  0xf8   :  { %895 = vst [vmem:[%s1781_s1 + $0x6f0] sm:$0xff] %v888_v30 }
  0xf9   :  { %896 = vst [vmem:[%s1781_s1 + $0x7f0] sm:$0xff] %v888_v30 }
  0xfa   :  { %898 = vst [vmem:[%s1781_s1 + $0xf8] sm:$0xff] %v897_v31 }
  0xfb   :  { %899 = vst [vmem:[%s1781_s1 + $0x1f8] sm:$0xff] %v897_v31 }
  0xfc   :  { %900 = vst [vmem:[%s1781_s1 + $0x2f8] sm:$0xff] %v897_v31 }
  0xfd   :  { %901 = vst [vmem:[%s1781_s1 + $0x3f8] sm:$0xff] %v897_v31 }
  0xfe   :  { %902 = vst [vmem:[%s1781_s1 + $0x4f8] sm:$0xff] %v897_v31 }
  0xff   :  { %903 = vst [vmem:[%s1781_s1 + $0x5f8] sm:$0xff] %v897_v31 }
 0x100   :  { %904 = vst [vmem:[%s1781_s1 + $0x6f8] sm:$0xff] %v897_v31 }
 0x101   :  { %905 = vst [vmem:[%s1781_s1 + $0x7f8] sm:$0xff] %v897_v31 }

// kernel: tile.25
= control target key start
LH: loop header
LB: loop body
LE: loop exit
PB: predicated region body
PF: predicated region fallthrough
CT: control target
= control target key end

     0   :  { %vm708_vm0 = vcmask 1047556   ;;  %s3707_s14 = smov 96   ;;  %vm3_vm1 = vcmask 261120   ;;  %vm712_vm2 = vcmask 1048320   ;;  %s3708_s27 = smov 64   ;;  %vm1415_vm3 = vcmask 785920   ;;  %s7480_s0 = inlined_call_operand.vmem [shape: f32[8,32,8,32], index: 0, kind: input, shape index: {}]   ;;  %s7481_s1 = inlined_call_operand.vmem [shape: f32[256,256], index: 1, kind: output, shape index: {}]  }
   0x1   :  { %v3136_v0 = vld [vmem:[%s7480_s0 + $0x103] ss:$8 sm:$0xf]   ;;  %v3178_v44 = vld [vmem:[%s7480_s0 + $0x7] ss:$8 sm:$0xf]  }
   0x2   :  { %v3137_v1 = vld [vmem:[%s7480_s0 + $0x103] ss:$8 sm:$0xf0]   ;;  %v3179_v45 = vld [vmem:[%s7480_s0 + $0x7] ss:$8 sm:$0xf0]  }
   0x3   :  { %v730_v2 = vsel %vm708_vm0, %v3137_v1, %v3136_v0  ;;  %v3131_v3 = vld [vmem:[%s7480_s0 + $0x3] ss:$8 sm:$0xf]   ;;  %v884_v49 = vsel %vm708_vm0, %v3179_v45, %v3178_v44  ;;  %v3181_v51 = vld [vmem:[%s7480_s0 + $0x87] ss:$8 sm:$0xf]  }
   0x4   :  { %v3132_v4 = vld [vmem:[%s7480_s0 + $0x3] ss:$8 sm:$0xf0]   ;;  %731 = vrot.lane.b32.xlu1 %v730_v2, %s3707_s14  ;;  %v3182_v52 = vld [vmem:[%s7480_s0 + $0x87] ss:$8 sm:$0xf0]  }
   0x5   :  { %v709_v5 = vsel %vm708_vm0, %v3132_v4, %v3131_v3  ;;  %v3139_v6 = vld [vmem:[%s7480_s0 + $0x183] ss:$8 sm:$0xf]   ;;  %v3187_v53 = vld [vmem:[%s7480_s0 + $0x187] ss:$8 sm:$0xf]   ;;  %v895_v57 = vsel %vm708_vm0, %v3182_v52, %v3181_v51 }
   0x6   :  { %710 = vrot.lane.b32.xlu0 %v709_v5, %s3707_s14  ;;  %v3140_v7 = vld [vmem:[%s7480_s0 + $0x183] ss:$8 sm:$0xf0]   ;;  %v3188_v54 = vld [vmem:[%s7480_s0 + $0x187] ss:$8 sm:$0xf0]  }
   0x7   :  { %v3133_v8 = vld [vmem:[%s7480_s0 + $0x83] ss:$8 sm:$0xf]   ;;  %v741_v12 = vsel %vm708_vm0, %v3140_v7, %v3139_v6  ;;  %v3184_v55 = vld [vmem:[%s7480_s0 + $0x107] ss:$8 sm:$0xf]   ;;  %v917_v58 = vsel %vm708_vm0, %v3188_v54, %v3187_v53 }
   0x8   :  { %v3134_v9 = vld [vmem:[%s7480_s0 + $0x83] ss:$8 sm:$0xf0]   ;;  %v3185_v56 = vld [vmem:[%s7480_s0 + $0x107] ss:$8 sm:$0xf0]  }
   0x9   :  { %v3142_v10 = vld [vmem:[%s7480_s0 + $0x203] ss:$8 sm:$0xf]   ;;  %v719_v14 = vsel %vm708_vm0, %v3134_v9, %v3133_v8  ;;  %v906_v59 = vsel %vm708_vm0, %v3185_v56, %v3184_v55  ;;  %v3190_v60 = vld [vmem:[%s7480_s0 + $0x207] ss:$8 sm:$0xf]  }
   0xa   :  { %v3143_v11 = vld [vmem:[%s7480_s0 + $0x203] ss:$8 sm:$0xf0]   ;;  %v3191_v61 = vld [vmem:[%s7480_s0 + $0x207] ss:$8 sm:$0xf0]  }
   0xb   :  { %v752_v13 = vsel %vm708_vm0, %v3143_v11, %v3142_v10  ;;  %v3145_v15 = vld [vmem:[%s7480_s0 + $0x283] ss:$8 sm:$0xf]   ;;  %v3196_v62 = vld [vmem:[%s7480_s0 + $0x307] ss:$8 sm:$0xf]   ;;  %v928_v2 = vsel %vm708_vm0, %v3191_v61, %v3190_v60 }
   0xc   :  { %753 = vrot.lane.b32.xlu2 %v752_v13, %s3707_s14  ;;  %742 = vrot.lane.b32.xlu1 %v741_v12, %s3707_s14  ;;  %v3146_v16 = vld [vmem:[%s7480_s0 + $0x283] ss:$8 sm:$0xf0]   ;;  %v3197_v63 = vld [vmem:[%s7480_s0 + $0x307] ss:$8 sm:$0xf0]  }
   0xd   :  { %v3151_v17 = vld [vmem:[%s7480_s0 + $0x383] ss:$8 sm:$0xf]   ;;  %v763_v21 = vsel %vm708_vm0, %v3146_v16, %v3145_v15  ;;  %v3193_v0 = vld [vmem:[%s7480_s0 + $0x287] ss:$8 sm:$0xf]   ;;  %v950_v3 = vsel %vm708_vm0, %v3197_v63, %v3196_v62 }
   0xe   :  { %720 = vrot.lane.b32.xlu0 %v719_v14, %s3707_s14  ;;  %v3152_v18 = vld [vmem:[%s7480_s0 + $0x383] ss:$8 sm:$0xf0]   ;;  %v3194_v1 = vld [vmem:[%s7480_s0 + $0x287] ss:$8 sm:$0xf0]  }
   0xf   :  { %v3148_v19 = vld [vmem:[%s7480_s0 + $0x303] ss:$8 sm:$0xf]   ;;  %v785_v22 = vsel %vm708_vm0, %v3152_v18, %v3151_v17  ;;  %v939_v4 = vsel %vm708_vm0, %v3194_v1, %v3193_v0  ;;  %v3199_v5 = vld [vmem:[%s7480_s0 + $0x387] ss:$8 sm:$0xf]  }
  0x10   :  { %v3149_v20 = vld [vmem:[%s7480_s0 + $0x303] ss:$8 sm:$0xf0]   ;;  %v3200_v6 = vld [vmem:[%s7480_s0 + $0x387] ss:$8 sm:$0xf0]  }
  0x11   :  { %v774_v23 = vsel %vm708_vm0, %v3149_v20, %v3148_v19  ;;  %v3154_v24 = vld [vmem:[%s7480_s0 + $0x403] ss:$8 sm:$0xf]   ;;  %v3205_v7 = vld [vmem:[%s7480_s0 + $0x487] ss:$8 sm:$0xf]   ;;  %v961_v11 = vsel %vm708_vm0, %v3200_v6, %v3199_v5 }
  0x12   :  { %v3155_v25 = vld [vmem:[%s7480_s0 + $0x403] ss:$8 sm:$0xf0]   ;;  %v3206_v8 = vld [vmem:[%s7480_s0 + $0x487] ss:$8 sm:$0xf0]  }
  0x13   :  { %v3160_v26 = vld [vmem:[%s7480_s0 + $0x503] ss:$8 sm:$0xf]   ;;  %v796_v30 = vsel %vm708_vm0, %v3155_v25, %v3154_v24  ;;  %v3202_v9 = vld [vmem:[%s7480_s0 + $0x407] ss:$8 sm:$0xf]   ;;  %v983_v12 = vsel %vm708_vm0, %v3206_v8, %v3205_v7 }
  0x14   :  { %764 = vrot.lane.b32.xlu2 %v763_v21, %s3707_s14  ;;  %786 = vrot.lane.b32.xlu1 %v785_v22, %s3707_s14  ;;  %v3161_v27 = vld [vmem:[%s7480_s0 + $0x503] ss:$8 sm:$0xf0]   ;;  %v3203_v10 = vld [vmem:[%s7480_s0 + $0x407] ss:$8 sm:$0xf0]  }
  0x15   :  { %v3157_v28 = vld [vmem:[%s7480_s0 + $0x483] ss:$8 sm:$0xf]   ;;  %v818_v31 = vsel %vm708_vm0, %v3161_v27, %v3160_v26  ;;  %v972_v13 = vsel %vm708_vm0, %v3203_v10, %v3202_v9  ;;  %v3208_v14 = vld [vmem:[%s7480_s0 + $0x507] ss:$8 sm:$0xf]  }
  0x16   :  { %775 = vrot.lane.b32.xlu0 %v774_v23, %s3707_s14  ;;  %v3158_v29 = vld [vmem:[%s7480_s0 + $0x483] ss:$8 sm:$0xf0]   ;;  %v3209_v15 = vld [vmem:[%s7480_s0 + $0x507] ss:$8 sm:$0xf0]  }
  0x17   :  { %v807_v32 = vsel %vm708_vm0, %v3158_v29, %v3157_v28  ;;  %v3163_v33 = vld [vmem:[%s7480_s0 + $0x583] ss:$8 sm:$0xf]   ;;  %v3214_v16 = vld [vmem:[%s7480_s0 + $0x607] ss:$8 sm:$0xf]   ;;  %v994_v20 = vsel %vm708_vm0, %v3209_v15, %v3208_v14 }
  0x18   :  { %v3164_v34 = vld [vmem:[%s7480_s0 + $0x583] ss:$8 sm:$0xf0]   ;;  %v3215_v17 = vld [vmem:[%s7480_s0 + $0x607] ss:$8 sm:$0xf0]  }
  0x19   :  { %v3169_v35 = vld [vmem:[%s7480_s0 + $0x683] ss:$8 sm:$0xf]   ;;  %v829_v39 = vsel %vm708_vm0, %v3164_v34, %v3163_v33  ;;  %v3211_v18 = vld [vmem:[%s7480_s0 + $0x587] ss:$8 sm:$0xf]   ;;  %v1016_v21 = vsel %vm708_vm0, %v3215_v17, %v3214_v16 }
  0x1a   :  { %v3170_v36 = vld [vmem:[%s7480_s0 + $0x683] ss:$8 sm:$0xf0]   ;;  %v3212_v19 = vld [vmem:[%s7480_s0 + $0x587] ss:$8 sm:$0xf0]  }
  0x1b   :  { %v3166_v37 = vld [vmem:[%s7480_s0 + $0x603] ss:$8 sm:$0xf]   ;;  %v851_v40 = vsel %vm708_vm0, %v3170_v36, %v3169_v35  ;;  %v1005_v22 = vsel %vm708_vm0, %v3212_v19, %v3211_v18  ;;  %v3217_v23 = vld [vmem:[%s7480_s0 + $0x687] ss:$8 sm:$0xf]  }
  0x1c   :  { %797 = vrot.lane.b32.xlu2 %v796_v30, %s3707_s14  ;;  %819 = vrot.lane.b32.xlu1 %v818_v31, %s3707_s14  ;;  %v3167_v38 = vld [vmem:[%s7480_s0 + $0x603] ss:$8 sm:$0xf0]   ;;  %v3218_v24 = vld [vmem:[%s7480_s0 + $0x687] ss:$8 sm:$0xf0]  }
  0x1d   :  { %v840_v41 = vsel %vm708_vm0, %v3167_v38, %v3166_v37  ;;  %v3172_v42 = vld [vmem:[%s7480_s0 + $0x703] ss:$8 sm:$0xf]   ;;  %v3223_v25 = vld [vmem:[%s7480_s0 + $0x787] ss:$8 sm:$0xf]   ;;  %v1027_v29 = vsel %vm708_vm0, %v3218_v24, %v3217_v23 }
  0x1e   :  { %808 = vrot.lane.b32.xlu0 %v807_v32, %s3707_s14  ;;  %v3173_v43 = vld [vmem:[%s7480_s0 + $0x703] ss:$8 sm:$0xf0]   ;;  %v3224_v26 = vld [vmem:[%s7480_s0 + $0x787] ss:$8 sm:$0xf0]  }
  0x1f   :  { %v3175_v46 = vld [vmem:[%s7480_s0 + $0x783] ss:$8 sm:$0xf]   ;;  %v862_v48 = vsel %vm708_vm0, %v3173_v43, %v3172_v42  ;;  %v3220_v27 = vld [vmem:[%s7480_s0 + $0x707] ss:$8 sm:$0xf]   ;;  %v1049_v30 = vsel %vm708_vm0, %v3224_v26, %v3223_v25 }
  0x20   :  { %v3176_v47 = vld [vmem:[%s7480_s0 + $0x783] ss:$8 sm:$0xf0]   ;;  %v3221_v28 = vld [vmem:[%s7480_s0 + $0x707] ss:$8 sm:$0xf0]  }
  0x21   :  { %v873_v50 = vsel %vm708_vm0, %v3176_v47, %v3175_v46  ;;  %v1038_v31 = vsel %vm708_vm0, %v3221_v28, %v3220_v27  ;;  %v3226_v32 = vld [vmem:[%s7480_s0 + $0x43] ss:$8 sm:$0xf]   ;;  %v2831_v46 = vld [vmem:[%s7480_s0 + $0x80] ss:$4 sm:$0xff]   ;;  %s3709_s7 = smov 32  }
  0x22   :  { %v3227_v33 = vld [vmem:[%s7480_s0 + $0x43] ss:$8 sm:$0xf0]   ;;  %2832 = vst.msk [vmem:[%s7481_s1 + $0x20] ss:$8 sm:$0x3] %vm3_vm1, %v2831_v46  }
  0x23   :  { %v3232_v34 = vld [vmem:[%s7480_s0 + $0x143] ss:$8 sm:$0xf]   ;;  %v1060_v38 = vsel %vm708_vm0, %v3227_v33, %v3226_v32  ;;  %2833 = vst.msk [vmem:[%s7481_s1 + $0x11] ss:$8 sm:$0xc] %vm3_vm1, %v2831_v46  }
  0x24   :  { %830 = vrot.lane.b32.xlu2 %v829_v39, %s3707_s14  ;;  %852 = vrot.lane.b32.xlu1 %v851_v40, %s3707_s14  ;;  %v3233_v35 = vld [vmem:[%s7480_s0 + $0x143] ss:$8 sm:$0xf0]   ;;  %v2_v40 = vld [vmem:[%s7480_s0] ss:$4 sm:$0xff]   ;;  %vm2118_vm4 = vcmask 523520  }
  0x25   :  { %v3229_v36 = vld [vmem:[%s7480_s0 + $0xc3] ss:$8 sm:$0xf]   ;;  %v1082_v39 = vsel %vm708_vm0, %v3233_v35, %v3232_v34  ;;  %4 = vst.msk [vmem:[%s7481_s1] ss:$8 sm:$0x3] %vm3_vm1, %v2_v40  }
  0x26   :  { %841 = vrot.lane.b32.xlu0 %v840_v41, %s3707_s14  ;;  %v3230_v37 = vld [vmem:[%s7480_s0 + $0xc3] ss:$8 sm:$0xf0]   ;;  %2813 = vst.msk [vmem:[%s7481_s1 - $0xf] ss:$8 sm:$0xc] %vm3_vm1, %v2_v40  }
  0x27   :  { %v1071_v41 = vsel %vm708_vm0, %v3230_v37, %v3229_v36  ;;  %v3235_v42 = vld [vmem:[%s7480_s0 + $0x1c3] ss:$8 sm:$0xf]   ;;  %2814 = vst.msk [vmem:[%s7481_s1 - $0x1e] ss:$8 sm:$0x30] %vm3_vm1, %v2_v40  }
  0x28   :  { %v3236_v43 = vld [vmem:[%s7480_s0 + $0x1c3] ss:$8 sm:$0xf0]   ;;  %v2836_v53 = vld [vmem:[%s7480_s0 + $0xa0] ss:$4 sm:$0xff]  }
  0x29   :  { %v3241_v44 = vld [vmem:[%s7480_s0 + $0x2c3] ss:$8 sm:$0xf]   ;;  %2834 = vst.msk [vmem:[%s7481_s1 + $0x2] ss:$8 sm:$0x30] %vm3_vm1, %v2831_v46  }
  0x2a   :  { %v3242_v45 = vld [vmem:[%s7480_s0 + $0x2c3] ss:$8 sm:$0xf0]   ;;  %2835 = vst.msk [vmem:[%s7481_s1 - $0xd] ss:$8 sm:$0xc0] %vm3_vm1, %v2831_v46  }
  0x2b   :  { %v3238_v47 = vld [vmem:[%s7480_s0 + $0x243] ss:$8 sm:$0xf]   ;;  %2837 = vst.msk [vmem:[%s7481_s1 + $0x24] ss:$8 sm:$0x3] %vm3_vm1, %v2836_v53  }
  0x2c   :  { %863 = vrot.lane.b32.xlu2 %v862_v48, %s3707_s14  ;;  %885 = vrot.lane.b32.xlu1 %v884_v49, %s3707_s14  ;;  %v3239_v48 = vld [vmem:[%s7480_s0 + $0x243] ss:$8 sm:$0xf0]   ;;  %v1093_v49 = vsel %vm708_vm0, %v3236_v43, %v3235_v42  ;;  %2838 = vst.msk [vmem:[%s7481_s1 + $0x15] ss:$8 sm:$0xc] %vm3_vm1, %v2836_v53  }
  0x2d   :  { %v1104_v51 = vsel %vm708_vm0, %v3239_v48, %v3238_v47  ;;  %v3244_v52 = vld [vmem:[%s7480_s0 + $0x343] ss:$8 sm:$0xf]   ;;  %2839 = vst.msk [vmem:[%s7481_s1 + $0x6] ss:$8 sm:$0x30] %vm3_vm1, %v2836_v53  }
  0x2e   :  { %874 = vrot.lane.b32.xlu0 %v873_v50, %s3707_s14  ;;  %v1115_v50 = vsel %vm708_vm0, %v3242_v45, %v3241_v44  ;;  %v3245_v55 = vld [vmem:[%s7480_s0 + $0x343] ss:$8 sm:$0xf0]   ;;  %v2816_v0 = vld [vmem:[%s7480_s0 + $0x20] ss:$4 sm:$0xff]  }
  0x2f   :  { %v3250_v56 = vld [vmem:[%s7480_s0 + $0x443] ss:$8 sm:$0xf]   ;;  %v1126_v60 = vsel %vm708_vm0, %v3245_v55, %v3244_v52  ;;  %2840 = vst.msk [vmem:[%s7481_s1 - $0x9] ss:$8 sm:$0xc0] %vm3_vm1, %v2836_v53  }
  0x30   :  { %v3253_v63 = vld [vmem:[%s7480_s0 + $0x4c3] ss:$8 sm:$0xf]   ;;  %2815 = vst.msk [vmem:[%s7481_s1 - $0x2d] ss:$8 sm:$0xc0] %vm3_vm1, %v2_v40  }
  0x31   :  { %2817 = vst.msk [vmem:[%s7481_s1 + $0x4] ss:$8 sm:$0x3] %vm3_vm1, %v2816_v0   ;;  %v3256_v5 = vld [vmem:[%s7480_s0 + $0x543] ss:$8 sm:$0xf]  }
  0x32   :  { %v3257_v6 = vld [vmem:[%s7480_s0 + $0x543] ss:$8 sm:$0xf0]   ;;  %2818 = vst.msk [vmem:[%s7481_s1 - $0xb] ss:$8 sm:$0xc] %vm3_vm1, %v2816_v0  }
  0x33   :  { %v1170_v9 = vsel %vm708_vm0, %v3257_v6, %v3256_v5  ;;  %2819 = vst.msk [vmem:[%s7481_s1 - $0x1a] ss:$8 sm:$0x30] %vm3_vm1, %v2816_v0   ;;  %v2891_v10 = vld [vmem:[%s7480_s0 + $0x200] ss:$4 sm:$0xff]  }
  0x34   :  { %896 = vrot.lane.b32.xlu2 %v895_v57, %s3707_s14  ;;  %918 = vrot.lane.b32.xlu1 %v917_v58, %s3707_s14  ;;  %v3251_v57 = vld [vmem:[%s7480_s0 + $0x443] ss:$8 sm:$0xf0]   ;;  %2820 = vst.msk [vmem:[%s7481_s1 - $0x29] ss:$8 sm:$0xc0] %vm3_vm1, %v2816_v0  }
  0x35   :  { %v3247_v58 = vld [vmem:[%s7480_s0 + $0x3c3] ss:$8 sm:$0xf]   ;;  %v1148_v61 = vsel %vm708_vm0, %v3251_v57, %v3250_v56  ;;  %2892 = vst.msk [vmem:[%s7481_s1 + $0x80] ss:$8 sm:$0x3] %vm3_vm1, %v2891_v10  }
  0x36   :  { %907 = vrot.lane.b32.xlu0 %v906_v59, %s3707_s14  ;;  %v3248_v59 = vld [vmem:[%s7480_s0 + $0x3c3] ss:$8 sm:$0xf0]   ;;  %2893 = vst.msk [vmem:[%s7481_s1 + $0x71] ss:$8 sm:$0xc] %vm3_vm1, %v2891_v10  }
  0x37   :  { %v1137_v62 = vsel %vm708_vm0, %v3248_v59, %v3247_v58  ;;  %v3263_v14 = vld [vmem:[%s7480_s0 + $0x643] ss:$8 sm:$0xf0]   ;;  %2894 = vst.msk [vmem:[%s7481_s1 + $0x62] ss:$8 sm:$0x30] %vm3_vm1, %v2891_v10  }
  0x38   :  { %v3269_v15 = vld [vmem:[%s7480_s0 + $0x743] ss:$8 sm:$0xf0]   ;;  %v2896_v23 = vld [vmem:[%s7480_s0 + $0x220] ss:$4 sm:$0xff]  }
  0x39   :  { %v3265_v18 = vld [vmem:[%s7480_s0 + $0x6c3] ss:$8 sm:$0xf]   ;;  %2895 = vst.msk [vmem:[%s7481_s1 + $0x53] ss:$8 sm:$0xc0] %vm3_vm1, %v2891_v10  }
  0x3a   :  { %v3266_v19 = vld [vmem:[%s7480_s0 + $0x6c3] ss:$8 sm:$0xf0]   ;;  %v3277_v27 = vld [vmem:[%s7480_s0 + $0xc7] ss:$8 sm:$0xf]  }
  0x3b   :  { %v3271_v24 = vld [vmem:[%s7480_s0 + $0x7c3] ss:$8 sm:$0xf]   ;;  %2897 = vst.msk [vmem:[%s7481_s1 + $0x84] ss:$8 sm:$0x3] %vm3_vm1, %v2896_v23  }
  0x3c   :  { %929 = vrot.lane.b32.xlu2 %v928_v2, %s3707_s14  ;;  %951 = vrot.lane.b32.xlu1 %v950_v3, %s3707_s14  ;;  %v3254_v2 = vld [vmem:[%s7480_s0 + $0x4c3] ss:$8 sm:$0xf0]   ;;  %2898 = vst.msk [vmem:[%s7481_s1 + $0x75] ss:$8 sm:$0xc] %vm3_vm1, %v2896_v23  }
  0x3d   :  { %v3259_v3 = vld [vmem:[%s7480_s0 + $0x5c3] ss:$8 sm:$0xf]   ;;  %v1159_v7 = vsel %vm708_vm0, %v3254_v2, %v3253_v63  ;;  %v3275_v32 = vld [vmem:[%s7480_s0 + $0x47] ss:$8 sm:$0xf0]  }
  0x3e   :  { %940 = vrot.lane.b32.xlu0 %v939_v4, %s3707_s14  ;;  %v3260_v4 = vld [vmem:[%s7480_s0 + $0x5c3] ss:$8 sm:$0xf0]   ;;  %2899 = vst.msk [vmem:[%s7481_s1 + $0x66] ss:$8 sm:$0x30] %vm3_vm1, %v2896_v23  }
  0x3f   :  { %v1181_v8 = vsel %vm708_vm0, %v3260_v4, %v3259_v3  ;;  %v3272_v26 = vld [vmem:[%s7480_s0 + $0x7c3] ss:$8 sm:$0xf0]   ;;  %v3280_v36 = vld [vmem:[%s7480_s0 + $0x147] ss:$8 sm:$0xf]  }
  0x40   :  { %v1225_v33 = vsel %vm708_vm0, %v3272_v26, %v3271_v24  ;;  %v2871_v37 = vld [vmem:[%s7480_s0 + $0x180] ss:$4 sm:$0xff]   ;;  %2900 = vst.msk [vmem:[%s7481_s1 + $0x57] ss:$8 sm:$0xc0] %vm3_vm1, %v2896_v23  }
  0x41   :  { %v3286_v40 = vld [vmem:[%s7480_s0 + $0x247] ss:$8 sm:$0xf]   ;;  %2872 = vst.msk [vmem:[%s7481_s1 + $0x60] ss:$8 sm:$0x3] %vm3_vm1, %v2871_v37  }
  0x42   :  { %v3287_v42 = vld [vmem:[%s7480_s0 + $0x247] ss:$8 sm:$0xf0]   ;;  %2873 = vst.msk [vmem:[%s7481_s1 + $0x51] ss:$8 sm:$0xc] %vm3_vm1, %v2871_v37  }
  0x43   :  { %v3283_v44 = vld [vmem:[%s7480_s0 + $0x1c7] ss:$8 sm:$0xf]   ;;  %v1280_v47 = vsel %vm708_vm0, %v3287_v42, %v3286_v40  ;;  %2874 = vst.msk [vmem:[%s7481_s1 + $0x42] ss:$8 sm:$0x30] %vm3_vm1, %v2871_v37  }
  0x44   :  { %962 = vrot.lane.b32.xlu2 %v961_v11, %s3707_s14  ;;  %984 = vrot.lane.b32.xlu1 %v983_v12, %s3707_s14  ;;  %v3262_v11 = vld [vmem:[%s7480_s0 + $0x643] ss:$8 sm:$0xf]   ;;  %v3284_v45 = vld [vmem:[%s7480_s0 + $0x1c7] ss:$8 sm:$0xf0]  }
  0x45   :  { %v3268_v12 = vld [vmem:[%s7480_s0 + $0x743] ss:$8 sm:$0xf]   ;;  %v1269_v48 = vsel %vm708_vm0, %v3284_v45, %v3283_v44  ;;  %v3290_v52 = vld [vmem:[%s7480_s0 + $0x2c7] ss:$8 sm:$0xf0]  }
  0x46   :  { %973 = vrot.lane.b32.xlu0 %v972_v13, %s3707_s14  ;;  %2875 = vst.msk [vmem:[%s7481_s1 + $0x33] ss:$8 sm:$0xc0] %vm3_vm1, %v2871_v37   ;;  %v3295_v53 = vld [vmem:[%s7480_s0 + $0x3c7] ss:$8 sm:$0xf]  }
  0x47   :  { %v3296_v55 = vld [vmem:[%s7480_s0 + $0x3c7] ss:$8 sm:$0xf0]   ;;  %v2851_v5 = vld [vmem:[%s7480_s0 + $0x100] ss:$4 sm:$0xff]  }
  0x48   :  { %v3292_v57 = vld [vmem:[%s7480_s0 + $0x347] ss:$8 sm:$0xf]   ;;  %2852 = vst.msk [vmem:[%s7481_s1 + $0x40] ss:$8 sm:$0x3] %vm3_vm1, %v2851_v5  }
  0x49   :  { %v3293_v58 = vld [vmem:[%s7480_s0 + $0x347] ss:$8 sm:$0xf0]   ;;  %2853 = vst.msk [vmem:[%s7481_s1 + $0x31] ss:$8 sm:$0xc] %vm3_vm1, %v2851_v5  }
  0x4a   :  { %v3299_v0 = vld [vmem:[%s7480_s0 + $0x447] ss:$8 sm:$0xf0]   ;;  %2854 = vst.msk [vmem:[%s7481_s1 + $0x22] ss:$8 sm:$0x30] %vm3_vm1, %v2851_v5  }
  0x4b   :  { %v3304_v2 = vld [vmem:[%s7480_s0 + $0x547] ss:$8 sm:$0xf]   ;;  %2855 = vst.msk [vmem:[%s7481_s1 + $0x13] ss:$8 sm:$0xc0] %vm3_vm1, %v2851_v5  }
  0x4c   :  { %995 = vrot.lane.b32.xlu2 %v994_v20, %s3707_s14  ;;  %1017 = vrot.lane.b32.xlu1 %v1016_v21, %s3707_s14  ;;  %v1192_v20 = vsel %vm708_vm0, %v3263_v14, %v3262_v11  ;;  %v1214_v21 = vsel %vm708_vm0, %v3269_v15, %v3268_v12  ;;  %v3305_v4 = vld [vmem:[%s7480_s0 + $0x547] ss:$8 sm:$0xf0]   ;;  %v2856_v14 = vld [vmem:[%s7480_s0 + $0x120] ss:$4 sm:$0xff]  }
  0x4d   :  { %v1346_v10 = vsel %vm708_vm0, %v3305_v4, %v3304_v2  ;;  %v3307_v12 = vld [vmem:[%s7480_s0 + $0x5c7] ss:$8 sm:$0xf]   ;;  %2857 = vst.msk [vmem:[%s7481_s1 + $0x44] ss:$8 sm:$0x3] %vm3_vm1, %v2856_v14  }
  0x4e   :  { %1006 = vrot.lane.b32.xlu0 %v1005_v22, %s3707_s14  ;;  %v1203_v22 = vsel %vm708_vm0, %v3266_v19, %v3265_v18  ;;  %v3313_v18 = vld [vmem:[%s7480_s0 + $0x6c7] ss:$8 sm:$0xf]   ;;  %2858 = vst.msk [vmem:[%s7481_s1 + $0x35] ss:$8 sm:$0xc] %vm3_vm1, %v2856_v14  }
  0x4f   :  { %v3311_v23 = vld [vmem:[%s7480_s0 + $0x647] ss:$8 sm:$0xf0]   ;;  %2859 = vst.msk [vmem:[%s7481_s1 + $0x26] ss:$8 sm:$0x30] %vm3_vm1, %v2856_v14  }
  0x50   :  { %2860 = vst.msk [vmem:[%s7481_s1 + $0x17] ss:$8 sm:$0xc0] %vm3_vm1, %v2856_v14   ;;  %v3324_v42 = vld [vmem:[%s7480_s0 + $0x82] ss:$8 sm:$0xf]  }
  0x51   :  { %v3330_v44 = vld [vmem:[%s7480_s0 + $0x182] ss:$8 sm:$0xf]  }
  0x52   :  { %v3336_v2 = vld [vmem:[%s7480_s0 + $0x282] ss:$8 sm:$0xf]  }
  0x53   :  { %v3337_v4 = vld [vmem:[%s7480_s0 + $0x282] ss:$8 sm:$0xf0]  }
  0x54   :  { %1028 = vrot.lane.b32.xlu2 %v1027_v29, %s3707_s14  ;;  %1050 = vrot.lane.b32.xlu1 %v1049_v30, %s3707_s14  ;;  %v3278_v29 = vld [vmem:[%s7480_s0 + $0xc7] ss:$8 sm:$0xf0]   ;;  %v3349_v14 = vld [vmem:[%s7480_s0 + $0x482] ss:$8 sm:$0xf0]  }
  0x55   :  { %v1247_v34 = vsel %vm708_vm0, %v3278_v29, %v3277_v27 }
  0x56   :  { %1039 = vrot.lane.b32.xlu0 %v1038_v31, %s3707_s14  ;;  %v3274_v31 = vld [vmem:[%s7480_s0 + $0x47] ss:$8 sm:$0xf]  }
  0x57   :  { %v1236_v35 = vsel %vm708_vm0, %v3275_v32, %v3274_v31  ;;  %v3322_v31 = vld [vmem:[%s7480_s0 + $0x2] ss:$8 sm:$0xf]  }
  0x5c   :  { %1061 = vrot.lane.b32.xlu2 %v1060_v38, %s3707_s14  ;;  %1083 = vrot.lane.b32.xlu1 %v1082_v39, %s3707_s14  ;;  %v3281_v39 = vld [vmem:[%s7480_s0 + $0x147] ss:$8 sm:$0xf0]  }
  0x5d   :  { %v1258_v46 = vsel %vm708_vm0, %v3281_v39, %v3280_v36  ;;  %v2951_v39 = vld [vmem:[%s7480_s0 + $0x380] ss:$4 sm:$0xff]  }
  0x5e   :  { %1072 = vrot.lane.b32.xlu0 %v1071_v41, %s3707_s14  ;;  %2952 = vst.msk [vmem:[%s7481_s1 + $0xe0] ss:$8 sm:$0x3] %vm3_vm1, %v2951_v39  }
  0x5f   :  { %2953 = vst.msk [vmem:[%s7481_s1 + $0xd1] ss:$8 sm:$0xc] %vm3_vm1, %v2951_v39  }
  0x60   :  { %2954 = vst.msk [vmem:[%s7481_s1 + $0xc2] ss:$8 sm:$0x30] %vm3_vm1, %v2951_v39  }
  0x61   :  { %2955 = vst.msk [vmem:[%s7481_s1 + $0xb3] ss:$8 sm:$0xc0] %vm3_vm1, %v2951_v39   ;;  %v3360_v39 = vld [vmem:[%s7480_s0 + $0x682] ss:$8 sm:$0xf]  }
  0x64   :  { %1094 = vrot.lane.b32.xlu2 %v1093_v49, %s3707_s14  ;;  %1116 = vrot.lane.b32.xlu1 %v1115_v50, %s3707_s14  ;;  %v3289_v49 = vld [vmem:[%s7480_s0 + $0x2c7] ss:$8 sm:$0xf]   ;;  %v2876_v50 = vld [vmem:[%s7480_s0 + $0x1a0] ss:$4 sm:$0xff]  }
  0x65   :  { %2877 = vst.msk [vmem:[%s7481_s1 + $0x64] ss:$8 sm:$0x3] %vm3_vm1, %v2876_v50   ;;  %v1291_v59 = vsel %vm708_vm0, %v3290_v52, %v3289_v49  ;;  %v3327_v49 = vld [vmem:[%s7480_s0 + $0x102] ss:$8 sm:$0xf]  }
  0x66   :  { %v4055_v54 = vpop.permute.xlu2 %753   ;;  %1105 = vrot.lane.b32.xlu0 %v1104_v51, %s3707_s14  ;;  %2878 = vst.msk [vmem:[%s7481_s1 + $0x55] ss:$8 sm:$0xc] %vm3_vm1, %v2876_v50  }
  0x67   :  { %3144 = vst.msk [vmem:[%s7481_s1 + $0x80] sm:$0xff] %vm712_vm2, %v4055_v54  }
  0x68   :  { %2879 = vst.msk [vmem:[%s7481_s1 + $0x46] ss:$8 sm:$0x30] %vm3_vm1, %v2876_v50  }
  0x69   :  { %2880 = vst.msk [vmem:[%s7481_s1 + $0x37] ss:$8 sm:$0xc0] %vm3_vm1, %v2876_v50  }
  0x6c   :  { %1127 = vrot.lane.b32.xlu2 %v1126_v60, %s3707_s14  ;;  %1149 = vrot.lane.b32.xlu1 %v1148_v61, %s3707_s14  ;;  %v1313_v60 = vsel %vm708_vm0, %v3296_v55, %v3295_v53  ;;  %v1302_v61 = vsel %vm708_vm0, %v3293_v58, %v3292_v57  ;;  %v2956_v53 = vld [vmem:[%s7480_s0 + $0x3a0] ss:$4 sm:$0xff]   ;;  %v3333_v58 = vld [vmem:[%s7480_s0 + $0x202] ss:$8 sm:$0xf]  }
  0x6d   :  { %2957 = vst.msk [vmem:[%s7481_s1 + $0xe4] ss:$8 sm:$0x3] %vm3_vm1, %v2956_v53  }
  0x6e   :  { %v4104_v1 = vpop.permute.xlu2 %764   ;;  %1138 = vrot.lane.b32.xlu0 %v1137_v62, %s3707_s14  ;;  %v3298_v62 = vld [vmem:[%s7480_s0 + $0x447] ss:$8 sm:$0xf]   ;;  %2958 = vst.msk [vmem:[%s7481_s1 + $0xd5] ss:$8 sm:$0xc] %vm3_vm1, %v2956_v53  }
  0x6f   :  { %2959 = vst.msk [vmem:[%s7481_s1 + $0xc6] ss:$8 sm:$0x30] %vm3_vm1, %v2956_v53  }
  0x70   :  { %2960 = vst.msk [vmem:[%s7481_s1 + $0xb7] ss:$8 sm:$0xc0] %vm3_vm1, %v2956_v53  }
  0x74   :  { %1160 = vrot.lane.b32.xlu2 %v1159_v7, %s3707_s14  ;;  %1182 = vrot.lane.b32.xlu1 %v1181_v8, %s3707_s14  ;;  %v3301_v7 = vld [vmem:[%s7480_s0 + $0x4c7] ss:$8 sm:$0xf]  }
  0x75   :  { %v3302_v8 = vld [vmem:[%s7480_s0 + $0x4c7] ss:$8 sm:$0xf0]  }
  0x76   :  { %v4156_v13 = vpop.permute.xlu2 %797   ;;  %1171 = vrot.lane.b32.xlu0 %v1170_v9, %s3707_s14  ;;  %v4173_v16 = vpop.permute.xlu1 %731   ;;  %v1324_v9 = vsel %vm708_vm0, %v3299_v0, %v3298_v62  ;;  %v1335_v11 = vsel %vm708_vm0, %v3302_v8, %v3301_v7  ;;  %v1466_v8 = vsel %vm708_vm0, %v3337_v4, %v3336_v2  ;;  %v3376_v4 = vld [vmem:[%s7480_s0 + $0x106] ss:$8 sm:$0xf0]  }
  0x77   :  { %3138 = vst.msk [vmem:[%s7481_s1 + $0x40] sm:$0xff] %vm712_vm2, %v4173_v16  }
  0x78   :  { %v711_v17 = vpop.permute.xlu0 %710  }
  0x79   :  { %713 = vst.msk [vmem:[%s7481_s1] sm:$0xff] %vm712_vm2, %v711_v17   ;;  %v3308_v17 = vld [vmem:[%s7480_s0 + $0x5c7] ss:$8 sm:$0xf0]  }
  0x7a   :  { %v1357_v24 = vsel %vm708_vm0, %v3308_v17, %v3307_v12  ;;  %v3343_v12 = vld [vmem:[%s7480_s0 + $0x382] ss:$8 sm:$0xf0]   ;;  %v2936_v17 = vld [vmem:[%s7480_s0 + $0x320] ss:$4 sm:$0xff]  }
  0x7b   :  { %2937 = vst.msk [vmem:[%s7481_s1 + $0xc4] ss:$8 sm:$0x3] %vm3_vm1, %v2936_v17  }
  0x7c   :  { %1193 = vrot.lane.b32.xlu2 %v1192_v20, %s3707_s14  ;;  %1215 = vrot.lane.b32.xlu1 %v1214_v21, %s3707_s14  ;;  %v3314_v20 = vld [vmem:[%s7480_s0 + $0x6c7] ss:$8 sm:$0xf0]   ;;  %2938 = vst.msk [vmem:[%s7481_s1 + $0xb5] ss:$8 sm:$0xc] %vm3_vm1, %v2936_v17  }
  0x7d   :  { %v1379_v26 = vsel %vm708_vm0, %v3314_v20, %v3313_v18  ;;  %v3346_v20 = vld [vmem:[%s7480_s0 + $0x402] ss:$8 sm:$0xf0]   ;;  %2939 = vst.msk [vmem:[%s7481_s1 + $0xa6] ss:$8 sm:$0x30] %vm3_vm1, %v2936_v17  }
  0x7e   :  { %v4204_v25 = vpop.permute.xlu2 %830   ;;  %1204 = vrot.lane.b32.xlu0 %v1203_v22, %s3707_s14  ;;  %v4221_v28 = vpop.permute.xlu1 %742   ;;  %v3310_v22 = vld [vmem:[%s7480_s0 + $0x647] ss:$8 sm:$0xf]   ;;  %2940 = vst.msk [vmem:[%s7481_s1 + $0x97] ss:$8 sm:$0xc0] %vm3_vm1, %v2936_v17  }
  0x7f   :  { %3141 = vst.msk [vmem:[%s7481_s1 + $0x60] sm:$0xff] %vm712_vm2, %v4221_v28   ;;  %v1368_v27 = vsel %vm708_vm0, %v3311_v23, %v3310_v22  ;;  %v3316_v28 = vld [vmem:[%s7480_s0 + $0x747] ss:$8 sm:$0xf]  }
  0x80   :  { %v721_v30 = vpop.permute.xlu0 %720   ;;  %v3379_v17 = vld [vmem:[%s7480_s0 + $0x186] ss:$8 sm:$0xf0]  }
  0x81   :  { %3135 = vst.msk [vmem:[%s7481_s1 + $0x20] sm:$0xff] %vm712_vm2, %v721_v30   ;;  %v3317_v30 = vld [vmem:[%s7480_s0 + $0x747] ss:$8 sm:$0xf0]  }
  0x82   :  { %v1390_v36 = vsel %vm708_vm0, %v3317_v30, %v3316_v28  ;;  %v3352_v28 = vld [vmem:[%s7480_s0 + $0x502] ss:$8 sm:$0xf0]  }
  0x83   :  { %v3357_v30 = vld [vmem:[%s7480_s0 + $0x602] ss:$8 sm:$0xf]  }
  0x84   :  { %1226 = vrot.lane.b32.xlu2 %v1225_v33, %s3707_s14  ;;  %1248 = vrot.lane.b32.xlu1 %v1247_v34, %s3707_s14  ;;  %v3323_v33 = vld [vmem:[%s7480_s0 + $0x2] ss:$8 sm:$0xf0]   ;;  %v3319_v34 = vld [vmem:[%s7480_s0 + $0x7c7] ss:$8 sm:$0xf]  }
  0x85   :  { %v1412_v37 = vsel %vm708_vm0, %v3323_v33, %v3322_v31 }
  0x86   :  { %v4255_v38 = vpop.permute.xlu2 %863   ;;  %1237 = vrot.lane.b32.xlu0 %v1236_v35, %s3707_s14  ;;  %v4273_v41 = vpop.permute.xlu1 %786   ;;  %v3320_v35 = vld [vmem:[%s7480_s0 + $0x7c7] ss:$8 sm:$0xf0]  }
  0x87   :  { %v1401_v40 = vsel %vm708_vm0, %v3320_v35, %v3319_v34  ;;  %3153 = vst.msk [vmem:[%s7481_s1 + $0xe0] sm:$0xff] %vm712_vm2, %v4273_v41   ;;  %v2931_v41 = vld [vmem:[%s7480_s0 + $0x300] ss:$4 sm:$0xff]   ;;  %v3355_v34 = vld [vmem:[%s7480_s0 + $0x582] ss:$8 sm:$0xf0]  }
  0x88   :  { %v4282_v43 = vpop.permute.xlu0 %775   ;;  %2932 = vst.msk [vmem:[%s7481_s1 + $0xc0] ss:$8 sm:$0x3] %vm3_vm1, %v2931_v41  }
  0x89   :  { %2933 = vst.msk [vmem:[%s7481_s1 + $0xb1] ss:$8 sm:$0xc] %vm3_vm1, %v2931_v41  }
  0x8a   :  { %2934 = vst.msk [vmem:[%s7481_s1 + $0xa2] ss:$8 sm:$0x30] %vm3_vm1, %v2931_v41  }
  0x8b   :  { %2935 = vst.msk [vmem:[%s7481_s1 + $0x93] ss:$8 sm:$0xc0] %vm3_vm1, %v2931_v41   ;;  %v3373_v41 = vld [vmem:[%s7480_s0 + $0x86] ss:$8 sm:$0xf0]  }
  0x8c   :  { %1259 = vrot.lane.b32.xlu2 %v1258_v46, %s3707_s14  ;;  %1281 = vrot.lane.b32.xlu1 %v1280_v47, %s3707_s14  ;;  %v3325_v46 = vld [vmem:[%s7480_s0 + $0x82] ss:$8 sm:$0xf0]   ;;  %3150 = vst.msk [vmem:[%s7481_s1 + $0xc0] sm:$0xff] %vm712_vm2, %v4282_v43  }
  0x8d   :  { %v3331_v47 = vld [vmem:[%s7480_s0 + $0x182] ss:$8 sm:$0xf0]   ;;  %v1422_v52 = vsel %vm708_vm0, %v3325_v46, %v3324_v42  ;;  %v2911_v43 = vld [vmem:[%s7480_s0 + $0x280] ss:$4 sm:$0xff]  }
  0x8e   :  { %v897_v51 = vpop.permute.xlu2 %896   ;;  %1270 = vrot.lane.b32.xlu0 %v1269_v48, %s3707_s14  ;;  %v4324_v54 = vpop.permute.xlu1 %819   ;;  %v1444_v55 = vsel %vm708_vm0, %v3331_v47, %v3330_v44  ;;  %v3361_v44 = vld [vmem:[%s7480_s0 + $0x682] ss:$8 sm:$0xf0]   ;;  %2912 = vst.msk [vmem:[%s7481_s1 + $0xa0] ss:$8 sm:$0x3] %vm3_vm1, %v2911_v43  }
  0x8f   :  { %3183 = vst.msk [vmem:[%s7481_s1 + $0x28] sm:$0xff] %vm712_vm2, %v897_v51   ;;  %v3328_v51 = vld [vmem:[%s7480_s0 + $0x102] ss:$8 sm:$0xf0]   ;;  %v1554_v53 = vsel %vm708_vm0, %v3361_v44, %v3360_v39 }
  0x90   :  { %v4333_v56 = vpop.permute.xlu0 %808   ;;  %v1433_v57 = vsel %vm708_vm0, %v3328_v51, %v3327_v49  ;;  %v3367_v46 = vld [vmem:[%s7480_s0 + $0x782] ss:$8 sm:$0xf0]   ;;  %2913 = vst.msk [vmem:[%s7481_s1 + $0x91] ss:$8 sm:$0xc] %vm3_vm1, %v2911_v43  }
  0x91   :  { %2914 = vst.msk [vmem:[%s7481_s1 + $0x82] ss:$8 sm:$0x30] %vm3_vm1, %v2911_v43   ;;  %v3363_v51 = vld [vmem:[%s7480_s0 + $0x702] ss:$8 sm:$0xf]  }
  0x92   :  { %2915 = vst.msk [vmem:[%s7481_s1 + $0x73] ss:$8 sm:$0xc0] %vm3_vm1, %v2911_v43   ;;  %v3391_v44 = vld [vmem:[%s7480_s0 + $0x386] ss:$8 sm:$0xf0]  }
  0x94   :  { %1292 = vrot.lane.b32.xlu2 %v1291_v59, %s3707_s14  ;;  %1314 = vrot.lane.b32.xlu1 %v1313_v60, %s3707_s14  ;;  %v3334_v60 = vld [vmem:[%s7480_s0 + $0x202] ss:$8 sm:$0xf0]  }
  0x95   :  { %v1455_v5 = vsel %vm708_vm0, %v3334_v60, %v3333_v58  ;;  %v3369_v58 = vld [vmem:[%s7480_s0 + $0x6] ss:$8 sm:$0xf]  }
  0x96   :  { %v930_v63 = vpop.permute.xlu2 %929   ;;  %1303 = vrot.lane.b32.xlu0 %v1302_v61, %s3707_s14  ;;  %v4372_v3 = vpop.permute.xlu1 %852   ;;  %v3339_v61 = vld [vmem:[%s7480_s0 + $0x302] ss:$8 sm:$0xf]  }
  0x97   :  { %3192 = vst.msk [vmem:[%s7481_s1 + $0x88] sm:$0xff] %vm712_vm2, %v930_v63   ;;  %v3340_v63 = vld [vmem:[%s7480_s0 + $0x302] ss:$8 sm:$0xf0]  }
  0x98   :  { %v4385_v6 = vpop.permute.xlu0 %841   ;;  %v1477_v7 = vsel %vm708_vm0, %v3340_v63, %v3339_v61  ;;  %v3370_v61 = vld [vmem:[%s7480_s0 + $0x6] ss:$8 sm:$0xf0]  }
  0x99   :  { %v3375_v63 = vld [vmem:[%s7480_s0 + $0x106] ss:$8 sm:$0xf]  }
  0x9c   :  { %1325 = vrot.lane.b32.xlu2 %v1324_v9, %s3707_s14  ;;  %1347 = vrot.lane.b32.xlu1 %v1346_v10, %s3707_s14  ;;  %v3342_v9 = vld [vmem:[%s7480_s0 + $0x382] ss:$8 sm:$0xf]  }
  0x9d   :  { %v3348_v10 = vld [vmem:[%s7480_s0 + $0x482] ss:$8 sm:$0xf]   ;;  %v1488_v22 = vsel %vm708_vm0, %v3343_v12, %v3342_v9  ;;  %v1609_v9 = vsel %vm708_vm0, %v3376_v4, %v3375_v63  ;;  %v3384_v12 = vld [vmem:[%s7480_s0 + $0x286] ss:$8 sm:$0xf]  }
  0x9e   :  { %v4412_v15 = vpop.permute.xlu2 %962   ;;  %1336 = vrot.lane.b32.xlu0 %v1335_v11, %s3707_s14  ;;  %v886_v19 = vpop.permute.xlu1 %885   ;;  %v1510_v23 = vsel %vm708_vm0, %v3349_v14, %v3348_v10  ;;  %v3399_v4 = vld [vmem:[%s7480_s0 + $0x506] ss:$8 sm:$0xf]  }
  0x9f   :  { %3180 = vst.msk [vmem:[%s7481_s1 + $0x8] sm:$0xff] %vm712_vm2, %v886_v19   ;;  %v3345_v19 = vld [vmem:[%s7480_s0 + $0x402] ss:$8 sm:$0xf]  }
  0xa0   :  { %v4436_v21 = vpop.permute.xlu0 %874   ;;  %3201 = vst.msk [vmem:[%s7481_s1 + $0xe8] sm:$0xff] %vm712_vm2, %v4412_v15  }
  0xa4   :  { %1358 = vrot.lane.b32.xlu2 %v1357_v24, %s3707_s14  ;;  %1380 = vrot.lane.b32.xlu1 %v1379_v26, %s3707_s14  ;;  %v1499_v24 = vsel %vm708_vm0, %v3346_v20, %v3345_v19  ;;  %v3351_v26 = vld [vmem:[%s7480_s0 + $0x502] ss:$8 sm:$0xf]   ;;  %v3385_v19 = vld [vmem:[%s7480_s0 + $0x286] ss:$8 sm:$0xf0]  }
  0xa5   :  { %v1521_v35 = vsel %vm708_vm0, %v3352_v28, %v3351_v26  ;;  %v3016_v28 = vld [vmem:[%s7480_s0 + $0x520] ss:$4 sm:$0xff]  }
  0xa6   :  { %v4460_v29 = vpop.permute.xlu2 %995   ;;  %1369 = vrot.lane.b32.xlu0 %v1368_v27, %s3707_s14  ;;  %v919_v32 = vpop.permute.xlu1 %918   ;;  %3017 = vst.msk [vmem:[%s7481_s1 + $0x144] ss:$8 sm:$0x3] %vm3_vm1, %v3016_v28  }
  0xa7   :  { %3189 = vst.msk [vmem:[%s7481_s1 + $0x68] sm:$0xff] %vm712_vm2, %v919_v32   ;;  %v3358_v32 = vld [vmem:[%s7480_s0 + $0x602] ss:$8 sm:$0xf0]  }
  0xa8   :  { %v908_v16 = vpop.permute.xlu0 %907   ;;  %3018 = vst.msk [vmem:[%s7481_s1 + $0x135] ss:$8 sm:$0xc] %vm3_vm1, %v3016_v28  }
  0xa9   :  { %3186 = vst.msk [vmem:[%s7481_s1 + $0x48] sm:$0xff] %vm712_vm2, %v908_v16   ;;  %v3354_v16 = vld [vmem:[%s7480_s0 + $0x582] ss:$8 sm:$0xf]  }
  0xaa   :  { %3019 = vst.msk [vmem:[%s7481_s1 + $0x126] ss:$8 sm:$0x30] %vm3_vm1, %v3016_v28  }
  0xab   :  { %3020 = vst.msk [vmem:[%s7481_s1 + $0x117] ss:$8 sm:$0xc0] %vm3_vm1, %v3016_v28  }
  0xac   :  { %1391 = vrot.lane.b32.xlu2 %v1390_v36, %s3707_s14  ;;  %1413 = vrot.lane.b32.xlu1 %v1412_v37, %s3708_s27  ;;  %v1543_v36 = vsel %vm708_vm0, %v3358_v32, %v3357_v30  ;;  %v1532_v37 = vsel %vm708_vm0, %v3355_v34, %v3354_v16  ;;  %v1642_v30 = vsel %vm708_vm0, %v3385_v19, %v3384_v12  ;;  %v3387_v16 = vld [vmem:[%s7480_s0 + $0x306] ss:$8 sm:$0xf]  }
  0xad   :  { %v3411_v12 = vld [vmem:[%s7480_s0 + $0x706] ss:$8 sm:$0xf]  }
  0xae   :  { %v4513_v45 = vpop.permute.xlu2 %1028   ;;  %1402 = vrot.lane.b32.xlu0 %v1401_v40, %s3707_s14  ;;  %v4530_v48 = vpop.permute.xlu1 %951   ;;  %v3366_v40 = vld [vmem:[%s7480_s0 + $0x782] ss:$8 sm:$0xf]   ;;  %v3412_v19 = vld [vmem:[%s7480_s0 + $0x706] ss:$8 sm:$0xf0]  }
  0xaf   :  { %3198 = vst.msk [vmem:[%s7481_s1 + $0xc8] sm:$0xff] %vm712_vm2, %v4530_v48   ;;  %v2916_v48 = vld [vmem:[%s7480_s0 + $0x2a0] ss:$4 sm:$0xff]  }
  0xb0   :  { %v4539_v50 = vpop.permute.xlu0 %940   ;;  %2917 = vst.msk [vmem:[%s7481_s1 + $0xa4] ss:$8 sm:$0x3] %vm3_vm1, %v2916_v48  }
  0xb1   :  { %2918 = vst.msk [vmem:[%s7481_s1 + $0x95] ss:$8 sm:$0xc] %vm3_vm1, %v2916_v48  }
  0xb2   :  { %2919 = vst.msk [vmem:[%s7481_s1 + $0x86] ss:$8 sm:$0x30] %vm3_vm1, %v2916_v48  }
  0xb3   :  { %2920 = vst.msk [vmem:[%s7481_s1 + $0x77] ss:$8 sm:$0xc0] %vm3_vm1, %v2916_v48  }
  0xb4   :  { %1423 = vrot.lane.b32.xlu2 %v1422_v52, %s3708_s27  ;;  %1445 = vrot.lane.b32.xlu1 %v1444_v55, %s3708_s27  ;;  %v3364_v52 = vld [vmem:[%s7480_s0 + $0x702] ss:$8 sm:$0xf0]   ;;  %v1576_v55 = vsel %vm708_vm0, %v3367_v46, %v3366_v40  ;;  %3147 = vst.msk [vmem:[%s7481_s1 + $0xa0] sm:$0xff] %vm712_vm2, %v4104_v1  }
  0xb5   :  { %v3011_v1 = vld [vmem:[%s7480_s0 + $0x500] ss:$4 sm:$0xff]   ;;  %3195 = vst.msk [vmem:[%s7481_s1 + $0xa8] sm:$0xff] %vm712_vm2, %v4539_v50   ;;  %v3378_v50 = vld [vmem:[%s7480_s0 + $0x186] ss:$8 sm:$0xf]  }
  0xb6   :  { %v4563_v59 = vpop.permute.xlu2 %1061   ;;  %1434 = vrot.lane.b32.xlu0 %v1433_v57, %s3708_s27  ;;  %v4580_v62 = vpop.permute.xlu1 %984   ;;  %v1565_v57 = vsel %vm708_vm0, %v3364_v52, %v3363_v51  ;;  %3012 = vst.msk [vmem:[%s7481_s1 + $0x140] ss:$8 sm:$0x3] %vm3_vm1, %v3011_v1   ;;  %v1620_v26 = vsel %vm708_vm0, %v3379_v17, %v3378_v50  ;;  %v3390_v40 = vld [vmem:[%s7480_s0 + $0x386] ss:$8 sm:$0xf]  }
  0xb7   :  { %3013 = vst.msk [vmem:[%s7481_s1 + $0x131] ss:$8 sm:$0xc] %vm3_vm1, %v3011_v1   ;;  %v1664_v51 = vsel %vm708_vm0, %v3391_v44, %v3390_v40  ;;  %v3402_v52 = vld [vmem:[%s7480_s0 + $0x586] ss:$8 sm:$0xf]  }
  0xb8   :  { %v4589_v0 = vpop.permute.xlu0 %973   ;;  %3014 = vst.msk [vmem:[%s7481_s1 + $0x122] ss:$8 sm:$0x30] %vm3_vm1, %v3011_v1   ;;  %v3406_v50 = vld [vmem:[%s7480_s0 + $0x606] ss:$8 sm:$0xf0]  }
  0xb9   :  { %3015 = vst.msk [vmem:[%s7481_s1 + $0x113] ss:$8 sm:$0xc0] %vm3_vm1, %v3011_v1   ;;  %v3405_v1 = vld [vmem:[%s7480_s0 + $0x606] ss:$8 sm:$0xf]  }
  0xba   :  { %3162 = vst.msk [vmem:[%s7481_s1 + $0x140] sm:$0xff] %vm712_vm2, %v4324_v54   ;;  %v2991_v54 = vld [vmem:[%s7480_s0 + $0x480] ss:$4 sm:$0xff]   ;;  %v1719_v28 = vsel %vm708_vm0, %v3406_v50, %v3405_v1  ;;  %v3427_v1 = vld [vmem:[%s7480_s0 + $0x1c2] ss:$8 sm:$0xf0]  }
  0xbb   :  { %3210 = vst.msk [vmem:[%s7481_s1 + $0x148] sm:$0xff] %vm712_vm2, %v4460_v29   ;;  %v3396_v29 = vld [vmem:[%s7480_s0 + $0x486] ss:$8 sm:$0xf]   ;;  %v2976_v44 = vld [vmem:[%s7480_s0 + $0x420] ss:$4 sm:$0xff]  }
  0xbc   :  { %1456 = vrot.lane.b32.xlu2 %v1455_v5, %s3708_s27  ;;  %1478 = vrot.lane.b32.xlu1 %v1477_v7, %s3708_s27  ;;  %v3372_v7 = vld [vmem:[%s7480_s0 + $0x86] ss:$8 sm:$0xf]   ;;  %2992 = vst.msk [vmem:[%s7481_s1 + $0x120] ss:$8 sm:$0x3] %vm3_vm1, %v2991_v54  }
  0xbd   :  { %v1598_v10 = vsel %vm708_vm0, %v3373_v41, %v3372_v7  ;;  %2993 = vst.msk [vmem:[%s7481_s1 + $0x111] ss:$8 sm:$0xc] %vm3_vm1, %v2991_v54   ;;  %v3400_v7 = vld [vmem:[%s7480_s0 + $0x506] ss:$8 sm:$0xf0]  }
  0xbe   :  { %v4621_v11 = vpop.permute.xlu2 %1094   ;;  %1467 = vrot.lane.b32.xlu0 %v1466_v8, %s3708_s27  ;;  %v4638_v15 = vpop.permute.xlu1 %1017   ;;  %v1587_v8 = vsel %vm708_vm0, %v3370_v61, %v3369_v58  ;;  %2994 = vst.msk [vmem:[%s7481_s1 + $0x102] ss:$8 sm:$0x30] %vm3_vm1, %v2991_v54   ;;  %v2996_v61 = vld [vmem:[%s7480_s0 + $0x4a0] ss:$4 sm:$0xff]  }
  0xbf   :  { %2995 = vst.msk [vmem:[%s7481_s1 + $0xf3] ss:$8 sm:$0xc0] %vm3_vm1, %v2991_v54   ;;  %v3418_v54 = vld [vmem:[%s7480_s0 + $0x42] ss:$8 sm:$0xf0]  }
  0xc0   :  { %v4647_v18 = vpop.permute.xlu0 %1006   ;;  %2997 = vst.msk [vmem:[%s7481_s1 + $0x124] ss:$8 sm:$0x3] %vm3_vm1, %v2996_v61  }
  0xc1   :  { %2998 = vst.msk [vmem:[%s7481_s1 + $0x115] ss:$8 sm:$0xc] %vm3_vm1, %v2996_v61  }
  0xc2   :  { %2999 = vst.msk [vmem:[%s7481_s1 + $0x106] ss:$8 sm:$0x30] %vm3_vm1, %v2996_v61  }
  0xc3   :  { %3000 = vst.msk [vmem:[%s7481_s1 + $0xf7] ss:$8 sm:$0xc0] %vm3_vm1, %v2996_v61   ;;  %v3423_v61 = vld [vmem:[%s7480_s0 + $0x142] ss:$8 sm:$0xf]  }
  0xc4   :  { %1489 = vrot.lane.b32.xlu2 %v1488_v22, %s3708_s27  ;;  %1511 = vrot.lane.b32.xlu1 %v1510_v23, %s3708_s27  ;;  %v3381_v22 = vld [vmem:[%s7480_s0 + $0x206] ss:$8 sm:$0xf]   ;;  %3159 = vst.msk [vmem:[%s7481_s1 + $0x120] sm:$0xff] %vm712_vm2, %v4333_v56  }
  0xc5   :  { %v2971_v56 = vld [vmem:[%s7480_s0 + $0x400] ss:$4 sm:$0xff]   ;;  %3207 = vst.msk [vmem:[%s7481_s1 + $0x128] sm:$0xff] %vm712_vm2, %v4580_v62   ;;  %v3414_v62 = vld [vmem:[%s7480_s0 + $0x786] ss:$8 sm:$0xf]  }
  0xc6   :  { %v4671_v27 = vpop.permute.xlu2 %1127   ;;  %1500 = vrot.lane.b32.xlu0 %v1499_v24, %s3708_s27  ;;  %v4688_v31 = vpop.permute.xlu1 %1050   ;;  %v3382_v24 = vld [vmem:[%s7480_s0 + $0x206] ss:$8 sm:$0xf0]   ;;  %2972 = vst.msk [vmem:[%s7481_s1 + $0x100] ss:$8 sm:$0x3] %vm3_vm1, %v2971_v56  }
  0xc7   :  { %v1631_v32 = vsel %vm708_vm0, %v3382_v24, %v3381_v22  ;;  %v3408_v24 = vld [vmem:[%s7480_s0 + $0x686] ss:$8 sm:$0xf]   ;;  %2973 = vst.msk [vmem:[%s7481_s1 + $0xf1] ss:$8 sm:$0xc] %vm3_vm1, %v2971_v56  }
  0xc8   :  { %v4697_v33 = vpop.permute.xlu0 %1039   ;;  %2974 = vst.msk [vmem:[%s7481_s1 + $0xe2] ss:$8 sm:$0x30] %vm3_vm1, %v2971_v56  }
  0xc9   :  { %2975 = vst.msk [vmem:[%s7481_s1 + $0xd3] ss:$8 sm:$0xc0] %vm3_vm1, %v2971_v56  }
  0xca   :  { %2977 = vst.msk [vmem:[%s7481_s1 + $0x104] ss:$8 sm:$0x3] %vm3_vm1, %v2976_v44  }
  0xcb   :  { %2978 = vst.msk [vmem:[%s7481_s1 + $0xf5] ss:$8 sm:$0xc] %vm3_vm1, %v2976_v44  }
  0xcc   :  { %1522 = vrot.lane.b32.xlu2 %v1521_v35, %s3708_s27  ;;  %1544 = vrot.lane.b32.xlu1 %v1543_v36, %s3708_s27  ;;  %v3388_v35 = vld [vmem:[%s7480_s0 + $0x306] ss:$8 sm:$0xf0]   ;;  %2979 = vst.msk [vmem:[%s7481_s1 + $0xe6] ss:$8 sm:$0x30] %vm3_vm1, %v2976_v44  }
  0xcd   :  { %v3393_v36 = vld [vmem:[%s7480_s0 + $0x406] ss:$8 sm:$0xf]   ;;  %v1653_v46 = vsel %vm708_vm0, %v3388_v35, %v3387_v16  ;;  %v3420_v16 = vld [vmem:[%s7480_s0 + $0xc2] ss:$8 sm:$0xf]  }
  0xce   :  { %v4729_v42 = vpop.permute.xlu2 %1160   ;;  %1533 = vrot.lane.b32.xlu0 %v1532_v37, %s3708_s27  ;;  %v4746_v47 = vpop.permute.xlu1 %1083   ;;  %v3394_v37 = vld [vmem:[%s7480_s0 + $0x406] ss:$8 sm:$0xf0]   ;;  %2980 = vst.msk [vmem:[%s7481_s1 + $0xd7] ss:$8 sm:$0xc0] %vm3_vm1, %v2976_v44  }
  0xcf   :  { %v1675_v48 = vsel %vm708_vm0, %v3394_v37, %v3393_v36  ;;  %v3415_v36 = vld [vmem:[%s7480_s0 + $0x786] ss:$8 sm:$0xf0]   ;;  %v3421_v37 = vld [vmem:[%s7480_s0 + $0xc2] ss:$8 sm:$0xf0]  }
  0xd0   :  { %v4755_v49 = vpop.permute.xlu0 %1072   ;;  %3156 = vst.msk [vmem:[%s7481_s1 + $0x100] sm:$0xff] %vm712_vm2, %v4156_v13   ;;  %v3071_v13 = vld [vmem:[%s7480_s0 + $0x680] ss:$4 sm:$0xff]  }
  0xd1   :  { %3204 = vst.msk [vmem:[%s7481_s1 + $0x108] sm:$0xff] %vm712_vm2, %v4589_v0   ;;  %v3438_v0 = vld [vmem:[%s7480_s0 + $0x3c2] ss:$8 sm:$0xf]  }
  0xd2   :  { %3072 = vst.msk [vmem:[%s7481_s1 + $0x1a0] ss:$8 sm:$0x3] %vm3_vm1, %v3071_v13  }
  0xd3   :  { %3073 = vst.msk [vmem:[%s7481_s1 + $0x191] ss:$8 sm:$0xc] %vm3_vm1, %v3071_v13  }
  0xd4   :  { %1555 = vrot.lane.b32.xlu2 %v1554_v53, %s3708_s27  ;;  %1577 = vrot.lane.b32.xlu1 %v1576_v55, %s3708_s27  ;;  %v3397_v55 = vld [vmem:[%s7480_s0 + $0x486] ss:$8 sm:$0xf0]   ;;  %3074 = vst.msk [vmem:[%s7481_s1 + $0x182] ss:$8 sm:$0x30] %vm3_vm1, %v3071_v13  }
  0xd5   :  { %v1686_v41 = vsel %vm708_vm0, %v3397_v55, %v3396_v29  ;;  %v1774_v29 = vsel %vm708_vm0, %v3421_v37, %v3420_v16  ;;  %v3429_v55 = vld [vmem:[%s7480_s0 + $0x242] ss:$8 sm:$0xf]   ;;  %v3076_v37 = vld [vmem:[%s7480_s0 + $0x6a0] ss:$4 sm:$0xff]  }
  0xd6   :  { %v4779_v60 = vpop.permute.xlu2 %1193   ;;  %1566 = vrot.lane.b32.xlu0 %v1565_v57, %s3708_s27  ;;  %v4796_v2 = vpop.permute.xlu1 %1116   ;;  %v3403_v57 = vld [vmem:[%s7480_s0 + $0x586] ss:$8 sm:$0xf0]   ;;  %v3436_v16 = vld [vmem:[%s7480_s0 + $0x342] ss:$8 sm:$0xf0]  }
  0xd7   :  { %3075 = vst.msk [vmem:[%s7481_s1 + $0x173] ss:$8 sm:$0xc0] %vm3_vm1, %v3071_v13  }
  0xd8   :  { %v4805_v5 = vpop.permute.xlu0 %1105   ;;  %3077 = vst.msk [vmem:[%s7481_s1 + $0x1a4] ss:$8 sm:$0x3] %vm3_vm1, %v3076_v37  }
  0xd9   :  { %3078 = vst.msk [vmem:[%s7481_s1 + $0x195] ss:$8 sm:$0xc] %vm3_vm1, %v3076_v37  }
  0xda   :  { %3079 = vst.msk [vmem:[%s7481_s1 + $0x186] ss:$8 sm:$0x30] %vm3_vm1, %v3076_v37  }
  0xdb   :  { %3080 = vst.msk [vmem:[%s7481_s1 + $0x177] ss:$8 sm:$0xc0] %vm3_vm1, %v3076_v37   ;;  %v3056_v37 = vld [vmem:[%s7480_s0 + $0x620] ss:$4 sm:$0xff]  }
  0xdc   :  { %1588 = vrot.lane.b32.xlu2 %v1587_v8, %s3708_s27  ;;  %1610 = vrot.lane.b32.xlu1 %v1609_v9, %s3708_s27  ;;  %v1708_v8 = vsel %vm708_vm0, %v3403_v57, %v3402_v52  ;;  %v1697_v9 = vsel %vm708_vm0, %v3400_v7, %v3399_v4  ;;  %v3424_v4 = vld [vmem:[%s7480_s0 + $0x142] ss:$8 sm:$0xf0]   ;;  %3171 = vst.msk [vmem:[%s7481_s1 + $0x1a0] sm:$0xff] %vm712_vm2, %v4372_v3  }
  0xdd   :  { %v3430_v7 = vld [vmem:[%s7480_s0 + $0x242] ss:$8 sm:$0xf0]   ;;  %v1785_v50 = vsel %vm708_vm0, %v3424_v4, %v3423_v61  ;;  %3219 = vst.msk [vmem:[%s7481_s1 + $0x1a8] sm:$0xff] %vm712_vm2, %v4513_v45  }
  0xde   :  { %v4837_v14 = vpop.permute.xlu2 %1226   ;;  %1599 = vrot.lane.b32.xlu0 %v1598_v10, %s3708_s27  ;;  %v4854_v20 = vpop.permute.xlu1 %1149   ;;  %v3444_v4 = vld [vmem:[%s7480_s0 + $0x4c2] ss:$8 sm:$0xf]   ;;  %3057 = vst.msk [vmem:[%s7481_s1 + $0x184] ss:$8 sm:$0x3] %vm3_vm1, %v3056_v37  }
  0xdf   :  { %v3456_v3 = vld [vmem:[%s7480_s0 + $0x6c2] ss:$8 sm:$0xf]   ;;  %3058 = vst.msk [vmem:[%s7481_s1 + $0x175] ss:$8 sm:$0xc] %vm3_vm1, %v3056_v37  }
  0xe0   :  { %v4863_v23 = vpop.permute.xlu0 %1138   ;;  %3059 = vst.msk [vmem:[%s7481_s1 + $0x166] ss:$8 sm:$0x30] %vm3_vm1, %v3056_v37  }
  0xe1   :  { %3060 = vst.msk [vmem:[%s7481_s1 + $0x157] ss:$8 sm:$0xc0] %vm3_vm1, %v3056_v37   ;;  %v3036_v37 = vld [vmem:[%s7480_s0 + $0x5a0] ss:$4 sm:$0xff]  }
  0xe2   :  { %3037 = vst.msk [vmem:[%s7481_s1 + $0x164] ss:$8 sm:$0x3] %vm3_vm1, %v3036_v37  }
  0xe3   :  { %3038 = vst.msk [vmem:[%s7481_s1 + $0x155] ss:$8 sm:$0xc] %vm3_vm1, %v3036_v37  }
  0xe4   :  { %1621 = vrot.lane.b32.xlu2 %v1620_v26, %s3708_s27  ;;  %1643 = vrot.lane.b32.xlu1 %v1642_v30, %s3708_s27  ;;  %v3409_v26 = vld [vmem:[%s7480_s0 + $0x686] ss:$8 sm:$0xf0]   ;;  %v1741_v30 = vsel %vm708_vm0, %v3412_v19, %v3411_v12  ;;  %v1807_v12 = vsel %vm708_vm0, %v3430_v7, %v3429_v55  ;;  %v3448_v55 = vld [vmem:[%s7480_s0 + $0x542] ss:$8 sm:$0xf0]  }
  0xe5   :  { %3039 = vst.msk [vmem:[%s7481_s1 + $0x146] ss:$8 sm:$0x30] %vm3_vm1, %v3036_v37  }
  0xe6   :  { %v4887_v34 = vpop.permute.xlu2 %1259   ;;  %1632 = vrot.lane.b32.xlu0 %v1631_v32, %s3708_s27  ;;  %v4904_v43 = vpop.permute.xlu1 %1182   ;;  %v1730_v32 = vsel %vm708_vm0, %v3409_v26, %v3408_v24  ;;  %v3432_v26 = vld [vmem:[%s7480_s0 + $0x2c2] ss:$8 sm:$0xf]   ;;  %3040 = vst.msk [vmem:[%s7481_s1 + $0x137] ss:$8 sm:$0xc0] %vm3_vm1, %v3036_v37  }
  0xe7   :  { %v3495_v37 = vld [vmem:[%s7480_s0 + $0x546] ss:$8 sm:$0xf]  }
  0xe8   :  { %v4913_v39 = vpop.permute.xlu0 %1171  }
  0xec   :  { %1654 = vrot.lane.b32.xlu2 %v1653_v46, %s3708_s27  ;;  %1676 = vrot.lane.b32.xlu1 %v1675_v48, %s3708_s27  ;;  %v3417_v48 = vld [vmem:[%s7480_s0 + $0x42] ss:$8 sm:$0xf]  }
  0xed   :  { %v1763_v52 = vsel %vm708_vm0, %v3418_v54, %v3417_v48  ;;  %v3447_v54 = vld [vmem:[%s7480_s0 + $0x542] ss:$8 sm:$0xf]  }
  0xee   :  { %v4945_v53 = vpop.permute.xlu2 %1292   ;;  %1665 = vrot.lane.b32.xlu0 %v1664_v51, %s3708_s27  ;;  %v4962_v58 = vpop.permute.xlu1 %1215   ;;  %v1752_v51 = vsel %vm708_vm0, %v3415_v36, %v3414_v62 }
  0xf0   :  { %v4971_v63 = vpop.permute.xlu0 %1204  }
  0xf4   :  { %1687 = vrot.lane.b32.xlu2 %v1686_v41, %s3708_s27  ;;  %1709 = vrot.lane.b32.xlu1 %v1708_v8, %s3708_s27  ;;  %v3426_v8 = vld [vmem:[%s7480_s0 + $0x1c2] ss:$8 sm:$0xf]  }
  0xf5   :  { %v1796_v19 = vsel %vm708_vm0, %v3427_v1, %v3426_v8  ;;  %v3445_v8 = vld [vmem:[%s7480_s0 + $0x4c2] ss:$8 sm:$0xf0]  }
  0xf6   :  { %v4995_v10 = vpop.permute.xlu2 %1325   ;;  %1698 = vrot.lane.b32.xlu0 %v1697_v9, %s3708_s27  ;;  %v5012_v17 = vpop.permute.xlu1 %1248   ;;  %v1862_v13 = vsel %vm708_vm0, %v3445_v8, %v3444_v4  ;;  %v3462_v4 = vld [vmem:[%s7480_s0 + $0x7c2] ss:$8 sm:$0xf]  }
  0xf8   :  { %v5021_v22 = vpop.permute.xlu0 %1237  }
  0xfc   :  { %1720 = vrot.lane.b32.xlu2 %v1719_v28, %s3708_s27  ;;  %1742 = vrot.lane.b32.xlu1 %v1741_v30, %s3708_s27  ;;  %v3433_v28 = vld [vmem:[%s7480_s0 + $0x2c2] ss:$8 sm:$0xf0]  }
  0xfd   :  { %v3439_v30 = vld [vmem:[%s7480_s0 + $0x3c2] ss:$8 sm:$0xf0]   ;;  %v1818_v36 = vsel %vm708_vm0, %v3433_v28, %v3432_v26  ;;  %v3051_v26 = vld [vmem:[%s7480_s0 + $0x600] ss:$4 sm:$0xff]  }
  0xfe   :  { %v5053_v35 = vpop.permute.xlu2 %1358   ;;  %1731 = vrot.lane.b32.xlu0 %v1730_v32, %s3708_s27  ;;  %v5070_v40 = vpop.permute.xlu1 %1281   ;;  %v3435_v32 = vld [vmem:[%s7480_s0 + $0x342] ss:$8 sm:$0xf]   ;;  %v1840_v44 = vsel %vm708_vm0, %v3439_v30, %v3438_v0  ;;  %3052 = vst.msk [vmem:[%s7481_s1 + $0x180] ss:$8 sm:$0x3] %vm3_vm1, %v3051_v26  }
  0xff   :  { %v1829_v48 = vsel %vm708_vm0, %v3436_v16, %v3435_v32  ;;  %v3451_v0 = vld [vmem:[%s7480_s0 + $0x5c2] ss:$8 sm:$0xf0]   ;;  %3053 = vst.msk [vmem:[%s7481_s1 + $0x171] ss:$8 sm:$0xc] %vm3_vm1, %v3051_v26  }
 0x100   :  { %v5079_v46 = vpop.permute.xlu0 %1270   ;;  %v3453_v30 = vld [vmem:[%s7480_s0 + $0x642] ss:$8 sm:$0xf]   ;;  %3054 = vst.msk [vmem:[%s7481_s1 + $0x162] ss:$8 sm:$0x30] %vm3_vm1, %v3051_v26  }
 0x101   :  { %v3454_v32 = vld [vmem:[%s7480_s0 + $0x642] ss:$8 sm:$0xf0]   ;;  %3055 = vst.msk [vmem:[%s7481_s1 + $0x153] ss:$8 sm:$0xc0] %vm3_vm1, %v3051_v26  }
 0x102   :  { %3168 = vst.msk [vmem:[%s7481_s1 + $0x180] sm:$0xff] %vm712_vm2, %v4385_v6   ;;  %v3031_v6 = vld [vmem:[%s7480_s0 + $0x580] ss:$4 sm:$0xff]  }
 0x103   :  { %3216 = vst.msk [vmem:[%s7481_s1 + $0x188] sm:$0xff] %vm712_vm2, %v4638_v15   ;;  %v3469_v15 = vld [vmem:[%s7480_s0 + $0xc6] ss:$8 sm:$0xf0]  }
 0x104   :  { %1753 = vrot.lane.b32.xlu2 %v1752_v51, %s3708_s27  ;;  %1775 = vrot.lane.b32.xlu1 %v1774_v29, %s3708_s27  ;;  %v3441_v29 = vld [vmem:[%s7480_s0 + $0x442] ss:$8 sm:$0xf]   ;;  %3032 = vst.msk [vmem:[%s7481_s1 + $0x160] ss:$8 sm:$0x3] %vm3_vm1, %v3031_v6  }
 0x105   :  { %3033 = vst.msk [vmem:[%s7481_s1 + $0x151] ss:$8 sm:$0xc] %vm3_vm1, %v3031_v6  }
 0x106   :  { %v5107_v57 = vpop.permute.xlu2 %1391   ;;  %1764 = vrot.lane.b32.xlu0 %v1763_v52, %s3708_s27  ;;  %v5123_v41 = vpop.permute.xlu1 %1314   ;;  %v3442_v52 = vld [vmem:[%s7480_s0 + $0x442] ss:$8 sm:$0xf0]   ;;  %3034 = vst.msk [vmem:[%s7481_s1 + $0x142] ss:$8 sm:$0x30] %vm3_vm1, %v3031_v6  }
 0x107   :  { %v1851_v1 = vsel %vm708_vm0, %v3442_v52, %v3441_v29  ;;  %v3460_v29 = vld [vmem:[%s7480_s0 + $0x742] ss:$8 sm:$0xf0]   ;;  %v3466_v52 = vld [vmem:[%s7480_s0 + $0x46] ss:$8 sm:$0xf0]  }
 0x108   :  { %v5132_v9 = vpop.permute.xlu0 %1303   ;;  %3035 = vst.msk [vmem:[%s7481_s1 + $0x133] ss:$8 sm:$0xc0] %vm3_vm1, %v3031_v6   ;;  %v3492_v6 = vld [vmem:[%s7480_s0 + $0x4c6] ss:$8 sm:$0xf]  }
 0x109   :  { %3165 = vst.msk [vmem:[%s7481_s1 + $0x160] sm:$0xff] %vm712_vm2, %v4204_v25   ;;  %v3111_v25 = vld [vmem:[%s7480_s0 + $0x780] ss:$4 sm:$0xff]  }
 0x10a   :  { %3213 = vst.msk [vmem:[%s7481_s1 + $0x168] sm:$0xff] %vm712_vm2, %v4647_v18   ;;  %v3486_v18 = vld [vmem:[%s7480_s0 + $0x3c6] ss:$8 sm:$0xf]  }
 0x10b   :  { %3112 = vst.msk [vmem:[%s7481_s1 + $0x1e0] ss:$8 sm:$0x3] %vm3_vm1, %v3111_v25  }
 0x10c   :  { %1786 = vrot.lane.b32.xlu2 %v1785_v50, %s3708_s27  ;;  %1808 = vrot.lane.b32.xlu1 %v1807_v12, %s3708_s27  ;;  %v1873_v50 = vsel %vm708_vm0, %v3448_v55, %v3447_v54  ;;  %v3465_v54 = vld [vmem:[%s7480_s0 + $0x46] ss:$8 sm:$0xf]   ;;  %3113 = vst.msk [vmem:[%s7481_s1 + $0x1d1] ss:$8 sm:$0xc] %vm3_vm1, %v3111_v25  }
 0x10d   :  { %3114 = vst.msk [vmem:[%s7481_s1 + $0x1c2] ss:$8 sm:$0x30] %vm3_vm1, %v3111_v25  }
 0x10e   :  { %v1424_v24 = vpop.permute.xlu2 %1423   ;;  %1797 = vrot.lane.b32.xlu0 %v1796_v19, %s3708_s27  ;;  %v5176_v56 = vpop.permute.xlu1 %1347   ;;  %v3450_v19 = vld [vmem:[%s7480_s0 + $0x5c2] ss:$8 sm:$0xf]   ;;  %3115 = vst.msk [vmem:[%s7481_s1 + $0x1b3] ss:$8 sm:$0xc0] %vm3_vm1, %v3111_v25  }
 0x10f   :  { %3326 = vst.msk [vmem:[%s7481_s1 + $0x20] sm:$0xff] %vm1415_vm3, %v1424_v24   ;;  %v3457_v24 = vld [vmem:[%s7480_s0 + $0x6c2] ss:$8 sm:$0xf0]   ;;  %v1884_v16 = vsel %vm708_vm0, %v3451_v0, %v3450_v19 }
 0x110   :  { %v5185_v62 = vpop.permute.xlu0 %1336   ;;  %v3474_v19 = vld [vmem:[%s7480_s0 + $0x1c6] ss:$8 sm:$0xf]  }
 0x114   :  { %1819 = vrot.lane.b32.xlu2 %v1818_v36, %s3708_s27  ;;  %1841 = vrot.lane.b32.xlu1 %v1840_v44, %s3708_s27  ;;  %v1906_v36 = vsel %vm708_vm0, %v3457_v24, %v3456_v3  ;;  %v1895_v44 = vsel %vm708_vm0, %v3454_v32, %v3453_v30  ;;  %v3475_v24 = vld [vmem:[%s7480_s0 + $0x1c6] ss:$8 sm:$0xf0]  }
 0x115   :  { %v3472_v32 = vld [vmem:[%s7480_s0 + $0x146] ss:$8 sm:$0xf0]  }
 0x116   :  { %v1457_v51 = vpop.permute.xlu2 %1456   ;;  %1830 = vrot.lane.b32.xlu0 %v1829_v48, %s3708_s27  ;;  %v5227_v61 = vpop.permute.xlu1 %1380   ;;  %v3459_v48 = vld [vmem:[%s7480_s0 + $0x742] ss:$8 sm:$0xf]  }
 0x117   :  { %3335 = vst.msk [vmem:[%s7481_s1 + $0x80] sm:$0xff] %vm1415_vm3, %v1457_v51  }
 0x118   :  { %v5236_v7 = vpop.permute.xlu0 %1369  }
 0x11c   :  { %1852 = vrot.lane.b32.xlu2 %v1851_v1, %s3708_s27  ;;  %1874 = vrot.lane.b32.xlu1 %v1873_v50, %s3708_s27  ;;  %v3463_v1 = vld [vmem:[%s7480_s0 + $0x7c2] ss:$8 sm:$0xf0]   ;;  %v1917_v50 = vsel %vm708_vm0, %v3460_v29, %v3459_v48  ;;  %v3483_v48 = vld [vmem:[%s7480_s0 + $0x346] ss:$8 sm:$0xf]  }
 0x11d   :  { %v1928_v3 = vsel %vm708_vm0, %v3463_v1, %v3462_v4  ;;  %v3477_v29 = vld [vmem:[%s7480_s0 + $0x246] ss:$8 sm:$0xf]  }
 0x11e   :  { %v1490_v12 = vpop.permute.xlu2 %1489   ;;  %1863 = vrot.lane.b32.xlu0 %v1862_v13, %s3708_s27  ;;  %v1414_v28 = vpop.permute.xlu1 %1413   ;;  %v1939_v13 = vsel %vm708_vm0, %v3466_v52, %v3465_v54  ;;  %v3484_v54 = vld [vmem:[%s7480_s0 + $0x346] ss:$8 sm:$0xf0]  }
 0x11f   :  { %3344 = vst.msk [vmem:[%s7481_s1 + $0xe0] sm:$0xff] %vm1415_vm3, %v1490_v12   ;;  %v3468_v12 = vld [vmem:[%s7480_s0 + $0xc6] ss:$8 sm:$0xf]  }
 0x120   :  { %1416 = vst.msk [vmem:[%s7481_s1] sm:$0xff] %vm1415_vm3, %v1414_v28   ;;  %v5291_v45 = vpop.permute.xlu0 %1402   ;;  %v3471_v28 = vld [vmem:[%s7480_s0 + $0x146] ss:$8 sm:$0xf]  }
 0x121   :  { %v3478_v52 = vld [vmem:[%s7480_s0 + $0x246] ss:$8 sm:$0xf0]  }
 0x122   :  { %v3480_v4 = vld [vmem:[%s7480_s0 + $0x2c6] ss:$8 sm:$0xf]  }
 0x123   :  { %v3481_v1 = vld [vmem:[%s7480_s0 + $0x2c6] ss:$8 sm:$0xf0]  }
 0x124   :  { %1885 = vrot.lane.b32.xlu2 %v1884_v16, %s3708_s27  ;;  %1907 = vrot.lane.b32.xlu1 %v1906_v36, %s3708_s27  ;;  %v1950_v16 = vsel %vm708_vm0, %v3469_v15, %v3468_v12  ;;  %v1972_v36 = vsel %vm708_vm0, %v3475_v24, %v3474_v19  ;;  %v3487_v19 = vld [vmem:[%s7480_s0 + $0x3c6] ss:$8 sm:$0xf0]  }
 0x125   :  { %v3489_v24 = vld [vmem:[%s7480_s0 + $0x446] ss:$8 sm:$0xf]  }
 0x126   :  { %v1523_v51 = vpop.permute.xlu2 %1522   ;;  %1896 = vrot.lane.b32.xlu0 %v1895_v44, %s3708_s27  ;;  %v1446_v55 = vpop.permute.xlu1 %1445   ;;  %v1961_v44 = vsel %vm708_vm0, %v3472_v32, %v3471_v28  ;;  %v3490_v28 = vld [vmem:[%s7480_s0 + $0x446] ss:$8 sm:$0xf0]   ;;  %v3116_v32 = vld [vmem:[%s7480_s0 + $0x7a0] ss:$4 sm:$0xff]  }
 0x127   :  { %3353 = vst.msk [vmem:[%s7481_s1 + $0x140] sm:$0xff] %vm1415_vm3, %v1523_v51  }
 0x128   :  { %3332 = vst.msk [vmem:[%s7481_s1 + $0x60] sm:$0xff] %vm1415_vm3, %v1446_v55   ;;  %v1435_v8 = vpop.permute.xlu0 %1434  }
 0x129   :  { %3329 = vst.msk [vmem:[%s7481_s1 + $0x40] sm:$0xff] %vm1415_vm3, %v1435_v8  }
 0x12a   :  { %3117 = vst.msk [vmem:[%s7481_s1 + $0x1e4] ss:$8 sm:$0x3] %vm3_vm1, %v3116_v32  }
 0x12b   :  { %3118 = vst.msk [vmem:[%s7481_s1 + $0x1d5] ss:$8 sm:$0xc] %vm3_vm1, %v3116_v32  }
 0x12c   :  { %1918 = vrot.lane.b32.xlu2 %v1917_v50, %s3708_s27  ;;  %1940 = vrot.lane.b32.xlu1 %v1939_v13, %s3708_s27  ;;  %v1983_v50 = vsel %vm708_vm0, %v3478_v52, %v3477_v29  ;;  %v2005_v13 = vsel %vm708_vm0, %v3484_v54, %v3483_v48  ;;  %v3496_v54 = vld [vmem:[%s7480_s0 + $0x546] ss:$8 sm:$0xf0]   ;;  %3119 = vst.msk [vmem:[%s7481_s1 + $0x1c6] ss:$8 sm:$0x30] %vm3_vm1, %v3116_v32  }
 0x12d   :  { %3120 = vst.msk [vmem:[%s7481_s1 + $0x1b7] ss:$8 sm:$0xc0] %vm3_vm1, %v3116_v32   ;;  %v3498_v52 = vld [vmem:[%s7480_s0 + $0x5c6] ss:$8 sm:$0xf]  }
 0x12e   :  { %v1556_v0 = vpop.permute.xlu2 %1555   ;;  %1929 = vrot.lane.b32.xlu0 %v1928_v3, %s3708_s27  ;;  %v1479_v26 = vpop.permute.xlu1 %1478   ;;  %v1994_v3 = vsel %vm708_vm0, %v3481_v1, %v3480_v4  ;;  %3177 = vst.msk [vmem:[%s7481_s1 + $0x1e0] sm:$0xff] %vm712_vm2, %v4436_v21   ;;  %v3499_v4 = vld [vmem:[%s7480_s0 + $0x5c6] ss:$8 sm:$0xf0]   ;;  %v3096_v1 = vld [vmem:[%s7480_s0 + $0x720] ss:$4 sm:$0xff]  }
 0x12f   :  { %3362 = vst.msk [vmem:[%s7481_s1 + $0x1a0] sm:$0xff] %vm1415_vm3, %v1556_v0   ;;  %v3493_v0 = vld [vmem:[%s7480_s0 + $0x4c6] ss:$8 sm:$0xf0]  }
 0x130   :  { %3341 = vst.msk [vmem:[%s7481_s1 + $0xc0] sm:$0xff] %vm1415_vm3, %v1479_v26   ;;  %v1468_v30 = vpop.permute.xlu0 %1467  }
 0x131   :  { %3338 = vst.msk [vmem:[%s7481_s1 + $0xa0] sm:$0xff] %vm1415_vm3, %v1468_v30   ;;  %v2016_v30 = vsel %vm708_vm0, %v3487_v19, %v3486_v18  ;;  %v3505_v18 = vld [vmem:[%s7480_s0 + $0x6c6] ss:$8 sm:$0xf0]  }
 0x132   :  { %3225 = vst.msk [vmem:[%s7481_s1 + $0x1e8] sm:$0xff] %vm712_vm2, %v4688_v31  }
 0x133   :  { %3097 = vst.msk [vmem:[%s7481_s1 + $0x1c4] ss:$8 sm:$0x3] %vm3_vm1, %v3096_v1  }
 0x134   :  { %1951 = vrot.lane.b32.xlu2 %v1950_v16, %s3708_s27  ;;  %1973 = vrot.lane.b32.xlu1 %v1972_v36, %s3708_s27  ;;  %v2038_v16 = vsel %vm708_vm0, %v3493_v0, %v3492_v6  ;;  %v2027_v36 = vsel %vm708_vm0, %v3490_v28, %v3489_v24  ;;  %v3511_v6 = vld [vmem:[%s7480_s0 + $0x7c6] ss:$8 sm:$0xf0]   ;;  %3098 = vst.msk [vmem:[%s7481_s1 + $0x1b5] ss:$8 sm:$0xc] %vm3_vm1, %v3096_v1  }
 0x135   :  { %v3507_v0 = vld [vmem:[%s7480_s0 + $0x746] ss:$8 sm:$0xf]   ;;  %3099 = vst.msk [vmem:[%s7481_s1 + $0x1a6] ss:$8 sm:$0x30] %vm3_vm1, %v3096_v1  }
 0x136   :  { %v1589_v51 = vpop.permute.xlu2 %1588   ;;  %1962 = vrot.lane.b32.xlu0 %v1961_v44, %s3708_s27  ;;  %v1512_v55 = vpop.permute.xlu1 %1511   ;;  %v3501_v44 = vld [vmem:[%s7480_s0 + $0x646] ss:$8 sm:$0xf]   ;;  %3100 = vst.msk [vmem:[%s7481_s1 + $0x197] ss:$8 sm:$0xc0] %vm3_vm1, %v3096_v1  }
 0x137   :  { %3350 = vst.msk [vmem:[%s7481_s1 + $0x120] sm:$0xff] %vm1415_vm3, %v1512_v55   ;;  %v3091_v55 = vld [vmem:[%s7480_s0 + $0x700] ss:$4 sm:$0xff]   ;;  %v3508_v24 = vld [vmem:[%s7480_s0 + $0x746] ss:$8 sm:$0xf0]  }
 0x138   :  { %v1501_v8 = vpop.permute.xlu0 %1500   ;;  %3371 = vst.msk [vmem:[%s7481_s1 + $0x8] sm:$0xff] %vm1415_vm3, %v1589_v51   ;;  %v3502_v51 = vld [vmem:[%s7480_s0 + $0x646] ss:$8 sm:$0xf0]  }
 0x139   :  { %3347 = vst.msk [vmem:[%s7481_s1 + $0x100] sm:$0xff] %vm1415_vm3, %v1501_v8   ;;  %v2049_v8 = vsel %vm708_vm0, %v3496_v54, %v3495_v37  ;;  %v2071_v31 = vsel %vm708_vm0, %v3502_v51, %v3501_v44  ;;  %v3515_v37 = vld [vmem:[%s7480_s0 + $0x81] ss:$8 sm:$0xf]  }
 0x13a   :  { %3092 = vst.msk [vmem:[%s7481_s1 + $0x1c0] ss:$8 sm:$0x3] %vm3_vm1, %v3091_v55   ;;  %v3516_v54 = vld [vmem:[%s7480_s0 + $0x81] ss:$8 sm:$0xf0]  }
 0x13b   :  { %3093 = vst.msk [vmem:[%s7481_s1 + $0x1b1] ss:$8 sm:$0xc] %vm3_vm1, %v3091_v55  }
 0x13c   :  { %1984 = vrot.lane.b32.xlu2 %v1983_v50, %s3708_s27  ;;  %2006 = vrot.lane.b32.xlu1 %v2005_v13, %s3708_s27  ;;  %v2060_v50 = vsel %vm708_vm0, %v3499_v4, %v3498_v52  ;;  %v3504_v13 = vld [vmem:[%s7480_s0 + $0x6c6] ss:$8 sm:$0xf]   ;;  %3094 = vst.msk [vmem:[%s7481_s1 + $0x1a2] ss:$8 sm:$0x30] %vm3_vm1, %v3091_v55  }
 0x13d   :  { %3095 = vst.msk [vmem:[%s7481_s1 + $0x193] ss:$8 sm:$0xc0] %vm3_vm1, %v3091_v55   ;;  %v3521_v52 = vld [vmem:[%s7480_s0 + $0x181] ss:$8 sm:$0xf]  }
 0x13e   :  { %v5511_v12 = vpop.permute.xlu2 %1621   ;;  %1995 = vrot.lane.b32.xlu0 %v1994_v3, %s3708_s27  ;;  %v1545_v15 = vpop.permute.xlu1 %1544   ;;  %v3510_v3 = vld [vmem:[%s7480_s0 + $0x7c6] ss:$8 sm:$0xf]   ;;  %3174 = vst.msk [vmem:[%s7481_s1 + $0x1c0] sm:$0xff] %vm712_vm2, %v4255_v38   ;;  %v2093_v38 = vsel %vm708_vm0, %v3508_v24, %v3507_v0 }
 0x13f   :  { %3359 = vst.msk [vmem:[%s7481_s1 + $0x180] sm:$0xff] %vm1415_vm3, %v1545_v15   ;;  %v2104_v28 = vsel %vm708_vm0, %v3511_v6, %v3510_v3  ;;  %v3527_v55 = vld [vmem:[%s7480_s0 + $0x281] ss:$8 sm:$0xf]   ;;  %v2866_v6 = vld [vmem:[%s7480_s0 + $0x160] ss:$4 sm:$0xff]  }
 0x140   :  { %v1534_v26 = vpop.permute.xlu0 %1533   ;;  %3222 = vst.msk [vmem:[%s7481_s1 + $0x1c8] sm:$0xff] %vm712_vm2, %v4697_v33   ;;  %v3518_v33 = vld [vmem:[%s7480_s0 + $0x101] ss:$8 sm:$0xf]  }
 0x141   :  { %3356 = vst.msk [vmem:[%s7481_s1 + $0x160] sm:$0xff] %vm1415_vm3, %v1534_v26   ;;  %v2082_v26 = vsel %vm708_vm0, %v3505_v18, %v3504_v13  ;;  %v3525_v3 = vld [vmem:[%s7480_s0 + $0x201] ss:$8 sm:$0xf0]  }
 0x142   :  { %3380 = vst.msk [vmem:[%s7481_s1 + $0x68] sm:$0xff] %vm1415_vm3, %v5511_v12   ;;  %v3519_v12 = vld [vmem:[%s7480_s0 + $0x101] ss:$8 sm:$0xf0]  }
 0x143   :  { %v3536_v0 = vld [vmem:[%s7480_s0 + $0x401] ss:$8 sm:$0xf]   ;;  %2867 = vst.msk [vmem:[%s7481_s1 + $0x54] ss:$8 sm:$0x3] %vm3_vm1, %v2866_v6  }
 0x144   :  { %2017 = vrot.lane.b32.xlu2 %v2016_v30, %s3708_s27  ;;  %2039 = vrot.lane.b32.xlu1 %v2038_v16, %s3708_s27  ;;  %v3513_v30 = vld [vmem:[%s7480_s0 + $0x1] ss:$8 sm:$0xf]   ;;  %2868 = vst.msk [vmem:[%s7481_s1 + $0x45] ss:$8 sm:$0xc] %vm3_vm1, %v2866_v6  }
 0x145   :  { %v3514_v16 = vld [vmem:[%s7480_s0 + $0x1] ss:$8 sm:$0xf0]   ;;  %2869 = vst.msk [vmem:[%s7481_s1 + $0x36] ss:$8 sm:$0x30] %vm3_vm1, %v2866_v6  }
 0x146   :  { %v1655_v48 = vpop.permute.xlu2 %1654   ;;  %2028 = vrot.lane.b32.xlu0 %v2027_v36, %s3708_s27  ;;  %v1578_v29 = vpop.permute.xlu1 %1577   ;;  %v2115_v51 = vsel %vm708_vm0, %v3514_v16, %v3513_v30  ;;  %v3533_v30 = vld [vmem:[%s7480_s0 + $0x381] ss:$8 sm:$0xf]   ;;  %2870 = vst.msk [vmem:[%s7481_s1 + $0x27] ss:$8 sm:$0xc0] %vm3_vm1, %v2866_v6  }
 0x147   :  { %3368 = vst.msk [vmem:[%s7481_s1 + $0x1e0] sm:$0xff] %vm1415_vm3, %v1578_v29   ;;  %v2125_v29 = vsel %vm708_vm0, %v3516_v54, %v3515_v37  ;;  %v3545_v37 = vld [vmem:[%s7480_s0 + $0x581] ss:$8 sm:$0xf]  }
 0x148   :  { %v1567_v21 = vpop.permute.xlu0 %1566   ;;  %3389 = vst.msk [vmem:[%s7481_s1 + $0xc8] sm:$0xff] %vm1415_vm3, %v1655_v48   ;;  %v2136_v48 = vsel %vm708_vm0, %v3519_v12, %v3518_v33 }
 0x149   :  { %3365 = vst.msk [vmem:[%s7481_s1 + $0x1c0] sm:$0xff] %vm1415_vm3, %v1567_v21   ;;  %v2861_v21 = vld [vmem:[%s7480_s0 + $0x140] ss:$4 sm:$0xff]  }
 0x14a   :  { %2862 = vst.msk [vmem:[%s7481_s1 + $0x50] ss:$8 sm:$0x3] %vm3_vm1, %v2861_v21  }
 0x14b   :  { %2863 = vst.msk [vmem:[%s7481_s1 + $0x41] ss:$8 sm:$0xc] %vm3_vm1, %v2861_v21  }
 0x14c   :  { %2050 = vrot.lane.b32.xlu2 %v2049_v8, %s3708_s27  ;;  %2072 = vrot.lane.b32.xlu1 %v2071_v31, %s3708_s27  ;;  %v3522_v8 = vld [vmem:[%s7480_s0 + $0x181] ss:$8 sm:$0xf0]   ;;  %2864 = vst.msk [vmem:[%s7481_s1 + $0x32] ss:$8 sm:$0x30] %vm3_vm1, %v2861_v21  }
 0x14d   :  { %v3528_v31 = vld [vmem:[%s7480_s0 + $0x281] ss:$8 sm:$0xf0]   ;;  %2865 = vst.msk [vmem:[%s7481_s1 + $0x23] ss:$8 sm:$0xc0] %vm3_vm1, %v2861_v21  }
 0x14e   :  { %v1688_v25 = vpop.permute.xlu2 %1687   ;;  %2061 = vrot.lane.b32.xlu0 %v2060_v50, %s3708_s27  ;;  %v1611_v19 = vpop.permute.xlu1 %1610   ;;  %v3524_v50 = vld [vmem:[%s7480_s0 + $0x201] ss:$8 sm:$0xf]   ;;  %v2169_v18 = vsel %vm708_vm0, %v3528_v31, %v3527_v55  ;;  %3234 = vst.msk [vmem:[%s7481_s1 + $0x50] sm:$0xff] %vm712_vm2, %v4746_v47   ;;  %v2841_v47 = vld [vmem:[%s7480_s0 + $0xc0] ss:$4 sm:$0xff]  }
 0x14f   :  { %3377 = vst.msk [vmem:[%s7481_s1 + $0x48] sm:$0xff] %vm1415_vm3, %v1611_v19   ;;  %v2158_v19 = vsel %vm708_vm0, %v3525_v3, %v3524_v50  ;;  %v2821_v50 = vld [vmem:[%s7480_s0 + $0x40] ss:$4 sm:$0xff]  }
 0x150   :  { %v1600_v15 = vpop.permute.xlu0 %1599   ;;  %3398 = vst.msk [vmem:[%s7481_s1 + $0x128] sm:$0xff] %vm1415_vm3, %v1688_v25   ;;  %v2147_v25 = vsel %vm708_vm0, %v3522_v8, %v3521_v52  ;;  %v2846_v52 = vld [vmem:[%s7480_s0 + $0xe0] ss:$4 sm:$0xff]   ;;  %v3555_v8 = vld [vmem:[%s7480_s0 + $0x701] ss:$8 sm:$0xf0]  }
 0x151   :  { %3374 = vst.msk [vmem:[%s7481_s1 + $0x28] sm:$0xff] %vm1415_vm3, %v1600_v15   ;;  %v3537_v15 = vld [vmem:[%s7480_s0 + $0x401] ss:$8 sm:$0xf0]  }
 0x152   :  { %v2202_v12 = vsel %vm708_vm0, %v3537_v15, %v3536_v0  ;;  %3282 = vst.msk [vmem:[%s7481_s1 + $0x58] sm:$0xff] %vm712_vm2, %v4887_v34   ;;  %v3540_v15 = vld [vmem:[%s7480_s0 + $0x481] ss:$8 sm:$0xf0]  }
 0x153   :  { %2842 = vst.msk [vmem:[%s7481_s1 + $0x30] ss:$8 sm:$0x3] %vm3_vm1, %v2841_v47  }
 0x154   :  { %2083 = vrot.lane.b32.xlu2 %v2082_v26, %s3708_s27  ;;  %2105 = vrot.lane.b32.xlu1 %v2104_v28, %s3708_s27  ;;  %v3530_v26 = vld [vmem:[%s7480_s0 + $0x301] ss:$8 sm:$0xf]   ;;  %2843 = vst.msk [vmem:[%s7481_s1 + $0x21] ss:$8 sm:$0xc] %vm3_vm1, %v2841_v47  }
 0x155   :  { %v3531_v28 = vld [vmem:[%s7480_s0 + $0x301] ss:$8 sm:$0xf0]   ;;  %2844 = vst.msk [vmem:[%s7481_s1 + $0x12] ss:$8 sm:$0x30] %vm3_vm1, %v2841_v47  }
 0x156   :  { %v1721_v32 = vpop.permute.xlu2 %1720   ;;  %2094 = vrot.lane.b32.xlu0 %v2093_v38, %s3708_s27  ;;  %v1644_v36 = vpop.permute.xlu1 %1643   ;;  %v2180_v16 = vsel %vm708_vm0, %v3531_v28, %v3530_v26  ;;  %2845 = vst.msk [vmem:[%s7481_s1 + $0x3] ss:$8 sm:$0xc0] %vm3_vm1, %v2841_v47   ;;  %v3563_v26 = vld [vmem:[%s7480_s0 + $0x85] ss:$8 sm:$0xf]  }
 0x157   :  { %3386 = vst.msk [vmem:[%s7481_s1 + $0xa8] sm:$0xff] %vm1415_vm3, %v1644_v36   ;;  %v3564_v28 = vld [vmem:[%s7480_s0 + $0x85] ss:$8 sm:$0xf0]  }
 0x158   :  { %v1633_v44 = vpop.permute.xlu0 %1632   ;;  %3407 = vst.msk [vmem:[%s7481_s1 + $0x188] sm:$0xff] %vm1415_vm3, %v1721_v32   ;;  %v3534_v32 = vld [vmem:[%s7480_s0 + $0x381] ss:$8 sm:$0xf0]  }
 0x159   :  { %3383 = vst.msk [vmem:[%s7481_s1 + $0x88] sm:$0xff] %vm1415_vm3, %v1633_v44   ;;  %v2191_v36 = vsel %vm708_vm0, %v3534_v32, %v3533_v30  ;;  %v3546_v44 = vld [vmem:[%s7480_s0 + $0x581] ss:$8 sm:$0xf0]  }
 0x15a   :  { %v2235_v21 = vsel %vm708_vm0, %v3546_v44, %v3545_v37  ;;  %2847 = vst.msk [vmem:[%s7481_s1 + $0x34] ss:$8 sm:$0x3] %vm3_vm1, %v2846_v52   ;;  %v3560_v30 = vld [vmem:[%s7480_s0 + $0x5] ss:$8 sm:$0xf]  }
 0x15b   :  { %2848 = vst.msk [vmem:[%s7481_s1 + $0x25] ss:$8 sm:$0xc] %vm3_vm1, %v2846_v52   ;;  %v3549_v37 = vld [vmem:[%s7480_s0 + $0x601] ss:$8 sm:$0xf0]  }
 0x15c   :  { %2116 = vrot.lane.b32.xlu2 %v2115_v51, %s3709_s7  ;;  %2137 = vrot.lane.b32.xlu1 %v2136_v48, %s3709_s7  ;;  %v3542_v51 = vld [vmem:[%s7480_s0 + $0x501] ss:$8 sm:$0xf]   ;;  %2849 = vst.msk [vmem:[%s7481_s1 + $0x16] ss:$8 sm:$0x30] %vm3_vm1, %v2846_v52  }
 0x15d   :  { %2850 = vst.msk [vmem:[%s7481_s1 + $0x7] ss:$8 sm:$0xc0] %vm3_vm1, %v2846_v52   ;;  %v3572_v44 = vld [vmem:[%s7480_s0 + $0x205] ss:$8 sm:$0xf]  }
 0x15e   :  { %v1754_v4 = vpop.permute.xlu2 %1753   ;;  %2126 = vrot.lane.b32.xlu0 %v2125_v29, %s3709_s7  ;;  %v1677_v1 = vpop.permute.xlu1 %1676   ;;  %v3543_v29 = vld [vmem:[%s7480_s0 + $0x501] ss:$8 sm:$0xf0]   ;;  %3231 = vst.msk [vmem:[%s7481_s1 + $0x30] sm:$0xff] %vm712_vm2, %v4755_v49  }
 0x15f   :  { %3416 = vst.msk [vmem:[%s7481_s1 + $0x1e8] sm:$0xff] %vm1415_vm3, %v1754_v4   ;;  %v2224_v55 = vsel %vm708_vm0, %v3543_v29, %v3542_v51  ;;  %v3554_v4 = vld [vmem:[%s7480_s0 + $0x701] ss:$8 sm:$0xf]  }
 0x160   :  { %3395 = vst.msk [vmem:[%s7481_s1 + $0x108] sm:$0xff] %vm1415_vm3, %v1677_v1   ;;  %v1666_v13 = vpop.permute.xlu0 %1665   ;;  %v3551_v1 = vld [vmem:[%s7480_s0 + $0x681] ss:$8 sm:$0xf]  }
 0x161   :  { %3392 = vst.msk [vmem:[%s7481_s1 + $0xe8] sm:$0xff] %vm1415_vm3, %v1666_v13   ;;  %v3552_v13 = vld [vmem:[%s7480_s0 + $0x681] ss:$8 sm:$0xf0]  }
 0x162   :  { %3279 = vst.msk [vmem:[%s7481_s1 + $0x38] sm:$0xff] %vm712_vm2, %v5012_v17   ;;  %v2268_v17 = vsel %vm708_vm0, %v3555_v8, %v3554_v4  ;;  %v2257_v3 = vsel %vm708_vm0, %v3552_v13, %v3551_v1  ;;  %v3570_v29 = vld [vmem:[%s7480_s0 + $0x185] ss:$8 sm:$0xf0]  }
 0x163   :  { %2822 = vst.msk [vmem:[%s7481_s1 + $0x10] ss:$8 sm:$0x3] %vm3_vm1, %v2821_v50   ;;  %v3557_v4 = vld [vmem:[%s7480_s0 + $0x781] ss:$8 sm:$0xf]  }
 0x164   :  { %2148 = vrot.lane.b32.xlu2 %v2147_v25, %s3709_s7  ;;  %2170 = vrot.lane.b32.xlu1 %v2169_v18, %s3709_s7  ;;  %2823 = vst.msk [vmem:[%s7481_s1 + $0x1] ss:$8 sm:$0xc] %vm3_vm1, %v2821_v50   ;;  %v2826_v25 = vld [vmem:[%s7480_s0 + $0x60] ss:$4 sm:$0xff]  }
 0x165   :  { %2824 = vst.msk [vmem:[%s7481_s1 - $0xe] ss:$8 sm:$0x30] %vm3_vm1, %v2821_v50  }
 0x166   :  { %v1787_v24 = vpop.permute.xlu2 %1786   ;;  %2159 = vrot.lane.b32.xlu0 %v2158_v19, %s3709_s7  ;;  %v1710_v38 = vpop.permute.xlu1 %1709   ;;  %2825 = vst.msk [vmem:[%s7481_s1 - $0x1d] ss:$8 sm:$0xc0] %vm3_vm1, %v2821_v50   ;;  %v3539_v19 = vld [vmem:[%s7480_s0 + $0x481] ss:$8 sm:$0xf]  }
 0x167   :  { %3404 = vst.msk [vmem:[%s7481_s1 + $0x168] sm:$0xff] %vm1415_vm3, %v1710_v38   ;;  %v2301_v38 = vsel %vm708_vm0, %v3564_v28, %v3563_v26  ;;  %v3582_v50 = vld [vmem:[%s7480_s0 + $0x385] ss:$8 sm:$0xf0]  }
 0x168   :  { %v1699_v33 = vpop.permute.xlu0 %1698   ;;  %3425 = vst.msk [vmem:[%s7481_s1 + $0x50] sm:$0xff] %vm1415_vm3, %v1787_v24   ;;  %v2213_v24 = vsel %vm708_vm0, %v3540_v15, %v3539_v19  ;;  %v3567_v19 = vld [vmem:[%s7480_s0 + $0x105] ss:$8 sm:$0xf0]  }
 0x169   :  { %3401 = vst.msk [vmem:[%s7481_s1 + $0x148] sm:$0xff] %vm1415_vm3, %v1699_v33   ;;  %v3561_v33 = vld [vmem:[%s7480_s0 + $0x5] ss:$8 sm:$0xf0]  }
 0x16a   :  { %2827 = vst.msk [vmem:[%s7481_s1 + $0x14] ss:$8 sm:$0x3] %vm3_vm1, %v2826_v25   ;;  %v2290_v32 = vsel %vm708_vm0, %v3561_v33, %v3560_v30  ;;  %v3591_v28 = vld [vmem:[%s7480_s0 + $0x505] ss:$8 sm:$0xf0]  }
 0x16b   :  { %2828 = vst.msk [vmem:[%s7481_s1 + $0x5] ss:$8 sm:$0xc] %vm3_vm1, %v2826_v25   ;;  %v3587_v30 = vld [vmem:[%s7480_s0 + $0x485] ss:$8 sm:$0xf]  }
 0x16c   :  { %2181 = vrot.lane.b32.xlu2 %v2180_v16, %s3709_s7  ;;  %2203 = vrot.lane.b32.xlu1 %v2202_v12, %s3709_s7  ;;  %2829 = vst.msk [vmem:[%s7481_s1 - $0xa] ss:$8 sm:$0x30] %vm3_vm1, %v2826_v25   ;;  %v2906_v16 = vld [vmem:[%s7480_s0 + $0x260] ss:$4 sm:$0xff]  }
 0x16d   :  { %2830 = vst.msk [vmem:[%s7481_s1 - $0x19] ss:$8 sm:$0xc0] %vm3_vm1, %v2826_v25   ;;  %v2886_v12 = vld [vmem:[%s7480_s0 + $0x1e0] ss:$4 sm:$0xff]  }
 0x16e   :  { %v5871_v34 = vpop.permute.xlu2 %1819   ;;  %2192 = vrot.lane.b32.xlu0 %v2191_v36, %s3709_s7  ;;  %v1743_v54 = vpop.permute.xlu1 %1742   ;;  %3228 = vst.msk [vmem:[%s7481_s1 + $0x10] sm:$0xff] %vm712_vm2, %v4563_v59   ;;  %v2921_v59 = vld [vmem:[%s7480_s0 + $0x2c0] ss:$4 sm:$0xff]   ;;  %v3548_v36 = vld [vmem:[%s7480_s0 + $0x601] ss:$8 sm:$0xf]  }
 0x16f   :  { %3413 = vst.msk [vmem:[%s7481_s1 + $0x1c8] sm:$0xff] %vm1415_vm3, %v1743_v54   ;;  %v3573_v54 = vld [vmem:[%s7480_s0 + $0x205] ss:$8 sm:$0xf0]  }
 0x170   :  { %v1732_v48 = vpop.permute.xlu0 %1731   ;;  %3276 = vst.msk [vmem:[%s7481_s1 + $0x18] sm:$0xff] %vm712_vm2, %v5021_v22   ;;  %v2926_v22 = vld [vmem:[%s7480_s0 + $0x2e0] ss:$4 sm:$0xff]   ;;  %v2334_v51 = vsel %vm708_vm0, %v3573_v54, %v3572_v44  ;;  %v3588_v33 = vld [vmem:[%s7480_s0 + $0x485] ss:$8 sm:$0xf0]  }
 0x171   :  { %3410 = vst.msk [vmem:[%s7481_s1 + $0x1a8] sm:$0xff] %vm1415_vm3, %v1732_v48   ;;  %v3569_v48 = vld [vmem:[%s7480_s0 + $0x185] ss:$8 sm:$0xf]  }
 0x172   :  { %2922 = vst.msk [vmem:[%s7481_s1 + $0xb0] ss:$8 sm:$0x3] %vm3_vm1, %v2921_v59   ;;  %v2323_v52 = vsel %vm708_vm0, %v3570_v29, %v3569_v48  ;;  %v3584_v44 = vld [vmem:[%s7480_s0 + $0x405] ss:$8 sm:$0xf]  }
 0x173   :  { %2923 = vst.msk [vmem:[%s7481_s1 + $0xa1] ss:$8 sm:$0xc] %vm3_vm1, %v2921_v59   ;;  %v3585_v54 = vld [vmem:[%s7480_s0 + $0x405] ss:$8 sm:$0xf0]  }
 0x174   :  { %2236 = vrot.lane.b32.xlu1 %v2235_v21, %s3709_s7  ;;  %2924 = vst.msk [vmem:[%s7481_s1 + $0x92] ss:$8 sm:$0x30] %vm3_vm1, %v2921_v59   ;;  %2214 = vrot.lane.b32.xlu2 %v2213_v24, %s3709_s7  ;;  %v2966_v21 = vld [vmem:[%s7480_s0 + $0x3e0] ss:$4 sm:$0xff]  }
 0x175   :  { %2925 = vst.msk [vmem:[%s7481_s1 + $0x83] ss:$8 sm:$0xc0] %vm3_vm1, %v2921_v59   ;;  %v3566_v59 = vld [vmem:[%s7480_s0 + $0x105] ss:$8 sm:$0xf]  }
 0x176   :  { %2225 = vrot.lane.b32.xlu0 %v2224_v55, %s3709_s7  ;;  %v1776_v31 = vpop.permute.xlu1 %1775   ;;  %v6025_v0 = vpop.permute.xlu2 %1852   ;;  %2927 = vst.msk [vmem:[%s7481_s1 + $0xb4] ss:$8 sm:$0x3] %vm3_vm1, %v2926_v22   ;;  %v2946_v55 = vld [vmem:[%s7480_s0 + $0x360] ss:$4 sm:$0xff]   ;;  %v2312_v15 = vsel %vm708_vm0, %v3567_v19, %v3566_v59 }
 0x177   :  { %3422 = vst.msk [vmem:[%s7481_s1 + $0x30] sm:$0xff] %vm1415_vm3, %v1776_v31   ;;  %v3558_v31 = vld [vmem:[%s7480_s0 + $0x781] ss:$8 sm:$0xf0]  }
 0x178   :  { %v1765_v49 = vpop.permute.xlu0 %1764   ;;  %2928 = vst.msk [vmem:[%s7481_s1 + $0xa5] ss:$8 sm:$0xc] %vm3_vm1, %v2926_v22   ;;  %v2279_v1 = vsel %vm708_vm0, %v3558_v31, %v3557_v4  ;;  %v3590_v24 = vld [vmem:[%s7480_s0 + $0x505] ss:$8 sm:$0xf]  }
 0x179   :  { %3419 = vst.msk [vmem:[%s7481_s1 + $0x10] sm:$0xff] %vm1415_vm3, %v1765_v49   ;;  %v3581_v49 = vld [vmem:[%s7480_s0 + $0x385] ss:$8 sm:$0xf]  }
 0x17a   :  { %2929 = vst.msk [vmem:[%s7481_s1 + $0x96] ss:$8 sm:$0x30] %vm3_vm1, %v2926_v22   ;;  %v2367_v13 = vsel %vm708_vm0, %v3582_v50, %v3581_v49  ;;  %v3608_v48 = vld [vmem:[%s7480_s0 + $0x41] ss:$8 sm:$0xf]  }
 0x17b   :  { %2930 = vst.msk [vmem:[%s7481_s1 + $0x87] ss:$8 sm:$0xc0] %vm3_vm1, %v2926_v22   ;;  %v3617_v4 = vld [vmem:[%s7480_s0 + $0x1c1] ss:$8 sm:$0xf]  }
 0x17c   :  { %2269 = vrot.lane.b32.xlu1 %v2268_v17, %s3709_s7  ;;  %3243 = vst.msk [vmem:[%s7481_s1 + $0xb0] sm:$0xff] %vm712_vm2, %v4796_v2   ;;  %v2901_v2 = vld [vmem:[%s7480_s0 + $0x240] ss:$4 sm:$0xff]   ;;  %v3578_v17 = vld [vmem:[%s7480_s0 + $0x305] ss:$8 sm:$0xf]  }
 0x17d   :  { %3434 = vst.msk [vmem:[%s7481_s1 + $0xb0] sm:$0xff] %vm1415_vm3, %v5871_v34   ;;  %v2246_v34 = vsel %vm708_vm0, %v3549_v37, %v3548_v36  ;;  %v3597_v37 = vld [vmem:[%s7480_s0 + $0x605] ss:$8 sm:$0xf0]  }
 0x17e   :  { %2258 = vrot.lane.b32.xlu0 %v2257_v3, %s3709_s7  ;;  %v1809_v18 = vpop.permute.xlu1 %1808   ;;  %3291 = vst.msk [vmem:[%s7481_s1 + $0xb8] sm:$0xff] %vm712_vm2, %v4945_v53   ;;  %v6212_v47 = vpop.permute.xlu2 %1885   ;;  %2247 = vrot.lane.b32.xlu2 %v2246_v34, %s3709_s7  ;;  %v3579_v3 = vld [vmem:[%s7480_s0 + $0x305] ss:$8 sm:$0xf0]  }
 0x17f   :  { %2902 = vst.msk [vmem:[%s7481_s1 + $0x90] ss:$8 sm:$0x3] %vm3_vm1, %v2901_v2   ;;  %v2356_v25 = vsel %vm708_vm0, %v3579_v3, %v3578_v17 }
 0x180   :  { %v1798_v6 = vpop.permute.xlu0 %1797   ;;  %2903 = vst.msk [vmem:[%s7481_s1 + $0x81] ss:$8 sm:$0xc] %vm3_vm1, %v2901_v2  }
 0x181   :  { %2904 = vst.msk [vmem:[%s7481_s1 + $0x72] ss:$8 sm:$0x30] %vm3_vm1, %v2901_v2  }
 0x182   :  { %2905 = vst.msk [vmem:[%s7481_s1 + $0x63] ss:$8 sm:$0xc0] %vm3_vm1, %v2901_v2   ;;  %v3575_v2 = vld [vmem:[%s7480_s0 + $0x285] ss:$8 sm:$0xf]  }
 0x183   :  { %2907 = vst.msk [vmem:[%s7481_s1 + $0x94] ss:$8 sm:$0x3] %vm3_vm1, %v2906_v16  }
 0x184   :  { %2302 = vrot.lane.b32.xlu1 %v2301_v38, %s3709_s7  ;;  %2908 = vst.msk [vmem:[%s7481_s1 + $0x85] ss:$8 sm:$0xc] %vm3_vm1, %v2906_v16   ;;  %v2400_v38 = vsel %vm708_vm0, %v3591_v28, %v3590_v24  ;;  %v3612_v24 = vld [vmem:[%s7480_s0 + $0xc1] ss:$8 sm:$0xf0]  }
 0x185   :  { %2909 = vst.msk [vmem:[%s7481_s1 + $0x76] ss:$8 sm:$0x30] %vm3_vm1, %v2906_v16   ;;  %v3632_v28 = vld [vmem:[%s7480_s0 + $0x441] ss:$8 sm:$0xf]  }
 0x186   :  { %2291 = vrot.lane.b32.xlu0 %v2290_v32, %s3709_s7  ;;  %v6098_v53 = vpop.permute.xlu1 %1841   ;;  %2910 = vst.msk [vmem:[%s7481_s1 + $0x67] ss:$8 sm:$0xc0] %vm3_vm1, %v2906_v16   ;;  %v6401_v8 = vpop.permute.xlu2 %1918   ;;  %2280 = vrot.lane.b32.xlu2 %v2279_v1, %s3709_s7  ;;  %v2389_v32 = vsel %vm708_vm0, %v3588_v33, %v3587_v30  ;;  %v3576_v16 = vld [vmem:[%s7480_s0 + $0x285] ss:$8 sm:$0xf0]  }
 0x187   :  { %3240 = vst.msk [vmem:[%s7481_s1 + $0x90] sm:$0xff] %vm712_vm2, %v4805_v5   ;;  %v2881_v5 = vld [vmem:[%s7480_s0 + $0x1c0] ss:$4 sm:$0xff]   ;;  %v3614_v1 = vld [vmem:[%s7480_s0 + $0x141] ss:$8 sm:$0xf]  }
 0x188   :  { %3431 = vst.msk [vmem:[%s7481_s1 + $0x90] sm:$0xff] %vm1415_vm3, %v1809_v18   ;;  %v3026_v18 = vld [vmem:[%s7480_s0 + $0x560] ss:$4 sm:$0xff]   ;;  %v3633_v30 = vld [vmem:[%s7480_s0 + $0x441] ss:$8 sm:$0xf0]  }
 0x189   :  { %3288 = vst.msk [vmem:[%s7481_s1 + $0x98] sm:$0xff] %vm712_vm2, %v5070_v40   ;;  %v6152_v40 = vpop.permute.xlu0 %1830  }
 0x18a   :  { %2882 = vst.msk [vmem:[%s7481_s1 + $0x70] ss:$8 sm:$0x3] %vm3_vm1, %v2881_v5  }
 0x18b   :  { %2883 = vst.msk [vmem:[%s7481_s1 + $0x61] ss:$8 sm:$0xc] %vm3_vm1, %v2881_v5  }
 0x18c   :  { %2884 = vst.msk [vmem:[%s7481_s1 + $0x52] ss:$8 sm:$0x30] %vm3_vm1, %v2881_v5   ;;  %2335 = vrot.lane.b32.xlu1 %v2334_v51, %s3709_s7  ;;  %v2378_v51 = vsel %vm708_vm0, %v3585_v54, %v3584_v44  ;;  %v3630_v44 = vld [vmem:[%s7480_s0 + $0x3c1] ss:$8 sm:$0xf0]  }
 0x18d   :  { %2885 = vst.msk [vmem:[%s7481_s1 + $0x43] ss:$8 sm:$0xc0] %vm3_vm1, %v2881_v5   ;;  %v3653_v54 = vld [vmem:[%s7480_s0 + $0x7c1] ss:$8 sm:$0xf]  }
 0x18e   :  { %2887 = vst.msk [vmem:[%s7481_s1 + $0x74] ss:$8 sm:$0x3] %vm3_vm1, %v2886_v12   ;;  %2324 = vrot.lane.b32.xlu0 %v2323_v52, %s3709_s7  ;;  %v6590_v22 = vpop.permute.xlu2 %1951   ;;  %2313 = vrot.lane.b32.xlu2 %v2312_v15, %s3709_s7  ;;  %v3609_v52 = vld [vmem:[%s7480_s0 + $0x41] ss:$8 sm:$0xf0]  }
 0x18f   :  { %2888 = vst.msk [vmem:[%s7481_s1 + $0x65] ss:$8 sm:$0xc] %vm3_vm1, %v2886_v12   ;;  %v3611_v15 = vld [vmem:[%s7480_s0 + $0xc1] ss:$8 sm:$0xf]  }
 0x190   :  { %2889 = vst.msk [vmem:[%s7481_s1 + $0x56] ss:$8 sm:$0x30] %vm3_vm1, %v2886_v12  }
 0x191   :  { %2890 = vst.msk [vmem:[%s7481_s1 + $0x47] ss:$8 sm:$0xc0] %vm3_vm1, %v2886_v12   ;;  %v3599_v12 = vld [vmem:[%s7480_s0 + $0x685] ss:$8 sm:$0xf]  }
 0x192   :  { %3237 = vst.msk [vmem:[%s7481_s1 + $0x70] sm:$0xff] %vm712_vm2, %v4621_v11   ;;  %v2981_v11 = vld [vmem:[%s7480_s0 + $0x440] ss:$4 sm:$0xff]  }
 0x193   :  { %3428 = vst.msk [vmem:[%s7481_s1 + $0x70] sm:$0xff] %vm1415_vm3, %v1798_v6   ;;  %v3006_v6 = vld [vmem:[%s7480_s0 + $0x4e0] ss:$4 sm:$0xff]  }
 0x194   :  { %3285 = vst.msk [vmem:[%s7481_s1 + $0x78] sm:$0xff] %vm712_vm2, %v5079_v46   ;;  %v2986_v46 = vld [vmem:[%s7480_s0 + $0x460] ss:$4 sm:$0xff]   ;;  %2368 = vrot.lane.b32.xlu1 %v2367_v13, %s3709_s7 }
 0x195   :  { %2982 = vst.msk [vmem:[%s7481_s1 + $0x110] ss:$8 sm:$0x3] %vm3_vm1, %v2981_v11  }
 0x196   :  { %2983 = vst.msk [vmem:[%s7481_s1 + $0x101] ss:$8 sm:$0xc] %vm3_vm1, %v2981_v11   ;;  %2357 = vrot.lane.b32.xlu0 %v2356_v25, %s3709_s7  ;;  %v3602_v25 = vld [vmem:[%s7480_s0 + $0x705] ss:$8 sm:$0xf]  }
 0x197   :  { %2984 = vst.msk [vmem:[%s7481_s1 + $0xf2] ss:$8 sm:$0x30] %vm3_vm1, %v2981_v11  }
 0x198   :  { %2985 = vst.msk [vmem:[%s7481_s1 + $0xe3] ss:$8 sm:$0xc0] %vm3_vm1, %v2981_v11  }
 0x199   :  { %2987 = vst.msk [vmem:[%s7481_s1 + $0x114] ss:$8 sm:$0x3] %vm3_vm1, %v2986_v46  }
 0x19a   :  { %2988 = vst.msk [vmem:[%s7481_s1 + $0x105] ss:$8 sm:$0xc] %vm3_vm1, %v2986_v46  }
 0x19b   :  { %2989 = vst.msk [vmem:[%s7481_s1 + $0xf6] ss:$8 sm:$0x30] %vm3_vm1, %v2986_v46  }
 0x19c   :  { %2990 = vst.msk [vmem:[%s7481_s1 + $0xe7] ss:$8 sm:$0xc0] %vm3_vm1, %v2986_v46   ;;  %2401 = vrot.lane.b32.xlu1 %v2400_v38, %s3709_s7  ;;  %v3600_v46 = vld [vmem:[%s7480_s0 + $0x685] ss:$8 sm:$0xf0]  }
 0x19d   :  { %3252 = vst.msk [vmem:[%s7481_s1 + $0x110] sm:$0xff] %vm712_vm2, %v4854_v20   ;;  %v2961_v20 = vld [vmem:[%s7480_s0 + $0x3c0] ss:$4 sm:$0xff]   ;;  %v2433_v36 = vsel %vm708_vm0, %v3600_v46, %v3599_v12  ;;  %v3641_v12 = vld [vmem:[%s7480_s0 + $0x5c1] ss:$8 sm:$0xf]  }
 0x19e   :  { %3443 = vst.msk [vmem:[%s7481_s1 + $0x110] sm:$0xff] %vm1415_vm3, %v6025_v0   ;;  %2390 = vrot.lane.b32.xlu0 %v2389_v32, %s3709_s7  ;;  %v3642_v46 = vld [vmem:[%s7480_s0 + $0x5c1] ss:$8 sm:$0xf0]  }
 0x19f   :  { %3300 = vst.msk [vmem:[%s7481_s1 + $0x118] sm:$0xff] %vm712_vm2, %v4995_v10   ;;  %v6285_v10 = vpop.permute.xlu1 %1874  }
 0x1a0   :  { %2962 = vst.msk [vmem:[%s7481_s1 + $0xf0] ss:$8 sm:$0x3] %vm3_vm1, %v2961_v20  }
 0x1a1   :  { %2963 = vst.msk [vmem:[%s7481_s1 + $0xe1] ss:$8 sm:$0xc] %vm3_vm1, %v2961_v20  }
 0x1a2   :  { %2964 = vst.msk [vmem:[%s7481_s1 + $0xd2] ss:$8 sm:$0x30] %vm3_vm1, %v2961_v20  }
 0x1a3   :  { %2965 = vst.msk [vmem:[%s7481_s1 + $0xc3] ss:$8 sm:$0xc0] %vm3_vm1, %v2961_v20  }
 0x1a4   :  { %2967 = vst.msk [vmem:[%s7481_s1 + $0xf4] ss:$8 sm:$0x3] %vm3_vm1, %v2966_v21   ;;  %2434 = vrot.lane.b32.xlu1 %v2433_v36, %s3709_s7 }
 0x1a5   :  { %2968 = vst.msk [vmem:[%s7481_s1 + $0xe5] ss:$8 sm:$0xc] %vm3_vm1, %v2966_v21  }
 0x1a6   :  { %2969 = vst.msk [vmem:[%s7481_s1 + $0xd6] ss:$8 sm:$0x30] %vm3_vm1, %v2966_v21  }
 0x1a7   :  { %2970 = vst.msk [vmem:[%s7481_s1 + $0xc7] ss:$8 sm:$0xc0] %vm3_vm1, %v2966_v21   ;;  %v3605_v21 = vld [vmem:[%s7480_s0 + $0x785] ss:$8 sm:$0xf]  }
 0x1a8   :  { %3249 = vst.msk [vmem:[%s7481_s1 + $0xf0] sm:$0xff] %vm712_vm2, %v4863_v23   ;;  %v2941_v23 = vld [vmem:[%s7480_s0 + $0x340] ss:$4 sm:$0xff]  }
 0x1a9   :  { %3440 = vst.msk [vmem:[%s7481_s1 + $0xf0] sm:$0xff] %vm1415_vm3, %v6098_v53   ;;  %v6681_v53 = vpop.permute.xlu2 %1984  }
 0x1aa   :  { %3297 = vst.msk [vmem:[%s7481_s1 + $0xf8] sm:$0xff] %vm712_vm2, %v5123_v41   ;;  %v6340_v41 = vpop.permute.xlu0 %1863  }
 0x1ab   :  { %2942 = vst.msk [vmem:[%s7481_s1 + $0xd0] ss:$8 sm:$0x3] %vm3_vm1, %v2941_v23  }
 0x1ac   :  { %2943 = vst.msk [vmem:[%s7481_s1 + $0xc1] ss:$8 sm:$0xc] %vm3_vm1, %v2941_v23  }
 0x1ad   :  { %2944 = vst.msk [vmem:[%s7481_s1 + $0xb2] ss:$8 sm:$0x30] %vm3_vm1, %v2941_v23  }
 0x1ae   :  { %2945 = vst.msk [vmem:[%s7481_s1 + $0xa3] ss:$8 sm:$0xc0] %vm3_vm1, %v2941_v23  }
 0x1af   :  { %2947 = vst.msk [vmem:[%s7481_s1 + $0xd4] ss:$8 sm:$0x3] %vm3_vm1, %v2946_v55  }
 0x1b0   :  { %2948 = vst.msk [vmem:[%s7481_s1 + $0xc5] ss:$8 sm:$0xc] %vm3_vm1, %v2946_v55  }
 0x1b1   :  { %2949 = vst.msk [vmem:[%s7481_s1 + $0xb6] ss:$8 sm:$0x30] %vm3_vm1, %v2946_v55   ;;  %v6759_v29 = vpop.permute.xlu2 %2017  }
 0x1b2   :  { %2950 = vst.msk [vmem:[%s7481_s1 + $0xa7] ss:$8 sm:$0xc0] %vm3_vm1, %v2946_v55  }
 0x1b3   :  { %3246 = vst.msk [vmem:[%s7481_s1 + $0xd0] sm:$0xff] %vm712_vm2, %v4671_v27   ;;  %v3041_v27 = vld [vmem:[%s7480_s0 + $0x5c0] ss:$4 sm:$0xff]  }
 0x1b4   :  { %3437 = vst.msk [vmem:[%s7481_s1 + $0xd0] sm:$0xff] %vm1415_vm3, %v6152_v40   ;;  %v2345_v40 = vsel %vm708_vm0, %v3576_v16, %v3575_v2  ;;  %v3620_v2 = vld [vmem:[%s7480_s0 + $0x241] ss:$8 sm:$0xf]  }
 0x1b5   :  { %3294 = vst.msk [vmem:[%s7481_s1 + $0xd8] sm:$0xff] %vm712_vm2, %v5132_v9   ;;  %v3046_v9 = vld [vmem:[%s7480_s0 + $0x5e0] ss:$4 sm:$0xff]   ;;  %2346 = vrot.lane.b32.xlu2 %v2345_v40, %s3709_s7  ;;  %v3644_v16 = vld [vmem:[%s7480_s0 + $0x641] ss:$8 sm:$0xf]  }
 0x1b6   :  { %3042 = vst.msk [vmem:[%s7481_s1 + $0x170] ss:$8 sm:$0x3] %vm3_vm1, %v3041_v27  }
 0x1b7   :  { %3043 = vst.msk [vmem:[%s7481_s1 + $0x161] ss:$8 sm:$0xc] %vm3_vm1, %v3041_v27  }
 0x1b8   :  { %3044 = vst.msk [vmem:[%s7481_s1 + $0x152] ss:$8 sm:$0x30] %vm3_vm1, %v3041_v27  }
 0x1b9   :  { %3045 = vst.msk [vmem:[%s7481_s1 + $0x143] ss:$8 sm:$0xc0] %vm3_vm1, %v3041_v27   ;;  %v3593_v27 = vld [vmem:[%s7480_s0 + $0x585] ss:$8 sm:$0xf]   ;;  %v6827_v49 = vpop.permute.xlu2 %2050  }
 0x1ba   :  { %3047 = vst.msk [vmem:[%s7481_s1 + $0x174] ss:$8 sm:$0x3] %vm3_vm1, %v3046_v9  }
 0x1bb   :  { %3048 = vst.msk [vmem:[%s7481_s1 + $0x165] ss:$8 sm:$0xc] %vm3_vm1, %v3046_v9  }
 0x1bc   :  { %3049 = vst.msk [vmem:[%s7481_s1 + $0x156] ss:$8 sm:$0x30] %vm3_vm1, %v3046_v9  }
 0x1bd   :  { %3050 = vst.msk [vmem:[%s7481_s1 + $0x147] ss:$8 sm:$0xc0] %vm3_vm1, %v3046_v9   ;;  %2379 = vrot.lane.b32.xlu2 %v2378_v51, %s3709_s7  ;;  %v3594_v9 = vld [vmem:[%s7480_s0 + $0x585] ss:$8 sm:$0xf0]  }
 0x1be   :  { %3261 = vst.msk [vmem:[%s7481_s1 + $0x170] sm:$0xff] %vm712_vm2, %v4904_v43   ;;  %v3021_v43 = vld [vmem:[%s7480_s0 + $0x540] ss:$4 sm:$0xff]   ;;  %v2411_v31 = vsel %vm708_vm0, %v3594_v9, %v3593_v27  ;;  %v3662_v27 = vld [vmem:[%s7480_s0 + $0x145] ss:$8 sm:$0xf]  }
 0x1bf   :  { %3452 = vst.msk [vmem:[%s7481_s1 + $0x170] sm:$0xff] %vm1415_vm3, %v6212_v47   ;;  %v3596_v47 = vld [vmem:[%s7480_s0 + $0x605] ss:$8 sm:$0xf]  }
 0x1c0   :  { %3309 = vst.msk [vmem:[%s7481_s1 + $0x178] sm:$0xff] %vm712_vm2, %v5053_v35   ;;  %v6474_v35 = vpop.permute.xlu1 %1907   ;;  %v2422_v34 = vsel %vm708_vm0, %v3597_v37, %v3596_v47  ;;  %v3663_v9 = vld [vmem:[%s7480_s0 + $0x145] ss:$8 sm:$0xf0]  }
 0x1c1   :  { %3022 = vst.msk [vmem:[%s7481_s1 + $0x150] ss:$8 sm:$0x3] %vm3_vm1, %v3021_v43   ;;  %2423 = vrot.lane.b32.xlu0 %v2422_v34, %s3709_s7  ;;  %v3629_v34 = vld [vmem:[%s7480_s0 + $0x3c1] ss:$8 sm:$0xf]  }
 0x1c2   :  { %3023 = vst.msk [vmem:[%s7481_s1 + $0x141] ss:$8 sm:$0xc] %vm3_vm1, %v3021_v43   ;;  %v2543_v51 = vsel %vm708_vm0, %v3630_v44, %v3629_v34  ;;  %v3695_v44 = vld [vmem:[%s7480_s0 + $0x6c5] ss:$8 sm:$0xf]  }
 0x1c3   :  { %3024 = vst.msk [vmem:[%s7481_s1 + $0x132] ss:$8 sm:$0x30] %vm3_vm1, %v3021_v43  }
 0x1c4   :  { %3025 = vst.msk [vmem:[%s7481_s1 + $0x123] ss:$8 sm:$0xc0] %vm3_vm1, %v3021_v43   ;;  %v3126_v43 = vld [vmem:[%s7480_s0 + $0x7e0] ss:$4 sm:$0xff]  }
 0x1c5   :  { %3027 = vst.msk [vmem:[%s7481_s1 + $0x154] ss:$8 sm:$0x3] %vm3_vm1, %v3026_v18   ;;  %2412 = vrot.lane.b32.xlu2 %v2411_v31, %s3709_s7 }
 0x1c6   :  { %3028 = vst.msk [vmem:[%s7481_s1 + $0x145] ss:$8 sm:$0xc] %vm3_vm1, %v3026_v18  }
 0x1c7   :  { %3029 = vst.msk [vmem:[%s7481_s1 + $0x136] ss:$8 sm:$0x30] %vm3_vm1, %v3026_v18  }
 0x1c8   :  { %3030 = vst.msk [vmem:[%s7481_s1 + $0x127] ss:$8 sm:$0xc0] %vm3_vm1, %v3026_v18   ;;  %v6599_v0 = vpop.permute.xlu1 %1940   ;;  %v3626_v18 = vld [vmem:[%s7480_s0 + $0x341] ss:$8 sm:$0xf]  }
 0x1c9   :  { %3258 = vst.msk [vmem:[%s7481_s1 + $0x150] sm:$0xff] %vm712_vm2, %v4913_v39   ;;  %v3001_v39 = vld [vmem:[%s7480_s0 + $0x4c0] ss:$4 sm:$0xff]  }
 0x1ca   :  { %3449 = vst.msk [vmem:[%s7481_s1 + $0x150] sm:$0xff] %vm1415_vm3, %v6285_v10   ;;  %v2466_v10 = vsel %vm708_vm0, %v3609_v52, %v3608_v48  ;;  %v3650_v48 = vld [vmem:[%s7480_s0 + $0x741] ss:$8 sm:$0xf]  }
 0x1cb   :  { %3306 = vst.msk [vmem:[%s7481_s1 + $0x158] sm:$0xff] %vm712_vm2, %v5176_v56   ;;  %v6529_v56 = vpop.permute.xlu0 %1896   ;;  %2467 = vrot.lane.b32.xlu1 %v2466_v10, %s3709_s7  ;;  %v3651_v52 = vld [vmem:[%s7480_s0 + $0x741] ss:$8 sm:$0xf0]  }
 0x1cc   :  { %3002 = vst.msk [vmem:[%s7481_s1 + $0x130] ss:$8 sm:$0x3] %vm3_vm1, %v3001_v39  }
 0x1cd   :  { %3003 = vst.msk [vmem:[%s7481_s1 + $0x121] ss:$8 sm:$0xc] %vm3_vm1, %v3001_v39  }
 0x1ce   :  { %3004 = vst.msk [vmem:[%s7481_s1 + $0x112] ss:$8 sm:$0x30] %vm3_vm1, %v3001_v39  }
 0x1cf   :  { %3005 = vst.msk [vmem:[%s7481_s1 + $0x103] ss:$8 sm:$0xc0] %vm3_vm1, %v3001_v39   ;;  %v3627_v39 = vld [vmem:[%s7480_s0 + $0x341] ss:$8 sm:$0xf0]  }
 0x1d0   :  { %3007 = vst.msk [vmem:[%s7481_s1 + $0x134] ss:$8 sm:$0x3] %vm3_vm1, %v3006_v6   ;;  %v6690_v5 = vpop.permute.xlu1 %1973  }
 0x1d1   :  { %3008 = vst.msk [vmem:[%s7481_s1 + $0x125] ss:$8 sm:$0xc] %vm3_vm1, %v3006_v6  }
 0x1d2   :  { %3009 = vst.msk [vmem:[%s7481_s1 + $0x116] ss:$8 sm:$0x30] %vm3_vm1, %v3006_v6  }
 0x1d3   :  { %3010 = vst.msk [vmem:[%s7481_s1 + $0x107] ss:$8 sm:$0xc0] %vm3_vm1, %v3006_v6   ;;  %v6609_v26 = vpop.permute.xlu0 %1929   ;;  %v3623_v6 = vld [vmem:[%s7480_s0 + $0x2c1] ss:$8 sm:$0xf]  }
 0x1d4   :  { %3255 = vst.msk [vmem:[%s7481_s1 + $0x130] sm:$0xff] %vm712_vm2, %v4729_v42   ;;  %v3101_v42 = vld [vmem:[%s7480_s0 + $0x740] ss:$4 sm:$0xff]  }
 0x1d5   :  { %3446 = vst.msk [vmem:[%s7481_s1 + $0x130] sm:$0xff] %vm1415_vm3, %v6340_v41   ;;  %v3606_v41 = vld [vmem:[%s7480_s0 + $0x785] ss:$8 sm:$0xf0]  }
 0x1d6   :  { %3303 = vst.msk [vmem:[%s7481_s1 + $0x138] sm:$0xff] %vm712_vm2, %v5185_v62   ;;  %v3106_v62 = vld [vmem:[%s7480_s0 + $0x760] ss:$4 sm:$0xff]   ;;  %v2455_v55 = vsel %vm708_vm0, %v3606_v41, %v3605_v21  ;;  %v3638_v41 = vld [vmem:[%s7480_s0 + $0x541] ss:$8 sm:$0xf]  }
 0x1d7   :  { %3102 = vst.msk [vmem:[%s7481_s1 + $0x1d0] ss:$8 sm:$0x3] %vm3_vm1, %v3101_v42   ;;  %2456 = vrot.lane.b32.xlu0 %v2455_v55, %s3709_s7  ;;  %v3639_v55 = vld [vmem:[%s7480_s0 + $0x541] ss:$8 sm:$0xf0]  }
 0x1d8   :  { %3103 = vst.msk [vmem:[%s7481_s1 + $0x1c1] ss:$8 sm:$0xc] %vm3_vm1, %v3101_v42   ;;  %v6768_v20 = vpop.permute.xlu1 %2006  }
 0x1d9   :  { %3104 = vst.msk [vmem:[%s7481_s1 + $0x1b2] ss:$8 sm:$0x30] %vm3_vm1, %v3101_v42  }
 0x1da   :  { %3105 = vst.msk [vmem:[%s7481_s1 + $0x1a3] ss:$8 sm:$0xc0] %vm3_vm1, %v3101_v42   ;;  %v2084_v42 = vpop.permute.xlu2 %2083  }
 0x1db   :  { %3107 = vst.msk [vmem:[%s7481_s1 + $0x1d4] ss:$8 sm:$0x3] %vm3_vm1, %v3106_v62   ;;  %v6700_v11 = vpop.permute.xlu0 %1962  }
 0x1dc   :  { %3108 = vst.msk [vmem:[%s7481_s1 + $0x1c5] ss:$8 sm:$0xc] %vm3_vm1, %v3106_v62  }
 0x1dd   :  { %3109 = vst.msk [vmem:[%s7481_s1 + $0x1b6] ss:$8 sm:$0x30] %vm3_vm1, %v3106_v62  }
 0x1de   :  { %3110 = vst.msk [vmem:[%s7481_s1 + $0x1a7] ss:$8 sm:$0xc0] %vm3_vm1, %v3106_v62   ;;  %v3624_v62 = vld [vmem:[%s7480_s0 + $0x2c1] ss:$8 sm:$0xf0]  }
 0x1df   :  { %3270 = vst.msk [vmem:[%s7481_s1 + $0x1d0] sm:$0xff] %vm712_vm2, %v4962_v58   ;;  %v3081_v58 = vld [vmem:[%s7480_s0 + $0x6c0] ss:$4 sm:$0xff]  }
 0x1e0   :  { %3461 = vst.msk [vmem:[%s7481_s1 + $0x1d0] sm:$0xff] %vm1415_vm3, %v6401_v8   ;;  %v3618_v8 = vld [vmem:[%s7480_s0 + $0x1c1] ss:$8 sm:$0xf0]   ;;  %v6837_v50 = vpop.permute.xlu1 %2039  }
 0x1e1   :  { %3318 = vst.msk [vmem:[%s7481_s1 + $0x1d8] sm:$0xff] %vm712_vm2, %v5107_v57   ;;  %v3086_v57 = vld [vmem:[%s7480_s0 + $0x6e0] ss:$4 sm:$0xff]   ;;  %v2499_v13 = vsel %vm708_vm0, %v3618_v8, %v3617_v4  ;;  %v2576_v4 = vsel %vm708_vm0, %v3639_v55, %v3638_v41  ;;  %v3659_v8 = vld [vmem:[%s7480_s0 + $0xc5] ss:$8 sm:$0xf]  }
 0x1e2   :  { %3082 = vst.msk [vmem:[%s7481_s1 + $0x1b0] ss:$8 sm:$0x3] %vm3_vm1, %v3081_v58   ;;  %2500 = vrot.lane.b32.xlu1 %v2499_v13, %s3709_s7  ;;  %v2117_v38 = vpop.permute.xlu2 %2116  }
 0x1e3   :  { %3083 = vst.msk [vmem:[%s7481_s1 + $0x1a1] ss:$8 sm:$0xc] %vm3_vm1, %v3081_v58   ;;  %v6778_v23 = vpop.permute.xlu0 %1995  }
 0x1e4   :  { %3084 = vst.msk [vmem:[%s7481_s1 + $0x192] ss:$8 sm:$0x30] %vm3_vm1, %v3081_v58  }
 0x1e5   :  { %3085 = vst.msk [vmem:[%s7481_s1 + $0x183] ss:$8 sm:$0xc0] %vm3_vm1, %v3081_v58  }
 0x1e6   :  { %3087 = vst.msk [vmem:[%s7481_s1 + $0x1b4] ss:$8 sm:$0x3] %vm3_vm1, %v3086_v57  }
 0x1e7   :  { %3088 = vst.msk [vmem:[%s7481_s1 + $0x1a5] ss:$8 sm:$0xc] %vm3_vm1, %v3086_v57  }
 0x1e8   :  { %3089 = vst.msk [vmem:[%s7481_s1 + $0x196] ss:$8 sm:$0x30] %vm3_vm1, %v3086_v57   ;;  %v2073_v59 = vpop.permute.xlu1 %2072  }
 0x1e9   :  { %3090 = vst.msk [vmem:[%s7481_s1 + $0x187] ss:$8 sm:$0xc0] %vm3_vm1, %v3086_v57   ;;  %v2554_v57 = vsel %vm708_vm0, %v3633_v30, %v3632_v28 }
 0x1ea   :  { %3267 = vst.msk [vmem:[%s7481_s1 + $0x1b0] sm:$0xff] %vm712_vm2, %v4971_v63   ;;  %v3061_v63 = vld [vmem:[%s7480_s0 + $0x640] ss:$4 sm:$0xff]  }
 0x1eb   :  { %3458 = vst.msk [vmem:[%s7481_s1 + $0x1b0] sm:$0xff] %vm1415_vm3, %v6474_v35   ;;  %v6845_v17 = vpop.permute.xlu0 %2028   ;;  %v3603_v35 = vld [vmem:[%s7480_s0 + $0x705] ss:$8 sm:$0xf0]  }
 0x1ec   :  { %3315 = vst.msk [vmem:[%s7481_s1 + $0x1b8] sm:$0xff] %vm712_vm2, %v5227_v61   ;;  %v3066_v61 = vld [vmem:[%s7480_s0 + $0x660] ss:$4 sm:$0xff]  }
 0x1ed   :  { %3062 = vst.msk [vmem:[%s7481_s1 + $0x190] ss:$8 sm:$0x3] %vm3_vm1, %v3061_v63  }
 0x1ee   :  { %3063 = vst.msk [vmem:[%s7481_s1 + $0x181] ss:$8 sm:$0xc] %vm3_vm1, %v3061_v63  }
 0x1ef   :  { %3064 = vst.msk [vmem:[%s7481_s1 + $0x172] ss:$8 sm:$0x30] %vm3_vm1, %v3061_v63  }
 0x1f0   :  { %3065 = vst.msk [vmem:[%s7481_s1 + $0x163] ss:$8 sm:$0xc0] %vm3_vm1, %v3061_v63   ;;  %v2106_v33 = vpop.permute.xlu1 %2105   ;;  %v2587_v63 = vsel %vm708_vm0, %v3642_v46, %v3641_v12 }
 0x1f1   :  { %3067 = vst.msk [vmem:[%s7481_s1 + $0x194] ss:$8 sm:$0x3] %vm3_vm1, %v3066_v61  }
 0x1f2   :  { %3068 = vst.msk [vmem:[%s7481_s1 + $0x185] ss:$8 sm:$0xc] %vm3_vm1, %v3066_v61  }
 0x1f3   :  { %3069 = vst.msk [vmem:[%s7481_s1 + $0x176] ss:$8 sm:$0x30] %vm3_vm1, %v3066_v61   ;;  %v2062_v19 = vpop.permute.xlu0 %2061  }
 0x1f4   :  { %3070 = vst.msk [vmem:[%s7481_s1 + $0x167] ss:$8 sm:$0xc0] %vm3_vm1, %v3066_v61   ;;  %v3654_v61 = vld [vmem:[%s7480_s0 + $0x7c1] ss:$8 sm:$0xf0]  }
 0x1f5   :  { %3264 = vst.msk [vmem:[%s7481_s1 + $0x190] sm:$0xff] %vm712_vm2, %v4779_v60   ;;  %v3615_v60 = vld [vmem:[%s7480_s0 + $0x141] ss:$8 sm:$0xf0]   ;;  %v2631_v10 = vsel %vm708_vm0, %v3654_v61, %v3653_v54 }
 0x1f6   :  { %3455 = vst.msk [vmem:[%s7481_s1 + $0x190] sm:$0xff] %vm1415_vm3, %v6529_v56   ;;  %v2488_v3 = vsel %vm708_vm0, %v3615_v60, %v3614_v1  ;;  %v2444_v56 = vsel %vm708_vm0, %v3603_v35, %v3602_v25  ;;  %v3660_v1 = vld [vmem:[%s7480_s0 + $0xc5] ss:$8 sm:$0xf0]   ;;  %v2664_v60 = vsel %vm708_vm0, %v3663_v9, %v3662_v27 }
 0x1f7   :  { %3312 = vst.msk [vmem:[%s7481_s1 + $0x198] sm:$0xff] %vm712_vm2, %v5236_v7   ;;  %v3121_v7 = vld [vmem:[%s7480_s0 + $0x7c0] ss:$4 sm:$0xff]   ;;  %2489 = vrot.lane.b32.xlu0 %v2488_v3, %s3709_s7  ;;  %2445 = vrot.lane.b32.xlu2 %v2444_v56, %s3709_s7  ;;  %v2653_v13 = vsel %vm708_vm0, %v3660_v1, %v3659_v8 }
 0x1f8   :  { %3470 = vst.msk [vmem:[%s7481_s1 + $0x38] sm:$0xff] %vm1415_vm3, %v6590_v22   ;;  %v2532_v22 = vsel %vm708_vm0, %v3627_v39, %v3626_v18  ;;  %v2138_v36 = vpop.permute.xlu1 %2137   ;;  %v3671_v3 = vld [vmem:[%s7480_s0 + $0x2c5] ss:$8 sm:$0xf]  }
 0x1f9   :  { %3467 = vst.msk [vmem:[%s7481_s1 + $0x18] sm:$0xff] %vm1415_vm3, %v6599_v0   ;;  %v2521_v0 = vsel %vm708_vm0, %v3624_v62, %v3623_v6  ;;  %2533 = vrot.lane.b32.xlu1 %v2532_v22, %s3709_s7  ;;  %v3672_v25 = vld [vmem:[%s7480_s0 + $0x2c5] ss:$8 sm:$0xf0]  }
 0x1fa   :  { %3122 = vst.msk [vmem:[%s7481_s1 + $0x1f0] ss:$8 sm:$0x3] %vm3_vm1, %v3121_v7   ;;  %v3668_v35 = vld [vmem:[%s7480_s0 + $0x245] ss:$8 sm:$0xf]   ;;  %v2697_v6 = vsel %vm708_vm0, %v3672_v25, %v3671_v3 }
 0x1fb   :  { %3123 = vst.msk [vmem:[%s7481_s1 + $0x1e1] ss:$8 sm:$0xc] %vm3_vm1, %v3121_v7   ;;  %v2095_v58 = vpop.permute.xlu0 %2094   ;;  %v3669_v39 = vld [vmem:[%s7480_s0 + $0x245] ss:$8 sm:$0xf0]  }
 0x1fc   :  { %3124 = vst.msk [vmem:[%s7481_s1 + $0x1d2] ss:$8 sm:$0x30] %vm3_vm1, %v3121_v7   ;;  %v2686_v62 = vsel %vm708_vm0, %v3669_v39, %v3668_v35  ;;  %v3657_v22 = vld [vmem:[%s7480_s0 + $0x45] ss:$8 sm:$0xf0]  }
 0x1fd   :  { %3125 = vst.msk [vmem:[%s7481_s1 + $0x1c3] ss:$8 sm:$0xc0] %vm3_vm1, %v3121_v7   ;;  %v3648_v7 = vld [vmem:[%s7480_s0 + $0x6c1] ss:$8 sm:$0xf0]  }
 0x1fe   :  { %3127 = vst.msk [vmem:[%s7481_s1 + $0x1f4] ss:$8 sm:$0x3] %vm3_vm1, %v3126_v43   ;;  %v3696_v54 = vld [vmem:[%s7480_s0 + $0x6c5] ss:$8 sm:$0xf0]  }
 0x1ff   :  { %3128 = vst.msk [vmem:[%s7481_s1 + $0x1e5] ss:$8 sm:$0xc] %vm3_vm1, %v3126_v43   ;;  %2522 = vrot.lane.b32.xlu0 %v2521_v0, %s3709_s7  ;;  %v3681_v0 = vld [vmem:[%s7480_s0 + $0x445] ss:$8 sm:$0xf0]  }
 0x200   :  { %3129 = vst.msk [vmem:[%s7481_s1 + $0x1d6] ss:$8 sm:$0x30] %vm3_vm1, %v3126_v43   ;;  %v3692_v27 = vld [vmem:[%s7480_s0 + $0x645] ss:$8 sm:$0xf]  }
 0x201   :  { %3130 = vst.msk [vmem:[%s7481_s1 + $0x1c7] ss:$8 sm:$0xc0] %vm3_vm1, %v3126_v43   ;;  %v3693_v9 = vld [vmem:[%s7480_s0 + $0x645] ss:$8 sm:$0xf0]  }
 0x202   :  { %3273 = vst.msk [vmem:[%s7481_s1 + $0x1f0] sm:$0xff] %vm712_vm2, %v4837_v14   ;;  %v3635_v14 = vld [vmem:[%s7480_s0 + $0x4c1] ss:$8 sm:$0xf]  }
 0x203   :  { %3464 = vst.msk [vmem:[%s7481_s1 + $0x1f0] sm:$0xff] %vm1415_vm3, %v6609_v26   ;;  %v3636_v26 = vld [vmem:[%s7480_s0 + $0x4c1] ss:$8 sm:$0xf0]   ;;  %v2127_v37 = vpop.permute.xlu0 %2126  }
 0x204   :  { %3321 = vst.msk [vmem:[%s7481_s1 + $0x1f8] sm:$0xff] %vm712_vm2, %v5291_v45   ;;  %v2477_v45 = vsel %vm708_vm0, %v3612_v24, %v3611_v15  ;;  %v2565_v32 = vsel %vm708_vm0, %v3636_v26, %v3635_v14  ;;  %v3677_v24 = vld [vmem:[%s7480_s0 + $0x3c5] ss:$8 sm:$0xf]  }
 0x205   :  { %3479 = vst.msk [vmem:[%s7481_s1 + $0x98] sm:$0xff] %vm1415_vm3, %v6681_v53   ;;  %2478 = vrot.lane.b32.xlu2 %v2477_v45, %s3709_s7  ;;  %2566 = vrot.lane.b32.xlu1 %v2565_v32, %s3709_s7  ;;  %v3621_v53 = vld [vmem:[%s7480_s0 + $0x241] ss:$8 sm:$0xf0]  }
 0x206   :  { %3476 = vst.msk [vmem:[%s7481_s1 + $0x78] sm:$0xff] %vm1415_vm3, %v6690_v5   ;;  %v3645_v5 = vld [vmem:[%s7480_s0 + $0x641] ss:$8 sm:$0xf0]   ;;  %v2510_v40 = vsel %vm708_vm0, %v3621_v53, %v3620_v2 }
 0x207   :  { %3473 = vst.msk [vmem:[%s7481_s1 + $0x58] sm:$0xff] %vm1415_vm3, %v6700_v11   ;;  %2555 = vrot.lane.b32.xlu0 %v2554_v57, %s3709_s7  ;;  %v2149_v11 = vpop.permute.xlu2 %2148   ;;  %v2598_v47 = vsel %vm708_vm0, %v3645_v5, %v3644_v16  ;;  %v3678_v26 = vld [vmem:[%s7480_s0 + $0x3c5] ss:$8 sm:$0xf0]  }
 0x208   :  { %3488 = vst.msk [vmem:[%s7481_s1 + $0xf8] sm:$0xff] %vm1415_vm3, %v6759_v29   ;;  %v2719_v30 = vsel %vm708_vm0, %v3678_v26, %v3677_v24  ;;  %v3666_v32 = vld [vmem:[%s7480_s0 + $0x1c5] ss:$8 sm:$0xf0]  }
 0x209   :  { %3485 = vst.msk [vmem:[%s7481_s1 + $0xd8] sm:$0xff] %vm1415_vm3, %v6768_v20   ;;  %v2171_v20 = vpop.permute.xlu1 %2170   ;;  %v3690_v57 = vld [vmem:[%s7480_s0 + $0x5c5] ss:$8 sm:$0xf0]  }
 0x20a   :  { %3482 = vst.msk [vmem:[%s7481_s1 + $0xb8] sm:$0xff] %vm1415_vm3, %v6778_v23   ;;  %v2620_v23 = vsel %vm708_vm0, %v3651_v52, %v3650_v48  ;;  %v3686_v53 = vld [vmem:[%s7480_s0 + $0x545] ss:$8 sm:$0xf]  }
 0x20b   :  { %3497 = vst.msk [vmem:[%s7481_s1 + $0x158] sm:$0xff] %vm1415_vm3, %v6827_v49   ;;  %v2160_v21 = vpop.permute.xlu0 %2159   ;;  %v3687_v5 = vld [vmem:[%s7480_s0 + $0x545] ss:$8 sm:$0xf0]  }
 0x20c   :  { %3494 = vst.msk [vmem:[%s7481_s1 + $0x138] sm:$0xff] %vm1415_vm3, %v6837_v50   ;;  %v2752_v46 = vsel %vm708_vm0, %v3687_v5, %v3686_v53  ;;  %v3701_v1 = vld [vmem:[%s7480_s0 + $0x7c5] ss:$8 sm:$0xf]  }
 0x20d   :  { %3491 = vst.msk [vmem:[%s7481_s1 + $0x118] sm:$0xff] %vm1415_vm3, %v6845_v17   ;;  %2511 = vrot.lane.b32.xlu2 %v2510_v40, %s3709_s7  ;;  %2599 = vrot.lane.b32.xlu1 %v2598_v47, %s3709_s7  ;;  %v3647_v17 = vld [vmem:[%s7480_s0 + $0x6c1] ss:$8 sm:$0xf]  }
 0x20e   :  { %3506 = vst.msk [vmem:[%s7481_s1 + $0x1b8] sm:$0xff] %vm1415_vm3, %v2084_v42   ;;  %v2609_v43 = vsel %vm708_vm0, %v3648_v7, %v3647_v17  ;;  %v3675_v47 = vld [vmem:[%s7480_s0 + $0x345] ss:$8 sm:$0xf0]  }
 0x20f   :  { %3503 = vst.msk [vmem:[%s7481_s1 + $0x198] sm:$0xff] %vm1415_vm3, %v2073_v59   ;;  %2588 = vrot.lane.b32.xlu0 %v2587_v63, %s3709_s7  ;;  %v2182_v29 = vpop.permute.xlu2 %2181   ;;  %v3656_v59 = vld [vmem:[%s7480_s0 + $0x45] ss:$8 sm:$0xf]  }
 0x210   :  { %3500 = vst.msk [vmem:[%s7481_s1 + $0x178] sm:$0xff] %vm1415_vm3, %v2062_v19   ;;  %v3680_v19 = vld [vmem:[%s7480_s0 + $0x445] ss:$8 sm:$0xf]   ;;  %v2642_v15 = vsel %vm708_vm0, %v3657_v22, %v3656_v59 }
 0x211   :  { %2119 = vst.msk [vmem:[%s7481_s1] sm:$0xff] %vm2118_vm4, %v2117_v38   ;;  %v2204_v49 = vpop.permute.xlu1 %2203   ;;  %v2730_v28 = vsel %vm708_vm0, %v3681_v0, %v3680_v19  ;;  %v3699_v63 = vld [vmem:[%s7480_s0 + $0x745] ss:$8 sm:$0xf0]  }
 0x212   :  { %3512 = vst.msk [vmem:[%s7481_s1 + $0x1f8] sm:$0xff] %vm1415_vm3, %v2106_v33   ;;  %v3665_v33 = vld [vmem:[%s7480_s0 + $0x1c5] ss:$8 sm:$0xf]  }
 0x213   :  { %3509 = vst.msk [vmem:[%s7481_s1 + $0x1d8] sm:$0xff] %vm1415_vm3, %v2095_v58   ;;  %v2193_v50 = vpop.permute.xlu0 %2192   ;;  %v3689_v58 = vld [vmem:[%s7480_s0 + $0x5c5] ss:$8 sm:$0xf]   ;;  %v2675_v2 = vsel %vm708_vm0, %v3666_v32, %v3665_v33 }
 0x214   :  { %3523 = vst.msk [vmem:[%s7481_s1 + $0x60] sm:$0xff] %vm2118_vm4, %v2149_v11   ;;  %v2763_v12 = vsel %vm708_vm0, %v3690_v57, %v3689_v58 }
 0x215   :  { %3520 = vst.msk [vmem:[%s7481_s1 + $0x40] sm:$0xff] %vm2118_vm4, %v2138_v36   ;;  %2544 = vrot.lane.b32.xlu2 %v2543_v51, %s3709_s7  ;;  %2632 = vrot.lane.b32.xlu1 %v2631_v10, %s3709_s7  ;;  %v3674_v36 = vld [vmem:[%s7480_s0 + $0x345] ss:$8 sm:$0xf]  }
 0x216   :  { %3517 = vst.msk [vmem:[%s7481_s1 + $0x20] sm:$0xff] %vm2118_vm4, %v2127_v37   ;;  %v3698_v37 = vld [vmem:[%s7480_s0 + $0x745] ss:$8 sm:$0xf]   ;;  %v2708_v34 = vsel %vm708_vm0, %v3675_v47, %v3674_v36 }
 0x217   :  { %3532 = vst.msk [vmem:[%s7481_s1 + $0xc0] sm:$0xff] %vm2118_vm4, %v2182_v29   ;;  %2621 = vrot.lane.b32.xlu0 %v2620_v23, %s3709_s7  ;;  %v2215_v31 = vpop.permute.xlu2 %2214   ;;  %v2796_v51 = vsel %vm708_vm0, %v3699_v63, %v3698_v37  ;;  %v2785_v29 = vsel %vm708_vm0, %v3696_v54, %v3695_v44  ;;  %v3684_v10 = vld [vmem:[%s7480_s0 + $0x4c5] ss:$8 sm:$0xf0]  }
 0x218   :  { %3529 = vst.msk [vmem:[%s7481_s1 + $0xa0] sm:$0xff] %vm2118_vm4, %v2171_v20   ;;  %v3683_v20 = vld [vmem:[%s7480_s0 + $0x4c5] ss:$8 sm:$0xf]  }
 0x219   :  { %3526 = vst.msk [vmem:[%s7481_s1 + $0x80] sm:$0xff] %vm2118_vm4, %v2160_v21   ;;  %v2237_v56 = vpop.permute.xlu1 %2236   ;;  %v2741_v21 = vsel %vm708_vm0, %v3684_v10, %v3683_v20 }
 0x21a   :  { %3541 = vst.msk [vmem:[%s7481_s1 + $0x120] sm:$0xff] %vm2118_vm4, %v2215_v31  }
 0x21b   :  { %3538 = vst.msk [vmem:[%s7481_s1 + $0x100] sm:$0xff] %vm2118_vm4, %v2204_v49   ;;  %v2226_v42 = vpop.permute.xlu0 %2225  }
 0x21c   :  { %3535 = vst.msk [vmem:[%s7481_s1 + $0xe0] sm:$0xff] %vm2118_vm4, %v2193_v50  }
 0x21d   :  { %2577 = vrot.lane.b32.xlu2 %v2576_v4, %s3709_s7  ;;  %2665 = vrot.lane.b32.xlu1 %v2664_v60, %s3709_s7  ;;  %3547 = vst.msk [vmem:[%s7481_s1 + $0x160] sm:$0xff] %vm2118_vm4, %v2237_v56   ;;  %v2774_v4 = vsel %vm708_vm0, %v3693_v9, %v3692_v27  ;;  %v3702_v60 = vld [vmem:[%s7480_s0 + $0x7c5] ss:$8 sm:$0xf0]  }
 0x21e   :  { %3544 = vst.msk [vmem:[%s7481_s1 + $0x140] sm:$0xff] %vm2118_vm4, %v2226_v42   ;;  %v2807_v50 = vsel %vm708_vm0, %v3702_v60, %v3701_v1 }
 0x21f   :  { %2654 = vrot.lane.b32.xlu0 %v2653_v13, %s3709_s7  ;;  %v2248_v18 = vpop.permute.xlu2 %2247  }
 0x220   :  { %3550 = vst.msk [vmem:[%s7481_s1 + $0x180] sm:$0xff] %vm2118_vm4, %v2248_v18  }
 0x221   :  { %v2270_v45 = vpop.permute.xlu1 %2269  }
 0x222   :  { %3556 = vst.msk [vmem:[%s7481_s1 + $0x1c0] sm:$0xff] %vm2118_vm4, %v2270_v45  }
 0x223   :  { %v2259_v38 = vpop.permute.xlu0 %2258  }
 0x224   :  { %3553 = vst.msk [vmem:[%s7481_s1 + $0x1a0] sm:$0xff] %vm2118_vm4, %v2259_v38  }
 0x225   :  { %2610 = vrot.lane.b32.xlu2 %v2609_v43, %s3709_s7  ;;  %2698 = vrot.lane.b32.xlu1 %v2697_v6, %s3709_s7 }
 0x227   :  { %2687 = vrot.lane.b32.xlu0 %v2686_v62, %s3709_s7  ;;  %v2281_v14 = vpop.permute.xlu2 %2280  }
 0x228   :  { %3559 = vst.msk [vmem:[%s7481_s1 + $0x1e0] sm:$0xff] %vm2118_vm4, %v2281_v14  }
 0x229   :  { %v2303_v40 = vpop.permute.xlu1 %2302  }
 0x22a   :  { %3565 = vst.msk [vmem:[%s7481_s1 + $0x28] sm:$0xff] %vm2118_vm4, %v2303_v40  }
 0x22b   :  { %v2292_v11 = vpop.permute.xlu0 %2291  }
 0x22c   :  { %3562 = vst.msk [vmem:[%s7481_s1 + $0x8] sm:$0xff] %vm2118_vm4, %v2292_v11  }
 0x22d   :  { %2643 = vrot.lane.b32.xlu2 %v2642_v15, %s3709_s7  ;;  %2731 = vrot.lane.b32.xlu1 %v2730_v28, %s3709_s7 }
 0x22f   :  { %2720 = vrot.lane.b32.xlu0 %v2719_v30, %s3709_s7  ;;  %v2314_v16 = vpop.permute.xlu2 %2313  }
 0x230   :  { %3568 = vst.msk [vmem:[%s7481_s1 + $0x48] sm:$0xff] %vm2118_vm4, %v2314_v16  }
 0x231   :  { %v2336_v61 = vpop.permute.xlu1 %2335  }
 0x232   :  { %3574 = vst.msk [vmem:[%s7481_s1 + $0x88] sm:$0xff] %vm2118_vm4, %v2336_v61  }
 0x233   :  { %v2325_v48 = vpop.permute.xlu0 %2324  }
 0x234   :  { %3571 = vst.msk [vmem:[%s7481_s1 + $0x68] sm:$0xff] %vm2118_vm4, %v2325_v48  }
 0x235   :  { %2676 = vrot.lane.b32.xlu2 %v2675_v2, %s3709_s7  ;;  %2764 = vrot.lane.b32.xlu1 %v2763_v12, %s3709_s7 }
 0x237   :  { %2753 = vrot.lane.b32.xlu0 %v2752_v46, %s3709_s7  ;;  %v2347_v52 = vpop.permute.xlu2 %2346  }
 0x238   :  { %3577 = vst.msk [vmem:[%s7481_s1 + $0xa8] sm:$0xff] %vm2118_vm4, %v2347_v52  }
 0x239   :  { %v2369_v23 = vpop.permute.xlu1 %2368  }
 0x23a   :  { %3583 = vst.msk [vmem:[%s7481_s1 + $0xe8] sm:$0xff] %vm2118_vm4, %v2369_v23  }
 0x23b   :  { %v2358_v41 = vpop.permute.xlu0 %2357  }
 0x23c   :  { %3580 = vst.msk [vmem:[%s7481_s1 + $0xc8] sm:$0xff] %vm2118_vm4, %v2358_v41  }
 0x23d   :  { %2709 = vrot.lane.b32.xlu2 %v2708_v34, %s3709_s7  ;;  %2797 = vrot.lane.b32.xlu1 %v2796_v51, %s3709_s7 }
 0x23f   :  { %2786 = vrot.lane.b32.xlu0 %v2785_v29, %s3709_s7  ;;  %v2380_v55 = vpop.permute.xlu2 %2379  }
 0x240   :  { %3586 = vst.msk [vmem:[%s7481_s1 + $0x108] sm:$0xff] %vm2118_vm4, %v2380_v55  }
 0x241   :  { %v2402_v8 = vpop.permute.xlu1 %2401  }
 0x242   :  { %3592 = vst.msk [vmem:[%s7481_s1 + $0x148] sm:$0xff] %vm2118_vm4, %v2402_v8  }
 0x243   :  { %v2391_v31 = vpop.permute.xlu0 %2390  }
 0x244   :  { %3589 = vst.msk [vmem:[%s7481_s1 + $0x128] sm:$0xff] %vm2118_vm4, %v2391_v31  }
 0x245   :  { %2742 = vrot.lane.b32.xlu2 %v2741_v21, %s3709_s7 }
 0x247   :  { %v2413_v49 = vpop.permute.xlu2 %2412  }
 0x248   :  { %3595 = vst.msk [vmem:[%s7481_s1 + $0x168] sm:$0xff] %vm2118_vm4, %v2413_v49  }
 0x249   :  { %v2435_v17 = vpop.permute.xlu1 %2434  }
 0x24a   :  { %3601 = vst.msk [vmem:[%s7481_s1 + $0x1a8] sm:$0xff] %vm2118_vm4, %v2435_v17  }
 0x24b   :  { %v2424_v7 = vpop.permute.xlu0 %2423  }
 0x24c   :  { %3598 = vst.msk [vmem:[%s7481_s1 + $0x188] sm:$0xff] %vm2118_vm4, %v2424_v7  }
 0x24d   :  { %2775 = vrot.lane.b32.xlu2 %v2774_v4, %s3709_s7 }
 0x251   :  { %v2446_v13 = vpop.permute.xlu2 %2445   ;;  %v2468_v25 = vpop.permute.xlu1 %2467  }
 0x252   :  { %3604 = vst.msk [vmem:[%s7481_s1 + $0x1c8] sm:$0xff] %vm2118_vm4, %v2446_v13  }
 0x253   :  { %3610 = vst.msk [vmem:[%s7481_s1 + $0x10] sm:$0xff] %vm2118_vm4, %v2468_v25   ;;  %v2457_v43 = vpop.permute.xlu0 %2456  }
 0x254   :  { %3607 = vst.msk [vmem:[%s7481_s1 + $0x1e8] sm:$0xff] %vm2118_vm4, %v2457_v43  }
 0x255   :  { %2808 = vrot.lane.b32.xlu2 %v2807_v50, %s3709_s7 }
 0x259   :  { %v2501_v18 = vpop.permute.xlu1 %2500  }
 0x25a   :  { %3619 = vst.msk [vmem:[%s7481_s1 + $0x70] sm:$0xff] %vm2118_vm4, %v2501_v18  }
 0x25f   :  { %v2479_v3 = vpop.permute.xlu2 %2478  }
 0x260   :  { %3613 = vst.msk [vmem:[%s7481_s1 + $0x30] sm:$0xff] %vm2118_vm4, %v2479_v3  }
 0x267   :  { %v2512_v35 = vpop.permute.xlu2 %2511  }
 0x268   :  { %3622 = vst.msk [vmem:[%s7481_s1 + $0x90] sm:$0xff] %vm2118_vm4, %v2512_v35  }
 0x269   :  { %v2490_v39 = vpop.permute.xlu0 %2489  }
 0x26a   :  { %3616 = vst.msk [vmem:[%s7481_s1 + $0x50] sm:$0xff] %vm2118_vm4, %v2490_v39  }
 0x26b   :  { %v2534_v6 = vpop.permute.xlu1 %2533  }
 0x26c   :  { %3628 = vst.msk [vmem:[%s7481_s1 + $0xd0] sm:$0xff] %vm2118_vm4, %v2534_v6  }
 0x26f   :  { %v2545_v56 = vpop.permute.xlu2 %2544  }
 0x270   :  { %3631 = vst.msk [vmem:[%s7481_s1 + $0xf0] sm:$0xff] %vm2118_vm4, %v2545_v56  }
 0x271   :  { %v2523_v42 = vpop.permute.xlu0 %2522  }
 0x272   :  { %3625 = vst.msk [vmem:[%s7481_s1 + $0xb0] sm:$0xff] %vm2118_vm4, %v2523_v42  }
 0x277   :  { %v2578_v62 = vpop.permute.xlu2 %2577   ;;  %v2567_v59 = vpop.permute.xlu1 %2566  }
 0x278   :  { %3640 = vst.msk [vmem:[%s7481_s1 + $0x150] sm:$0xff] %vm2118_vm4, %v2578_v62  }
 0x279   :  { %3637 = vst.msk [vmem:[%s7481_s1 + $0x130] sm:$0xff] %vm2118_vm4, %v2567_v59   ;;  %v2556_v22 = vpop.permute.xlu0 %2555  }
 0x27a   :  { %3634 = vst.msk [vmem:[%s7481_s1 + $0x110] sm:$0xff] %vm2118_vm4, %v2556_v22  }
 0x27f   :  { %v2611_v19 = vpop.permute.xlu2 %2610   ;;  %v2600_v0 = vpop.permute.xlu1 %2599  }
 0x280   :  { %3649 = vst.msk [vmem:[%s7481_s1 + $0x1b0] sm:$0xff] %vm2118_vm4, %v2611_v19  }
 0x281   :  { %3646 = vst.msk [vmem:[%s7481_s1 + $0x190] sm:$0xff] %vm2118_vm4, %v2600_v0   ;;  %v2589_v15 = vpop.permute.xlu0 %2588  }
 0x282   :  { %3643 = vst.msk [vmem:[%s7481_s1 + $0x170] sm:$0xff] %vm2118_vm4, %v2589_v15  }
 0x287   :  { %v2644_v24 = vpop.permute.xlu2 %2643   ;;  %v2633_v14 = vpop.permute.xlu1 %2632  }
 0x288   :  { %3658 = vst.msk [vmem:[%s7481_s1 + $0x18] sm:$0xff] %vm2118_vm4, %v2644_v24  }
 0x289   :  { %3655 = vst.msk [vmem:[%s7481_s1 + $0x1f0] sm:$0xff] %vm2118_vm4, %v2633_v14   ;;  %v2622_v26 = vpop.permute.xlu0 %2621  }
 0x28a   :  { %3652 = vst.msk [vmem:[%s7481_s1 + $0x1d0] sm:$0xff] %vm2118_vm4, %v2622_v26  }
 0x28f   :  { %v2677_v45 = vpop.permute.xlu2 %2676   ;;  %v2666_v28 = vpop.permute.xlu1 %2665  }
 0x290   :  { %3667 = vst.msk [vmem:[%s7481_s1 + $0x78] sm:$0xff] %vm2118_vm4, %v2677_v45  }
 0x291   :  { %3664 = vst.msk [vmem:[%s7481_s1 + $0x58] sm:$0xff] %vm2118_vm4, %v2666_v28   ;;  %v2655_v38 = vpop.permute.xlu0 %2654  }
 0x292   :  { %3661 = vst.msk [vmem:[%s7481_s1 + $0x38] sm:$0xff] %vm2118_vm4, %v2655_v38  }
 0x297   :  { %v2710_v30 = vpop.permute.xlu2 %2709   ;;  %v2699_v33 = vpop.permute.xlu1 %2698  }
 0x298   :  { %3676 = vst.msk [vmem:[%s7481_s1 + $0xd8] sm:$0xff] %vm2118_vm4, %v2710_v30  }
 0x299   :  { %3673 = vst.msk [vmem:[%s7481_s1 + $0xb8] sm:$0xff] %vm2118_vm4, %v2699_v33   ;;  %v2688_v32 = vpop.permute.xlu0 %2687  }
 0x29a   :  { %3670 = vst.msk [vmem:[%s7481_s1 + $0x98] sm:$0xff] %vm2118_vm4, %v2688_v32  }
 0x29f   :  { %v2743_v58 = vpop.permute.xlu2 %2742   ;;  %v2732_v57 = vpop.permute.xlu1 %2731  }
 0x2a0   :  { %3685 = vst.msk [vmem:[%s7481_s1 + $0x138] sm:$0xff] %vm2118_vm4, %v2743_v58  }
 0x2a1   :  { %3682 = vst.msk [vmem:[%s7481_s1 + $0x118] sm:$0xff] %vm2118_vm4, %v2732_v57   ;;  %v2721_v2 = vpop.permute.xlu0 %2720  }
 0x2a2   :  { %3679 = vst.msk [vmem:[%s7481_s1 + $0xf8] sm:$0xff] %vm2118_vm4, %v2721_v2  }
 0x2a7   :  { %v2776_v53 = vpop.permute.xlu2 %2775   ;;  %v2765_v16 = vpop.permute.xlu1 %2764  }
 0x2a8   :  { %3694 = vst.msk [vmem:[%s7481_s1 + $0x198] sm:$0xff] %vm2118_vm4, %v2776_v53  }
 0x2a9   :  { %3691 = vst.msk [vmem:[%s7481_s1 + $0x178] sm:$0xff] %vm2118_vm4, %v2765_v16   ;;  %v2754_v5 = vpop.permute.xlu0 %2753  }
 0x2aa   :  { %3688 = vst.msk [vmem:[%s7481_s1 + $0x158] sm:$0xff] %vm2118_vm4, %v2754_v5  }
 0x2af   :  { %v2809_v40 = vpop.permute.xlu2 %2808   ;;  %v2798_v12 = vpop.permute.xlu1 %2797  }
 0x2b0   :  { %3703 = vst.msk [vmem:[%s7481_s1 + $0x1f8] sm:$0xff] %vm2118_vm4, %v2809_v40  }
 0x2b1   :  { %3700 = vst.msk [vmem:[%s7481_s1 + $0x1d8] sm:$0xff] %vm2118_vm4, %v2798_v12   ;;  %v2787_v11 = vpop.permute.xlu0 %2786  }
 0x2b2   :  { %3697 = vst.msk [vmem:[%s7481_s1 + $0x1b8] sm:$0xff] %vm2118_vm4, %v2787_v11  }

// kernel: residual_block.1
= control target key start
LH: loop header
LB: loop body
LE: loop exit
PB: predicated region body
PF: predicated region fallthrough
CT: control target
= control target key end

     0   :  { %vm41_vm0 = vcmask 130048   ;;  %vm1212_vm6 = vcmask 1040384   ;;  %s5676_s0 = inlined_call_operand.vmem [shape: f32[16,256], index: 0, kind: input, shape index: {}]   ;;  %s5677_s1 = inlined_call_operand.vmem [shape: f32[16,16], index: 1, kind: input, shape index: {}]   ;;  %s5678_s2 = inlined_call_operand.vmem [shape: f32[16,16], index: 2, kind: input, shape index: {}]   ;;  %s5679_s3 = inlined_call_operand.vmem [shape: bf16[768,256], index: 3, kind: input, shape index: {}]   ;;  %s5680_s9 = inlined_call_operand.vmem [shape: f32[256,256], index: 9, kind: input, shape index: {}]   ;;  %s5681_s4 = inlined_call_operand.vmem [shape: f32[1,256], index: 4, kind: input, shape index: {}]   ;;  %s5682_s5 = inlined_call_operand.vmem [shape: f32[1,256], index: 5, kind: input, shape index: {}]   ;;  %s5683_s6 = inlined_call_operand.vmem [shape: bf16[768,256], index: 6, kind: input, shape index: {}]   ;;  %s5684_s7 = inlined_call_operand.vmem [shape: f32[1,256], index: 7, kind: input, shape index: {}]   ;;  %s5685_s8 = inlined_call_operand.vmem [shape: f32[1,256], index: 8, kind: input, shape index: {}]   ;;  %s5686_s10 = inlined_call_operand.vmem [shape: f32[16,256], index: 10, kind: output, shape index: {}]  }
   0x1   :  { %v3483_v0 = vld [vmem:[%s5676_s0 + $0x10] sm:$0xff]  ;;  %v3488_v1 = vld [vmem:[%s5676_s0 + $0x18] sm:$0xff]  ;;  %v3493_v2 = vld [vmem:[%s5676_s0] sm:$0xff] }
   0x2   :  { %62 = vmatpush.msra.mxu0 %v3483_v0  ;;  %85 = vmatpush.msra.mxu1 %v3488_v1  ;;  %v3500_v3 = vld [vmem:[%s5676_s0 + $0x8] sm:$0xff]  ;;  %v39_v4 = vld [vmem:[%s5677_s1] sm:$0xff]  ;;  %v2563_v6 = vld [vmem:[%s5679_s3 + $0x170] sm:$0xf] }
   0x3   :  { %116 = vmatpush.msra.mxu2 %v3483_v0  ;;  %139 = vmatpush.msra.mxu3 %v3488_v1  ;;  %v94_v5 = vld [vmem:[%s5678_s2] sm:$0xff]  ;;  %v3200_v7 = vld [vmem:[%s5679_s3 + $0x174] sm:$0xf0]  ;;  %v2627_v8 = vld [vmem:[%s5679_s3 + $0x1f0] sm:$0xf] }
   0x4   :  { %63 = vmatpush.msra.mxu0 %v3493_v2  ;;  %86 = vmatpush.msra.mxu1 %v3500_v3  ;;  %v3216_v9 = vld [vmem:[%s5679_s3 + $0x1f4] sm:$0xf0]  ;;  %v2564_v10 = vor.u32 %v3200_v7, %v2563_v6  ;;  %v2555_v12 = vld [vmem:[%s5679_s3 + $0x160] sm:$0xf]  ;;  %v3198_v13 = vld [vmem:[%s5679_s3 + $0x164] sm:$0xf0] }
   0x5   :  { %2369 = vmatmul.msk.f32.vlgmr.msra.gmra.mxu0 %vm41_vm0, %v39_v4  ;;  %2371 = vmatmul.msk.f32.vlgmr.msra.gmra.mxu1 %vm41_vm0, %v39_v4  ;;  %v2628_v11 = vor.u32 %v3216_v9, %v2627_v8  ;;  %v2619_v14 = vld [vmem:[%s5679_s3 + $0x1e0] sm:$0xf]  ;;  %v3214_v15 = vld [vmem:[%s5679_s3 + $0x1e4] sm:$0xf0]  ;;  %v2547_v16 = vld [vmem:[%s5679_s3 + $0x150] sm:$0xf]  ;;  %v2556_v17 = vor.u32 %v3198_v13, %v2555_v12 }
   0x6   :  { %117 = vmatpush.msra.mxu2 %v3493_v2  ;;  %140 = vmatpush.msra.mxu3 %v3500_v3  ;;  %v2620_v18 = vor.u32 %v3214_v15, %v2619_v14  ;;  %v3196_v19 = vld [vmem:[%s5679_s3 + $0x154] sm:$0xf0]  ;;  %v2611_v20 = vld [vmem:[%s5679_s3 + $0x1d0] sm:$0xf]  ;;  %v40_v25 = vld [vmem:[%s5677_s1 + $0x8] sm:$0xff] }
   0x7   :  { %2373 = vmatmul.msk.f32.vlgmr.msra.gmra.mxu2 %vm41_vm0, %v94_v5  ;;  %2375 = vmatmul.msk.f32.vlgmr.msra.gmra.mxu3 %vm41_vm0, %v94_v5  ;;  %v3212_v21 = vld [vmem:[%s5679_s3 + $0x1d4] sm:$0xf0]  ;;  %v2435_v22 = vld [vmem:[%s5679_s3 + $0x70] sm:$0xf]  ;;  %v95_v28 = vld [vmem:[%s5678_s2 + $0x8] sm:$0xff]  ;;  %v2548_v32 = vor.u32 %v3196_v19, %v2547_v16 }
   0x8   :  { %758 = vmatpush.bf16.msrb.mxu2 %v2564_v10  ;;  %772 = vmatpush.bf16.msrb.mxu3 %v2628_v11  ;;  %v3168_v23 = vld [vmem:[%s5679_s3 + $0x74] sm:$0xf0]  ;;  %v2499_v24 = vld [vmem:[%s5679_s3 + $0xf0] sm:$0xf]  ;;  %v2539_v29 = vld [vmem:[%s5679_s3 + $0x140] sm:$0xf]  ;;  %v2612_v33 = vor.u32 %v3212_v21, %v2611_v20 }
   0x9   :  { %v2436_v26 = vor.u32 %v3168_v23, %v2435_v22  ;;  %v3184_v27 = vld [vmem:[%s5679_s3 + $0xf4] sm:$0xf0]  ;;  %v2427_v31 = vld [vmem:[%s5679_s3 + $0x60] sm:$0xf]  ;;  %v3166_v34 = vld [vmem:[%s5679_s3 + $0x64] sm:$0xf0] }
   0xa   :  { %v2500_v30 = vor.u32 %v3184_v27, %v2499_v24  ;;  %v2491_v35 = vld [vmem:[%s5679_s3 + $0xe0] sm:$0xf]  ;;  %v3182_v36 = vld [vmem:[%s5679_s3 + $0xe4] sm:$0xf0]  ;;  %v2428_v40 = vor.u32 %v3166_v34, %v2427_v31  ;;  %v2419_v42 = vld [vmem:[%s5679_s3 + $0x50] sm:$0xf] }
   0xb   :  { %v3194_v37 = vld [vmem:[%s5679_s3 + $0x144] sm:$0xf0]  ;;  %v2603_v38 = vld [vmem:[%s5679_s3 + $0x1c0] sm:$0xf]  ;;  %730 = vmatpush.bf16.msrb.mxu0 %v2436_v26  ;;  %v2492_v41 = vor.u32 %v3182_v36, %v2491_v35  ;;  %v3164_v43 = vld [vmem:[%s5679_s3 + $0x54] sm:$0xf0] }
   0xc   :  { %759 = vmatpush.bf16.msrb.mxu2 %v2556_v17  ;;  %773 = vmatpush.bf16.msrb.mxu3 %v2620_v18  ;;  %v3210_v39 = vld [vmem:[%s5679_s3 + $0x1c4] sm:$0xf0]  ;;  %v2483_v44 = vld [vmem:[%s5679_s3 + $0xd0] sm:$0xf]  ;;  %v3180_v45 = vld [vmem:[%s5679_s3 + $0xd4] sm:$0xf0]  ;;  %v2540_v46 = vor.u32 %v3194_v37, %v2539_v29  ;;  %v2420_v52 = vor.u32 %v3164_v43, %v2419_v42 }
   0xd   :  { %2370 = vmatmul.msk.f32.gmra.mxu0 %vm41_vm0, %v40_v25  ;;  %2372 = vmatmul.msk.f32.gmra.mxu1 %vm41_vm0, %v40_v25  ;;  %v2604_v47 = vor.u32 %v3210_v39, %v2603_v38  ;;  %v2531_v48 = vld [vmem:[%s5679_s3 + $0x130] sm:$0xf]  ;;  %v3192_v49 = vld [vmem:[%s5679_s3 + $0x134] sm:$0xf0]  ;;  %v2484_v53 = vor.u32 %v3180_v45, %v2483_v44  ;;  %v2411_v54 = vld [vmem:[%s5679_s3 + $0x40] sm:$0xf] }
   0xe   :  { %744 = vmatpush.bf16.msrb.mxu1 %v2500_v30  ;;  %v2595_v50 = vld [vmem:[%s5679_s3 + $0x1b0] sm:$0xf]  ;;  %v3208_v51 = vld [vmem:[%s5679_s3 + $0x1b4] sm:$0xf0]  ;;  %v3162_v55 = vld [vmem:[%s5679_s3 + $0x44] sm:$0xf0]  ;;  %v2532_v58 = vor.u32 %v3192_v49, %v2531_v48 }
   0xf   :  { %2374 = vmatmul.msk.f32.gmra.mxu2 %vm41_vm0, %v95_v28  ;;  %2376 = vmatmul.msk.f32.gmra.mxu3 %vm41_vm0, %v95_v28  ;;  %v2475_v56 = vld [vmem:[%s5679_s3 + $0xc0] sm:$0xf]  ;;  %v3178_v57 = vld [vmem:[%s5679_s3 + $0xc4] sm:$0xf0]  ;;  %v2596_v59 = vor.u32 %v3208_v51, %v2595_v50  ;;  %v2412_v4 = vor.u32 %v3162_v55, %v2411_v54  ;;  %v2403_v6 = vld [vmem:[%s5679_s3 + $0x30] sm:$0xf]  ;;  %v3753_v54 = vpack.c.bf16 %v3488_v1, %v3500_v3 }
  0x10   :  { %760 = vmatpush.bf16.msrb.mxu2 %v2548_v32  ;;  %774 = vmatpush.bf16.msrb.mxu3 %v2612_v33  ;;  %v2523_v60 = vld [vmem:[%s5679_s3 + $0x120] sm:$0xf]  ;;  %v3190_v61 = vld [vmem:[%s5679_s3 + $0x124] sm:$0xf0]  ;;  %v2476_v5 = vor.u32 %v3178_v57, %v2475_v56  ;;  %v3160_v7 = vld [vmem:[%s5679_s3 + $0x34] sm:$0xf0] }
  0x11   :  { %731 = vmatpush.bf16.msrb.mxu0 %v2428_v40  ;;  %v2587_v62 = vld [vmem:[%s5679_s3 + $0x1a0] sm:$0xf]  ;;  %v3206_v63 = vld [vmem:[%s5679_s3 + $0x1a4] sm:$0xf0]  ;;  %v2467_v8 = vld [vmem:[%s5679_s3 + $0xb0] sm:$0xf]  ;;  %v2524_v10 = vor.u32 %v3190_v61, %v2523_v60  ;;  %v2404_v16 = vor.u32 %v3160_v7, %v2403_v6 }
  0x12   :  { %745 = vmatpush.bf16.msrb.mxu1 %v2492_v41  ;;  %v3176_v9 = vld [vmem:[%s5679_s3 + $0xb4] sm:$0xf0]  ;;  %v2588_v11 = vor.u32 %v3206_v63, %v2587_v62  ;;  %v2515_v12 = vld [vmem:[%s5679_s3 + $0x110] sm:$0xf]  ;;  %v2395_v18 = vld [vmem:[%s5679_s3 + $0x20] sm:$0xf] }
  0x13   :  { %v3188_v13 = vld [vmem:[%s5679_s3 + $0x114] sm:$0xf0]  ;;  %v2579_v14 = vld [vmem:[%s5679_s3 + $0x190] sm:$0xf]  ;;  %v2468_v17 = vor.u32 %v3176_v9, %v2467_v8  ;;  %v3158_v19 = vld [vmem:[%s5679_s3 + $0x24] sm:$0xf0] }
  0x14   :  { %761 = vmatpush.bf16.msrb.mxu2 %v2540_v46  ;;  %775 = vmatpush.bf16.msrb.mxu3 %v2604_v47  ;;  %v3204_v15 = vld [vmem:[%s5679_s3 + $0x194] sm:$0xf0]  ;;  %v2459_v20 = vld [vmem:[%s5679_s3 + $0xa0] sm:$0xf]  ;;  %v3174_v21 = vld [vmem:[%s5679_s3 + $0xa4] sm:$0xf0]  ;;  %v2516_v22 = vor.u32 %v3188_v13, %v2515_v12  ;;  %v2396_v32 = vor.u32 %v3158_v19, %v2395_v18 }
  0x15   :  { %732 = vmatpush.bf16.msrb.mxu0 %v2420_v52  ;;  %v2580_v23 = vor.u32 %v3204_v15, %v2579_v14  ;;  %v2507_v24 = vld [vmem:[%s5679_s3 + $0x100] sm:$0xf]  ;;  %v3186_v25 = vld [vmem:[%s5679_s3 + $0x104] sm:$0xf0]  ;;  %v3167_v28 = vld [vmem:[%s5679_s3 + $0x74] sm:$0xf]  ;;  %v2460_v33 = vor.u32 %v3174_v21, %v2459_v20 }
  0x16   :  { %746 = vmatpush.bf16.msrb.mxu1 %v2484_v53  ;;  %v2571_v26 = vld [vmem:[%s5679_s3 + $0x180] sm:$0xf]  ;;  %v3202_v27 = vld [vmem:[%s5679_s3 + $0x184] sm:$0xf0]  ;;  %v2437_v29 = vld [vmem:[%s5679_s3 + $0x78] sm:$0xf0]  ;;  %v2508_v38 = vor.u32 %v3186_v25, %v2507_v24  ;;  %v3749_v53 = vpack.c.bf16 %v3483_v0, %v3493_v2 }
  0x17   :  { %v3183_v30 = vld [vmem:[%s5679_s3 + $0xf4] sm:$0xf]  ;;  %v2501_v31 = vld [vmem:[%s5679_s3 + $0xf8] sm:$0xf0]  ;;  %v2387_v34 = vld [vmem:[%s5679_s3 + $0x10] sm:$0xf]  ;;  %v2572_v39 = vor.u32 %v3202_v27, %v2571_v26  ;;  %v2440_v40 = vor.u32 %v3167_v28, %v2437_v29 }
  0x18   :  { %762 = vmatpush.bf16.msrb.mxu2 %v2532_v58  ;;  %776 = vmatpush.bf16.msrb.mxu3 %v2596_v59  ;;  %v3156_v35 = vld [vmem:[%s5679_s3 + $0x14] sm:$0xf0]  ;;  %v2451_v36 = vld [vmem:[%s5679_s3 + $0x90] sm:$0xf]  ;;  %v2504_v41 = vor.u32 %v3183_v30, %v2501_v31  ;;  %v3165_v42 = vld [vmem:[%s5679_s3 + $0x64] sm:$0xf] }
  0x19   :  { %733 = vmatpush.bf16.msrb.mxu0 %v2412_v4  ;;  %v3172_v37 = vld [vmem:[%s5679_s3 + $0x94] sm:$0xf0]  ;;  %v2429_v43 = vld [vmem:[%s5679_s3 + $0x68] sm:$0xf0]  ;;  %v3181_v44 = vld [vmem:[%s5679_s3 + $0xe4] sm:$0xf]  ;;  %v2388_v46 = vor.u32 %v3156_v35, %v2387_v34 }
  0x1a   :  { %747 = vmatpush.bf16.msrb.mxu1 %v2476_v5  ;;  %v2493_v45 = vld [vmem:[%s5679_s3 + $0xe8] sm:$0xf0]  ;;  %v2452_v47 = vor.u32 %v3172_v37, %v2451_v36  ;;  %v2379_v48 = vld [vmem:[%s5679_s3] sm:$0xf]  ;;  %v3154_v49 = vld [vmem:[%s5679_s3 + $0x4] sm:$0xf0]  ;;  %v2432_v0 = vor.u32 %v3165_v42, %v2429_v43 }
  0x1b   :  { %v2443_v50 = vld [vmem:[%s5679_s3 + $0x80] sm:$0xf]  ;;  %v3170_v51 = vld [vmem:[%s5679_s3 + $0x84] sm:$0xf0]  ;;  %v2691_v52 = vld [vmem:[%s5679_s3 + $0x270] sm:$0xf]  ;;  %v2496_v2 = vor.u32 %v3181_v44, %v2493_v45  ;;  %v2380_v60 = vor.u32 %v3154_v49, %v2379_v48 }
  0x1c   :  { %763 = vmatpush.bf16.msrb.mxu2 %v2524_v10  ;;  %777 = vmatpush.bf16.msrb.mxu3 %v2588_v11  ;;  %v3232_v55 = vld [vmem:[%s5679_s3 + $0x274] sm:$0xf0]  ;;  %v2755_v56 = vld [vmem:[%s5679_s3 + $0x2f0] sm:$0xf]  ;;  %v3163_v1 = vld [vmem:[%s5679_s3 + $0x54] sm:$0xf]  ;;  %v2444_v61 = vor.u32 %v3170_v51, %v2443_v50 }
  0x1d   :  { %734 = vmatpush.bf16.msrb.mxu0 %v2404_v16  ;;  %v3248_v57 = vld [vmem:[%s5679_s3 + $0x2f4] sm:$0xf0]  ;;  %v2421_v3 = vld [vmem:[%s5679_s3 + $0x58] sm:$0xf0]  ;;  %v3179_v58 = vld [vmem:[%s5679_s3 + $0xd4] sm:$0xf]  ;;  %v2692_v62 = vor.u32 %v3232_v55, %v2691_v52 }
  0x1e   :  { %748 = vmatpush.bf16.msrb.mxu1 %v2468_v17  ;;  %v2485_v59 = vld [vmem:[%s5679_s3 + $0xd8] sm:$0xf0]  ;;  %v2756_v63 = vor.u32 %v3248_v57, %v2755_v56  ;;  %v2683_v4 = vld [vmem:[%s5679_s3 + $0x260] sm:$0xf]  ;;  %v3230_v5 = vld [vmem:[%s5679_s3 + $0x264] sm:$0xf0]  ;;  %v2424_v8 = vor.u32 %v3163_v1, %v2421_v3 }
  0x1f   :  { %v2747_v6 = vld [vmem:[%s5679_s3 + $0x2e0] sm:$0xf]  ;;  %v3246_v7 = vld [vmem:[%s5679_s3 + $0x2e4] sm:$0xf0]  ;;  %v2488_v9 = vor.u32 %v3179_v58, %v2485_v59  ;;  %v3161_v10 = vld [vmem:[%s5679_s3 + $0x44] sm:$0xf]  ;;  %v2684_v14 = vor.u32 %v3230_v5, %v2683_v4 }
  0x20   :  { %764 = vmatpush.bf16.msrb.mxu2 %v2516_v22  ;;  %778 = vmatpush.bf16.msrb.mxu3 %v2580_v23  ;;  %v2413_v11 = vld [vmem:[%s5679_s3 + $0x48] sm:$0xf0]  ;;  %v3177_v12 = vld [vmem:[%s5679_s3 + $0xc4] sm:$0xf]  ;;  %v2748_v15 = vor.u32 %v3246_v7, %v2747_v6  ;;  %v2675_v16 = vld [vmem:[%s5679_s3 + $0x250] sm:$0xf] }
  0x21   :  { %735 = vmatpush.bf16.msrb.mxu0 %v2396_v32  ;;  %v2477_v13 = vld [vmem:[%s5679_s3 + $0xc8] sm:$0xf0]  ;;  %v3228_v17 = vld [vmem:[%s5679_s3 + $0x254] sm:$0xf0]  ;;  %v2739_v18 = vld [vmem:[%s5679_s3 + $0x2d0] sm:$0xf]  ;;  %v2416_v20 = vor.u32 %v3161_v10, %v2413_v11 }
  0x22   :  { %749 = vmatpush.bf16.msrb.mxu1 %v2460_v33  ;;  %v3244_v19 = vld [vmem:[%s5679_s3 + $0x2d4] sm:$0xf0]  ;;  %v2480_v21 = vor.u32 %v3177_v12, %v2477_v13  ;;  %v3159_v22 = vld [vmem:[%s5679_s3 + $0x34] sm:$0xf]  ;;  %v2405_v23 = vld [vmem:[%s5679_s3 + $0x38] sm:$0xf0]  ;;  %v2676_v26 = vor.u32 %v3228_v17, %v2675_v16 }
  0x23   :  { %v3175_v24 = vld [vmem:[%s5679_s3 + $0xb4] sm:$0xf]  ;;  %v2469_v25 = vld [vmem:[%s5679_s3 + $0xb8] sm:$0xf0]  ;;  %v2740_v27 = vor.u32 %v3244_v19, %v2739_v18  ;;  %v2667_v28 = vld [vmem:[%s5679_s3 + $0x240] sm:$0xf]  ;;  %v2408_v32 = vor.u32 %v3159_v22, %v2405_v23 }
  0x24   :  { %765 = vmatpush.bf16.msrb.mxu2 %v2508_v38  ;;  %779 = vmatpush.bf16.msrb.mxu3 %v2572_v39  ;;  %v3226_v29 = vld [vmem:[%s5679_s3 + $0x244] sm:$0xf0]  ;;  %v2731_v30 = vld [vmem:[%s5679_s3 + $0x2c0] sm:$0xf]  ;;  %v2472_v33 = vor.u32 %v3175_v24, %v2469_v25  ;;  %v3157_v34 = vld [vmem:[%s5679_s3 + $0x24] sm:$0xf] }
  0x25   :  { %736 = vmatpush.bf16.msrb.mxu0 %v2388_v46  ;;  %v3242_v31 = vld [vmem:[%s5679_s3 + $0x2c4] sm:$0xf0]  ;;  %v2397_v35 = vld [vmem:[%s5679_s3 + $0x28] sm:$0xf0]  ;;  %v3173_v36 = vld [vmem:[%s5679_s3 + $0xa4] sm:$0xf]  ;;  %v2668_v38 = vor.u32 %v3226_v29, %v2667_v28 }
  0x26   :  { %750 = vmatpush.bf16.msrb.mxu1 %v2452_v47  ;;  %v2461_v37 = vld [vmem:[%s5679_s3 + $0xa8] sm:$0xf0]  ;;  %v2732_v39 = vor.u32 %v3242_v31, %v2731_v30  ;;  %v2723_v42 = vld [vmem:[%s5679_s3 + $0x2b0] sm:$0xf]  ;;  %v3240_v43 = vld [vmem:[%s5679_s3 + $0x2b4] sm:$0xf0]  ;;  %v2400_v44 = vor.u32 %v3157_v34, %v2397_v35 }
  0x27   :  { %766 = vmatmul.bf16.vlgmr.msrb.gmra.mxu2 %v3749_v53  ;;  %780 = vmatmul.bf16.vlgmr.msrb.gmra.mxu3 %v3753_v54  ;;  %v2464_v45 = vor.u32 %v3173_v36, %v2461_v37  ;;  %v3155_v46 = vld [vmem:[%s5679_s3 + $0x14] sm:$0xf]  ;;  %v2389_v47 = vld [vmem:[%s5679_s3 + $0x18] sm:$0xf0]  ;;  %v2724_v51 = vor.u32 %v3240_v43, %v2723_v42  ;;  %v3153_v56 = vld [vmem:[%s5679_s3 + $0x4] sm:$0xf] }
  0x28   :  { %814 = vmatpush.bf16.msra.mxu2 %v2440_v40  ;;  %828 = vmatpush.bf16.msra.mxu3 %v2504_v41  ;;  %v2659_v40 = vld [vmem:[%s5679_s3 + $0x230] sm:$0xf]  ;;  %v3224_v41 = vld [vmem:[%s5679_s3 + $0x234] sm:$0xf0]  ;;  %v3171_v48 = vld [vmem:[%s5679_s3 + $0x94] sm:$0xf]  ;;  %v2392_v52 = vor.u32 %v3155_v46, %v2389_v47 }
  0x29   :  { %737 = vmatpush.bf16.msrb.mxu0 %v2380_v60  ;;  %v2453_v49 = vld [vmem:[%s5679_s3 + $0x98] sm:$0xf0]  ;;  %v2660_v50 = vor.u32 %v3224_v41, %v2659_v40  ;;  %v2381_v57 = vld [vmem:[%s5679_s3 + $0x8] sm:$0xf0]  ;;  %v3231_v1 = vld [vmem:[%s5679_s3 + $0x274] sm:$0xf] }
  0x2a   :  { %751 = vmatpush.bf16.msrb.mxu1 %v2444_v61  ;;  %v2456_v55 = vor.u32 %v3171_v48, %v2453_v49  ;;  %v2693_v3 = vld [vmem:[%s5679_s3 + $0x278] sm:$0xf0]  ;;  %v3247_v58 = vld [vmem:[%s5679_s3 + $0x2f4] sm:$0xf]  ;;  %v2384_v60 = vor.u32 %v3153_v56, %v2381_v57  ;;  %v3229_v4 = vld [vmem:[%s5679_s3 + $0x264] sm:$0xf] }
  0x2b   :  { %v2757_v59 = vld [vmem:[%s5679_s3 + $0x2f8] sm:$0xf0]  ;;  %v2685_v5 = vld [vmem:[%s5679_s3 + $0x268] sm:$0xf0]  ;;  %v3245_v6 = vld [vmem:[%s5679_s3 + $0x2e4] sm:$0xf] }
  0x2c   :  { %815 = vmatpush.bf16.msra.mxu2 %v2432_v0  ;;  %829 = vmatpush.bf16.msra.mxu3 %v2496_v2  ;;  %v3169_v0 = vld [vmem:[%s5679_s3 + $0x84] sm:$0xf]  ;;  %v2445_v2 = vld [vmem:[%s5679_s3 + $0x88] sm:$0xf0]  ;;  %v2688_v7 = vor.u32 %v3229_v4, %v2685_v5  ;;  %v2651_v10 = vld [vmem:[%s5679_s3 + $0x220] sm:$0xf] }
  0x2d   :  { %786 = vmatpush.bf16.msra.mxu0 %v2692_v62  ;;  %v2448_v61 = vor.u32 %v3169_v0, %v2445_v2  ;;  %v2696_v62 = vor.u32 %v3231_v1, %v2693_v3  ;;  %v3222_v11 = vld [vmem:[%s5679_s3 + $0x224] sm:$0xf0]  ;;  %v2715_v12 = vld [vmem:[%s5679_s3 + $0x2a0] sm:$0xf]  ;;  %v2677_v16 = vld [vmem:[%s5679_s3 + $0x258] sm:$0xf0] }
  0x2e   :  { %800 = vmatpush.bf16.msra.mxu1 %v2756_v63  ;;  %v2760_v63 = vor.u32 %v3247_v58, %v2757_v59  ;;  %v2652_v13 = vor.u32 %v3222_v11, %v2651_v10  ;;  %v3243_v19 = vld [vmem:[%s5679_s3 + $0x2d4] sm:$0xf]  ;;  %v3220_v23 = vld [vmem:[%s5679_s3 + $0x214] sm:$0xf0]  ;;  %v2707_v24 = vld [vmem:[%s5679_s3 + $0x290] sm:$0xf] }
  0x2f   :  { %v3236_v25 = vld [vmem:[%s5679_s3 + $0x294] sm:$0xf0]  ;;  %v3225_v28 = vld [vmem:[%s5679_s3 + $0x244] sm:$0xf]  ;;  %v2669_v29 = vld [vmem:[%s5679_s3 + $0x248] sm:$0xf0] }
  0x30   :  { %816 = vmatpush.bf16.msra.mxu2 %v2424_v8  ;;  %830 = vmatpush.bf16.msra.mxu3 %v2488_v9  ;;  %v2749_v8 = vld [vmem:[%s5679_s3 + $0x2e8] sm:$0xf0]  ;;  %v3241_v30 = vld [vmem:[%s5679_s3 + $0x2c4] sm:$0xf]  ;;  %v2672_v31 = vor.u32 %v3225_v28, %v2669_v29  ;;  %v2635_v34 = vld [vmem:[%s5679_s3 + $0x200] sm:$0xf] }
  0x31   :  { %787 = vmatpush.bf16.msra.mxu0 %v2684_v14  ;;  %v2752_v9 = vor.u32 %v3245_v6, %v2749_v8  ;;  %v3238_v14 = vld [vmem:[%s5679_s3 + $0x2a4] sm:$0xf0]  ;;  %v2699_v36 = vld [vmem:[%s5679_s3 + $0x280] sm:$0xf]  ;;  %v3223_v40 = vld [vmem:[%s5679_s3 + $0x234] sm:$0xf] }
  0x32   :  { %801 = vmatpush.bf16.msra.mxu1 %v2748_v15  ;;  %v3227_v15 = vld [vmem:[%s5679_s3 + $0x254] sm:$0xf]  ;;  %v2716_v17 = vor.u32 %v3238_v14, %v2715_v12  ;;  %v3218_v35 = vld [vmem:[%s5679_s3 + $0x204] sm:$0xf0]  ;;  %v2661_v41 = vld [vmem:[%s5679_s3 + $0x238] sm:$0xf0] }
  0x33   :  { %v2680_v18 = vor.u32 %v3227_v15, %v2677_v16  ;;  %v2636_v37 = vor.u32 %v3218_v35, %v2635_v34  ;;  %v3239_v42 = vld [vmem:[%s5679_s3 + $0x2b4] sm:$0xf]  ;;  %v2725_v43 = vld [vmem:[%s5679_s3 + $0x2b8] sm:$0xf0]  ;;  %v3221_v46 = vld [vmem:[%s5679_s3 + $0x224] sm:$0xf] }
  0x34   :  { %817 = vmatpush.bf16.msra.mxu2 %v2416_v20  ;;  %831 = vmatpush.bf16.msra.mxu3 %v2480_v21  ;;  %v2741_v20 = vld [vmem:[%s5679_s3 + $0x2d8] sm:$0xf0]  ;;  %v2643_v21 = vld [vmem:[%s5679_s3 + $0x210] sm:$0xf]  ;;  %v2653_v47 = vld [vmem:[%s5679_s3 + $0x228] sm:$0xf0] }
  0x35   :  { %788 = vmatpush.bf16.msra.mxu0 %v2676_v26  ;;  %v2744_v22 = vor.u32 %v3243_v19, %v2741_v20  ;;  %v2644_v26 = vor.u32 %v3220_v23, %v2643_v21  ;;  %v2656_v48 = vor.u32 %v3221_v46, %v2653_v47  ;;  %v3237_v49 = vld [vmem:[%s5679_s3 + $0x2a4] sm:$0xf]  ;;  %v3235_v57 = vld [vmem:[%s5679_s3 + $0x294] sm:$0xf]  ;;  %v2709_v0 = vld [vmem:[%s5679_s3 + $0x298] sm:$0xf0] }
  0x36   :  { %802 = vmatpush.bf16.msra.mxu1 %v2740_v27  ;;  %v2708_v27 = vor.u32 %v3236_v25, %v2707_v24  ;;  %v2712_v2 = vor.u32 %v3235_v57, %v2709_v0  ;;  %v3217_v1 = vld [vmem:[%s5679_s3 + $0x204] sm:$0xf]  ;;  %v2637_v3 = vld [vmem:[%s5679_s3 + $0x208] sm:$0xf0]  ;;  %v3199_v4 = vld [vmem:[%s5679_s3 + $0x174] sm:$0xf] }
  0x37   :  { %v3233_v58 = vld [vmem:[%s5679_s3 + $0x284] sm:$0xf]  ;;  %v2701_v59 = vld [vmem:[%s5679_s3 + $0x288] sm:$0xf0]  ;;  %v2565_v5 = vld [vmem:[%s5679_s3 + $0x178] sm:$0xf0] }
  0x38   :  { %818 = vmatpush.bf16.msra.mxu2 %v2408_v32  ;;  %832 = vmatpush.bf16.msra.mxu3 %v2472_v33  ;;  %v2733_v32 = vld [vmem:[%s5679_s3 + $0x2c8] sm:$0xf0]  ;;  %v3215_v6 = vld [vmem:[%s5679_s3 + $0x1f4] sm:$0xf]  ;;  %v2568_v12 = vor.u32 %v3199_v4, %v2565_v5  ;;  %v3197_v14 = vld [vmem:[%s5679_s3 + $0x164] sm:$0xf] }
  0x39   :  { %789 = vmatpush.bf16.msra.mxu0 %v2668_v38  ;;  %v2736_v33 = vor.u32 %v3241_v30, %v2733_v32  ;;  %v3234_v38 = vld [vmem:[%s5679_s3 + $0x284] sm:$0xf0]  ;;  %v2557_v15 = vld [vmem:[%s5679_s3 + $0x168] sm:$0xf0]  ;;  %v3213_v16 = vld [vmem:[%s5679_s3 + $0x1e4] sm:$0xf] }
  0x3a   :  { %803 = vmatpush.bf16.msra.mxu1 %v2732_v39  ;;  %v2700_v39 = vor.u32 %v3234_v38, %v2699_v36  ;;  %v4045_v20 = vld [vmem:[%s5680_s9 + $0xf8] sm:$0xff]  ;;  %v2560_v21 = vor.u32 %v3197_v14, %v2557_v15  ;;  %v3195_v23 = vld [vmem:[%s5679_s3 + $0x154] sm:$0xf]  ;;  %v4053_v24 = vld [vmem:[%s5680_s9 + $0xe8] sm:$0xff] }
  0x3b   :  { %v2549_v25 = vld [vmem:[%s5679_s3 + $0x158] sm:$0xf0]  ;;  %v4077_v32 = vld [vmem:[%s5680_s9 + $0xc8] sm:$0xff]  ;;  %v3209_v34 = vld [vmem:[%s5679_s3 + $0x1c4] sm:$0xf] }
  0x3c   :  { %819 = vmatpush.bf16.msra.mxu2 %v2400_v44  ;;  %833 = vmatpush.bf16.msra.mxu3 %v2464_v45  ;;  %v2664_v44 = vor.u32 %v3223_v40, %v2661_v41  ;;  %v2728_v45 = vor.u32 %v3239_v42, %v2725_v43  ;;  %v4068_v28 = vld [vmem:[%s5680_s9 + $0xd8] sm:$0xff]  ;;  %v2552_v29 = vor.u32 %v3195_v23, %v2549_v25  ;;  %v2605_v35 = vld [vmem:[%s5679_s3 + $0x1c8] sm:$0xf0]  ;;  %v3207_v43 = vld [vmem:[%s5679_s3 + $0x1b4] sm:$0xf] }
  0x3d   :  { %790 = vmatpush.bf16.msra.mxu0 %v2660_v50  ;;  %v2717_v50 = vld [vmem:[%s5679_s3 + $0x2a8] sm:$0xf0]  ;;  %v4092_v36 = vld [vmem:[%s5680_s9 + $0xb8] sm:$0xff]  ;;  %v2608_v38 = vor.u32 %v3209_v34, %v2605_v35  ;;  %v3187_v57 = vld [vmem:[%s5679_s3 + $0x114] sm:$0xf] }
  0x3e   :  { %804 = vmatpush.bf16.msra.mxu1 %v2724_v51  ;;  %v2720_v51 = vor.u32 %v3237_v49, %v2717_v50  ;;  %v2533_v40 = vld [vmem:[%s5679_s3 + $0x138] sm:$0xf0]  ;;  %v3189_v49 = vld [vmem:[%s5679_s3 + $0x124] sm:$0xf]  ;;  %v2525_v50 = vld [vmem:[%s5679_s3 + $0x128] sm:$0xf0] }
  0x3f   :  { %v2517_v0 = vld [vmem:[%s5679_s3 + $0x118] sm:$0xf0]  ;;  %v4147_v5 = vld [vmem:[%s5680_s9 + $0xf0] sm:$0xff]  ;;  %v4261_v23 = vld [vmem:[%s5680_s9 + $0x40] sm:$0xff] }
  0x40   :  { %820 = vmatpush.bf16.msra.mxu2 %v2392_v52  ;;  %834 = vmatpush.bf16.msra.mxu3 %v2456_v55  ;;  %v3219_v52 = vld [vmem:[%s5679_s3 + $0x214] sm:$0xf]  ;;  %v2645_v55 = vld [vmem:[%s5679_s3 + $0x218] sm:$0xf0]  ;;  %v4266_v25 = vld [vmem:[%s5680_s9 + $0x1e0] sm:$0xff] }
  0x41   :  { %791 = vmatpush.bf16.msra.mxu0 %v2652_v13  ;;  %v2648_v56 = vor.u32 %v3219_v52, %v2645_v55  ;;  %v2589_v52 = vld [vmem:[%s5679_s3 + $0x1a8] sm:$0xf0]  ;;  %v2528_v55 = vor.u32 %v3189_v49, %v2525_v50  ;;  %v4215_v14 = vld [vmem:[%s5680_s9 + $0x70] sm:$0xff]  ;;  %v4220_v15 = vld [vmem:[%s5680_s9 + $0x78] sm:$0xff] }
  0x42   :  { %805 = vmatpush.bf16.msra.mxu1 %v2716_v17  ;;  %v2621_v17 = vld [vmem:[%s5679_s3 + $0x1e8] sm:$0xf0]  ;;  %v4311_v34 = vld [vmem:[%s5680_s9 + $0x20] sm:$0xff] }
  0x43   :  { %v4316_v35 = vld [vmem:[%s5680_s9 + $0x1c0] sm:$0xff]  ;;  %v4401_v50 = vld [vmem:[%s5680_s9 + $0x188] sm:$0xff] }
  0x44   :  { %821 = vmatpush.bf16.msra.mxu2 %v2384_v60  ;;  %835 = vmatpush.bf16.msra.mxu3 %v2448_v61  ;;  %v2640_v60 = vor.u32 %v3217_v1, %v2637_v3  ;;  %v2704_v61 = vor.u32 %v3233_v58, %v2701_v59  ;;  %v2581_v1 = vld [vmem:[%s5679_s3 + $0x198] sm:$0xf0]  ;;  %v2520_v3 = vor.u32 %v3187_v57, %v2517_v0  ;;  %v3185_v59 = vld [vmem:[%s5679_s3 + $0x104] sm:$0xf]  ;;  %v4438_v57 = vld [vmem:[%s5680_s9 + $0x150] sm:$0xff] }
  0x45   :  { %792 = vmatpush.bf16.msra.mxu0 %v2644_v26  ;;  %v3211_v26 = vld [vmem:[%s5679_s3 + $0x1d4] sm:$0xf]  ;;  %v4396_v49 = vld [vmem:[%s5680_s9 + $0x180] sm:$0xff]  ;;  %v4443_v0 = vld [vmem:[%s5680_s9 + $0x158] sm:$0xff] }
  0x46   :  { %806 = vmatpush.bf16.msra.mxu1 %v2708_v27  ;;  %v2613_v27 = vld [vmem:[%s5679_s3 + $0x1d8] sm:$0xf0] }
  0x47   :  { %v2616_v30 = vor.u32 %v3211_v26, %v2613_v27  ;;  %v4273_v26 = vld [vmem:[%s5680_s9 + $0x48] sm:$0xff] }
  0x48   :  { %870 = vmatpush.bf16.msrb.mxu2 %v2696_v62  ;;  %884 = vmatpush.bf16.msrb.mxu3 %v2760_v63  ;;  %v4278_v27 = vld [vmem:[%s5680_s9 + $0x1e8] sm:$0xff] }
  0x49   :  { %793 = vmatpush.bf16.msra.mxu0 %v2636_v37 }
  0x4a   :  { %807 = vmatpush.bf16.msra.mxu1 %v2700_v39  ;;  %v3191_v39 = vld [vmem:[%s5679_s3 + $0x134] sm:$0xf] }
  0x4c   :  { %871 = vmatpush.bf16.msrb.mxu2 %v2688_v7  ;;  %885 = vmatpush.bf16.msrb.mxu3 %v2752_v9  ;;  %v2629_v7 = vld [vmem:[%s5679_s3 + $0x1f8] sm:$0xf0] }
  0x4d   :  { %v2632_v13 = vor.u32 %v3215_v6, %v2629_v7  ;;  %v4153_v6 = vld [vmem:[%s5680_s9 + $0xe0] sm:$0xff]  ;;  %v4160_v7 = vld [vmem:[%s5680_s9 + $0xd0] sm:$0xff] }
  0x50   :  { %872 = vmatpush.bf16.msrb.mxu2 %v2680_v18  ;;  %886 = vmatpush.bf16.msrb.mxu3 %v2744_v22  ;;  %v2624_v22 = vor.u32 %v3213_v16, %v2621_v17  ;;  %v4227_v16 = vld [vmem:[%s5680_s9 + $0x60] sm:$0xff]  ;;  %v4232_v17 = vld [vmem:[%s5680_s9 + $0x68] sm:$0xff] }
  0x54   :  { %873 = vmatpush.bf16.msrb.mxu2 %v2672_v31  ;;  %887 = vmatpush.bf16.msrb.mxu3 %v2736_v33  ;;  %v3193_v31 = vld [vmem:[%s5679_s3 + $0x144] sm:$0xf]  ;;  %v2541_v33 = vld [vmem:[%s5679_s3 + $0x148] sm:$0xf0] }
  0x55   :  { %v2544_v37 = vor.u32 %v3193_v31, %v2541_v33  ;;  %v4297_v31 = vld [vmem:[%s5680_s9 + $0x38] sm:$0xff] }
  0x56   :  { %v4304_v33 = vld [vmem:[%s5680_s9 + $0x1d8] sm:$0xff] }
  0x58   :  { %874 = vmatpush.bf16.msrb.mxu2 %v2664_v44  ;;  %888 = vmatpush.bf16.msrb.mxu3 %v2728_v45  ;;  %v2597_v44 = vld [vmem:[%s5679_s3 + $0x1b8] sm:$0xf0]  ;;  %v2536_v45 = vor.u32 %v3191_v39, %v2533_v40  ;;  %v4335_v39 = vld [vmem:[%s5680_s9 + $0x10] sm:$0xff] }
  0x59   :  { %v4340_v40 = vld [vmem:[%s5680_s9 + $0x1b0] sm:$0xff] }
  0x5c   :  { %875 = vmatpush.bf16.msrb.mxu2 %v2656_v48  ;;  %889 = vmatpush.bf16.msrb.mxu3 %v2720_v51  ;;  %v2600_v48 = vor.u32 %v3207_v43, %v2597_v44  ;;  %v3205_v51 = vld [vmem:[%s5679_s3 + $0x1a4] sm:$0xf] }
  0x5d   :  { %v4357_v43 = vld [vmem:[%s5680_s9] sm:$0xff] }
  0x5e   :  { %v4362_v44 = vld [vmem:[%s5680_s9 + $0x1a0] sm:$0xff] }
  0x60   :  { %876 = vmatpush.bf16.msrb.mxu2 %v2648_v56  ;;  %890 = vmatpush.bf16.msrb.mxu3 %v2712_v2  ;;  %v2592_v56 = vor.u32 %v3205_v51, %v2589_v52  ;;  %v3203_v2 = vld [vmem:[%s5679_s3 + $0x194] sm:$0xf]  ;;  %v4415_v52 = vld [vmem:[%s5680_s9 + $0x178] sm:$0xff] }
  0x61   :  { %v2584_v58 = vor.u32 %v3203_v2, %v2581_v1  ;;  %v4410_v51 = vld [vmem:[%s5680_s9 + $0x170] sm:$0xff]  ;;  %v4452_v1 = vld [vmem:[%s5680_s9 + $0x140] sm:$0xff] }
  0x64   :  { %877 = vmatpush.bf16.msrb.mxu2 %v2640_v60  ;;  %891 = vmatpush.bf16.msrb.mxu3 %v2704_v61  ;;  %v2509_v60 = vld [vmem:[%s5679_s3 + $0x108] sm:$0xf0]  ;;  %v3201_v61 = vld [vmem:[%s5679_s3 + $0x184] sm:$0xf] }
  0x82   :  { %v65_v62 = vpop.f32.mrf.mxu0  ;;  %v88_v63 = vpop.f32.mrf.mxu1 }
  0x8a   :  { %v68_v8 = vpop.f32.mrf.mxu0  ;;  %v91_v9 = vpop.f32.mrf.mxu1 }
  0x8b   :  { %v148_v10 = vpack.c.bf16 %v68_v8, %v65_v62  ;;  %v149_v11 = vpack.c.bf16 %v91_v9, %v88_v63  ;;  %v119_v18 = vpop.f32.mrf.mxu2  ;;  %v142_v19 = vpop.f32.mrf.mxu3  ;;  %v2573_v62 = vld [vmem:[%s5679_s3 + $0x188] sm:$0xf0]  ;;  %v2512_v63 = vor.u32 %v3185_v59, %v2509_v60  ;;  %v4166_v8 = vld [vmem:[%s5680_s9 + $0xc0] sm:$0xff] }
  0x8c   :  { %v2576_v4 = vor.u32 %v3201_v61, %v2573_v62  ;;  %v4184_v9 = vld [vmem:[%s5680_s9 + $0xa8] sm:$0xff]  ;;  %v4494_v61 = vld [vmem:[%s5680_s9 + $0x110] sm:$0xff]  ;;  %v4499_v62 = vld [vmem:[%s5680_s9 + $0x118] sm:$0xff] }
  0x8d   :  { %738 = vmatmul.bf16.vlgmr.msrb.gmra.mxu0 %v148_v10  ;;  %752 = vmatmul.bf16.vlgmr.msrb.gmra.mxu1 %v149_v11  ;;  %v4485_v59 = vld [vmem:[%s5680_s9 + $0x128] sm:$0xff] }
  0x8e   :  { %822 = vmatmul.bf16.vlgmr.msra.gmra.mxu2 %v148_v10  ;;  %836 = vmatmul.bf16.vlgmr.msra.gmra.mxu3 %v149_v11  ;;  %v4191_v10 = vld [vmem:[%s5680_s9 + $0x90] sm:$0xff]  ;;  %v4196_v11 = vld [vmem:[%s5680_s9 + $0x98] sm:$0xff] }
  0x8f   :  { %842 = vmatpush.bf16.msrb.mxu0 %v2568_v12  ;;  %856 = vmatpush.bf16.msrb.mxu1 %v2632_v13  ;;  %v4203_v12 = vld [vmem:[%s5680_s9 + $0x80] sm:$0xff]  ;;  %v4208_v13 = vld [vmem:[%s5680_s9 + $0x88] sm:$0xff] }
  0x90   :  { %1008 = vmatpush.msra.mxu2 %v4045_v20 }
  0x92   :  { %1009 = vmatpush.msra.mxu2 %v4053_v24 }
  0x93   :  { %843 = vmatpush.bf16.msrb.mxu0 %v2560_v21  ;;  %857 = vmatpush.bf16.msrb.mxu1 %v2624_v22  ;;  %v122_v41 = vpop.f32.mrf.mxu2  ;;  %v145_v42 = vpop.f32.mrf.mxu3  ;;  %v4249_v21 = vld [vmem:[%s5680_s9 + $0x58] sm:$0xff] }
  0x94   :  { %1010 = vmatpush.msra.mxu2 %v4068_v28  ;;  %v152_v46 = vpack.c.bf16 %v122_v41, %v119_v18  ;;  %v153_v47 = vpack.c.bf16 %v145_v42, %v142_v19  ;;  %v4239_v18 = vld [vmem:[%s5680_s9 + $0x50] sm:$0xff]  ;;  %v4256_v22 = vld [vmem:[%s5680_s9 + $0x1f8] sm:$0xff] }
  0x95   :  { %v4244_v19 = vld [vmem:[%s5680_s9 + $0x1f0] sm:$0xff]  ;;  %1031 = vmatpush.msra.mxu3 %v4256_v22  ;;  %v4345_v41 = vld [vmem:[%s5680_s9 + $0x18] sm:$0xff] }
  0x96   :  { %1011 = vmatpush.msra.mxu2 %v4077_v32  ;;  %v4352_v42 = vld [vmem:[%s5680_s9 + $0x1b8] sm:$0xff] }
  0x97   :  { %844 = vmatpush.bf16.msrb.mxu0 %v2552_v29  ;;  %858 = vmatpush.bf16.msrb.mxu1 %v2616_v30  ;;  %v4287_v29 = vld [vmem:[%s5680_s9 + $0x30] sm:$0xff] }
  0x98   :  { %1012 = vmatpush.msra.mxu2 %v4092_v36  ;;  %1032 = vmatpush.msra.mxu3 %v4278_v27  ;;  %v4292_v30 = vld [vmem:[%s5680_s9 + $0x1d0] sm:$0xff] }
  0x9a   :  { %1013 = vmatpush.msra.mxu2 %v4184_v9  ;;  %1033 = vmatpush.msra.mxu3 %v4304_v33 }
  0x9b   :  { %845 = vmatpush.bf16.msrb.mxu0 %v2544_v37  ;;  %859 = vmatpush.bf16.msrb.mxu1 %v2608_v38  ;;  %v4321_v37 = vld [vmem:[%s5680_s9 + $0x28] sm:$0xff] }
  0x9c   :  { %1014 = vmatpush.msra.mxu2 %v4196_v11  ;;  %v4328_v38 = vld [vmem:[%s5680_s9 + $0x1c8] sm:$0xff] }
  0x9d   :  { %794 = vmatmul.bf16.vlgmr.msra.gmra.mxu0 %v152_v46  ;;  %808 = vmatmul.bf16.vlgmr.msra.gmra.mxu1 %v153_v47 }
  0x9e   :  { %878 = vmatmul.bf16.vlgmr.msrb.gmra.mxu2 %v152_v46  ;;  %892 = vmatmul.bf16.vlgmr.msrb.gmra.mxu3 %v153_v47  ;;  %v4374_v46 = vld [vmem:[%s5680_s9 + $0x1a8] sm:$0xff]  ;;  %v4383_v47 = vld [vmem:[%s5680_s9 + $0x190] sm:$0xff] }
  0x9f   :  { %846 = vmatpush.bf16.msrb.mxu0 %v2536_v45  ;;  %860 = vmatpush.bf16.msrb.mxu1 %v2600_v48  ;;  %v4369_v45 = vld [vmem:[%s5680_s9 + $0x8] sm:$0xff]  ;;  %v4388_v48 = vld [vmem:[%s5680_s9 + $0x198] sm:$0xff] }
  0xa0   :  { %1015 = vmatpush.msra.mxu2 %v4208_v13  ;;  %1034 = vmatpush.msra.mxu3 %v4328_v38 }
  0xa2   :  { %1016 = vmatpush.msra.mxu2 %v4220_v15  ;;  %1035 = vmatpush.msra.mxu3 %v4352_v42 }
  0xa3   :  { %847 = vmatpush.bf16.msrb.mxu0 %v2528_v55  ;;  %861 = vmatpush.bf16.msrb.mxu1 %v2592_v56  ;;  %v4427_v56 = vld [vmem:[%s5680_s9 + $0x168] sm:$0xff] }
  0xa4   :  { %1017 = vmatpush.msra.mxu2 %v4232_v17  ;;  %1036 = vmatpush.msra.mxu3 %v4374_v46 }
  0xa6   :  { %1018 = vmatpush.msra.mxu2 %v4249_v21  ;;  %1037 = vmatpush.msra.mxu3 %v4388_v48 }
  0xa7   :  { %848 = vmatpush.bf16.msrb.mxu0 %v2520_v3  ;;  %862 = vmatpush.bf16.msrb.mxu1 %v2584_v58  ;;  %v4457_v3 = vld [vmem:[%s5680_s9 + $0x148] sm:$0xff]  ;;  %v4471_v58 = vld [vmem:[%s5680_s9 + $0x138] sm:$0xff] }
  0xa8   :  { %1019 = vmatpush.msra.mxu2 %v4273_v26  ;;  %1038 = vmatpush.msra.mxu3 %v4401_v50 }
  0xaa   :  { %1020 = vmatpush.msra.mxu2 %v4297_v31  ;;  %v767_v55 = vpop.f32.mrf.mxu2  ;;  %1039 = vmatpush.msra.mxu3 %v4415_v52 }
  0xab   :  { %849 = vmatpush.bf16.msrb.mxu0 %v2512_v63  ;;  %863 = vmatpush.bf16.msrb.mxu1 %v2576_v4 }
  0xac   :  { %1021 = vmatpush.msra.mxu2 %v4321_v37  ;;  %1040 = vmatpush.msra.mxu3 %v4427_v56 }
  0xae   :  { %850 = vmatmul.bf16.vlgmr.msrb.gmra.mxu0 %v3749_v53  ;;  %864 = vmatmul.bf16.vlgmr.msrb.gmra.mxu1 %v3753_v54  ;;  %v4172_v53 = vld [vmem:[%s5680_s9 + $0xb0] sm:$0xff]  ;;  %v4179_v54 = vld [vmem:[%s5680_s9 + $0xa0] sm:$0xff] }
  0xaf   :  { %962 = vmatpush.msra.mxu0 %v4147_v5  ;;  %985 = vmatpush.msra.mxu1 %v4244_v19 }
  0xb0   :  { %1022 = vmatpush.msra.mxu2 %v4345_v41  ;;  %1041 = vmatpush.msra.mxu3 %v4443_v0 }
  0xb1   :  { %963 = vmatpush.msra.mxu0 %v4153_v6  ;;  %986 = vmatpush.msra.mxu1 %v4266_v25 }
  0xb2   :  { %1023 = vmatpush.msra.mxu2 %v4369_v45  ;;  %1042 = vmatpush.msra.mxu3 %v4457_v3  ;;  %v769_v60 = vpop.f32.mrf.mxu2 }
  0xb3   :  { %964 = vmatpush.msra.mxu0 %v4160_v7  ;;  %987 = vmatpush.msra.mxu1 %v4292_v30 }
  0xb4   :  { %1124 = vmatpush.msrb.mxu2 %v4045_v20  ;;  %v4422_v20 = vld [vmem:[%s5680_s9 + $0x160] sm:$0xff]  ;;  %1043 = vmatpush.msra.mxu3 %v4471_v58 }
  0xb5   :  { %965 = vmatpush.msra.mxu0 %v4166_v8  ;;  %988 = vmatpush.msra.mxu1 %v4316_v35 }
  0xb6   :  { %1125 = vmatpush.msrb.mxu2 %v4053_v24  ;;  %v781_v24 = vpop.f32.mrf.mxu3  ;;  %1044 = vmatpush.msra.mxu3 %v4485_v59 }
  0xb7   :  { %966 = vmatpush.msra.mxu0 %v4172_v53  ;;  %989 = vmatpush.msra.mxu1 %v4340_v40 }
  0xb8   :  { %1126 = vmatpush.msrb.mxu2 %v4068_v28  ;;  %1045 = vmatpush.msra.mxu3 %v4499_v62 }
  0xb9   :  { %967 = vmatpush.msra.mxu0 %v4179_v54  ;;  %990 = vmatpush.msra.mxu1 %v4362_v44 }
  0xba   :  { %1127 = vmatpush.msrb.mxu2 %v4077_v32  ;;  %v4466_v32 = vld [vmem:[%s5680_s9 + $0x130] sm:$0xff] }
  0xbb   :  { %968 = vmatpush.msra.mxu0 %v4191_v10  ;;  %991 = vmatpush.msra.mxu1 %v4383_v47 }
  0xbc   :  { %1128 = vmatpush.msrb.mxu2 %v4092_v36  ;;  %v4480_v36 = vld [vmem:[%s5680_s9 + $0x120] sm:$0xff] }
  0xbd   :  { %969 = vmatpush.msra.mxu0 %v4203_v12  ;;  %992 = vmatpush.msra.mxu1 %v4396_v49 }
  0xbe   :  { %1129 = vmatpush.msrb.mxu2 %v4184_v9  ;;  %v783_v63 = vpop.f32.mrf.mxu3 }
  0xbf   :  { %970 = vmatpush.msra.mxu0 %v4215_v14  ;;  %993 = vmatpush.msra.mxu1 %v4410_v51 }
  0xc0   :  { %1130 = vmatpush.msrb.mxu2 %v4196_v11 }
  0xc1   :  { %971 = vmatpush.msra.mxu0 %v4227_v16  ;;  %994 = vmatpush.msra.mxu1 %v4422_v20 }
  0xc2   :  { %1131 = vmatpush.msrb.mxu2 %v4208_v13 }
  0xc3   :  { %972 = vmatpush.msra.mxu0 %v4239_v18  ;;  %995 = vmatpush.msra.mxu1 %v4438_v57 }
  0xc4   :  { %1132 = vmatpush.msrb.mxu2 %v4220_v15 }
  0xc5   :  { %973 = vmatpush.msra.mxu0 %v4261_v23  ;;  %996 = vmatpush.msra.mxu1 %v4452_v1 }
  0xc6   :  { %1133 = vmatpush.msrb.mxu2 %v4232_v17 }
  0xc7   :  { %974 = vmatpush.msra.mxu0 %v4287_v29  ;;  %997 = vmatpush.msra.mxu1 %v4466_v32 }
  0xc8   :  { %1134 = vmatpush.msrb.mxu2 %v4249_v21 }
  0xc9   :  { %975 = vmatpush.msra.mxu0 %v4311_v34  ;;  %998 = vmatpush.msra.mxu1 %v4480_v36 }
  0xca   :  { %1135 = vmatpush.msrb.mxu2 %v4273_v26 }
  0xcb   :  { %976 = vmatpush.msra.mxu0 %v4335_v39  ;;  %999 = vmatpush.msra.mxu1 %v4494_v61 }
  0xcc   :  { %1136 = vmatpush.msrb.mxu2 %v4297_v31 }
  0xcd   :  { %977 = vmatpush.msra.mxu0 %v4357_v43 }
  0xce   :  { %1137 = vmatpush.msrb.mxu2 %v4321_v37 }
  0xcf   :  { %1078 = vmatpush.msrb.mxu0 %v4147_v5 }
  0xd0   :  { %1138 = vmatpush.msrb.mxu2 %v4345_v41 }
  0xd1   :  { %1079 = vmatpush.msrb.mxu0 %v4153_v6 }
  0xd2   :  { %1139 = vmatpush.msrb.mxu2 %v4369_v45 }
  0xd3   :  { %1080 = vmatpush.msrb.mxu0 %v4160_v7  ;;  %v4508_v7 = vld [vmem:[%s5680_s9 + $0x100] sm:$0xff] }
  0xd4   :  { %1000 = vmatpush.msra.mxu1 %v4508_v7 }
  0xd5   :  { %1081 = vmatpush.msrb.mxu0 %v4166_v8  ;;  %v4513_v8 = vld [vmem:[%s5680_s9 + $0x108] sm:$0xff] }
  0xd6   :  { %1046 = vmatpush.msra.mxu3 %v4513_v8  ;;  %1101 = vmatpush.msrb.mxu1 %v4244_v19 }
  0xd7   :  { %1082 = vmatpush.msrb.mxu0 %v4172_v53 }
  0xd8   :  { %1147 = vmatpush.msrb.mxu3 %v4256_v22  ;;  %1102 = vmatpush.msrb.mxu1 %v4266_v25 }
  0xd9   :  { %1083 = vmatpush.msrb.mxu0 %v4179_v54 }
  0xda   :  { %1148 = vmatpush.msrb.mxu3 %v4278_v27  ;;  %1103 = vmatpush.msrb.mxu1 %v4292_v30 }
  0xdb   :  { %1084 = vmatpush.msrb.mxu0 %v4191_v10 }
  0xdc   :  { %1149 = vmatpush.msrb.mxu3 %v4304_v33  ;;  %1104 = vmatpush.msrb.mxu1 %v4316_v35 }
  0xdd   :  { %1085 = vmatpush.msrb.mxu0 %v4203_v12 }
  0xde   :  { %1150 = vmatpush.msrb.mxu3 %v4328_v38  ;;  %1105 = vmatpush.msrb.mxu1 %v4340_v40 }
  0xdf   :  { %1086 = vmatpush.msrb.mxu0 %v4215_v14 }
  0xe0   :  { %1151 = vmatpush.msrb.mxu3 %v4352_v42  ;;  %1106 = vmatpush.msrb.mxu1 %v4362_v44 }
  0xe1   :  { %1087 = vmatpush.msrb.mxu0 %v4227_v16 }
  0xe2   :  { %1152 = vmatpush.msrb.mxu3 %v4374_v46  ;;  %1107 = vmatpush.msrb.mxu1 %v4383_v47 }
  0xe3   :  { %1088 = vmatpush.msrb.mxu0 %v4239_v18 }
  0xe4   :  { %1153 = vmatpush.msrb.mxu3 %v4388_v48  ;;  %1108 = vmatpush.msrb.mxu1 %v4396_v49 }
  0xe5   :  { %1089 = vmatpush.msrb.mxu0 %v4261_v23 }
  0xe6   :  { %1154 = vmatpush.msrb.mxu3 %v4401_v50  ;;  %1109 = vmatpush.msrb.mxu1 %v4410_v51 }
  0xe7   :  { %1090 = vmatpush.msrb.mxu0 %v4287_v29 }
  0xe8   :  { %1155 = vmatpush.msrb.mxu3 %v4415_v52  ;;  %1110 = vmatpush.msrb.mxu1 %v4422_v20 }
  0xe9   :  { %1091 = vmatpush.msrb.mxu0 %v4311_v34 }
  0xea   :  { %1156 = vmatpush.msrb.mxu3 %v4427_v56  ;;  %1111 = vmatpush.msrb.mxu1 %v4438_v57 }
  0xeb   :  { %1092 = vmatpush.msrb.mxu0 %v4335_v39 }
  0xec   :  { %1157 = vmatpush.msrb.mxu3 %v4443_v0  ;;  %1112 = vmatpush.msrb.mxu1 %v4452_v1 }
  0xed   :  { %1093 = vmatpush.msrb.mxu0 %v4357_v43 }
  0xee   :  { %1158 = vmatpush.msrb.mxu3 %v4457_v3  ;;  %1113 = vmatpush.msrb.mxu1 %v4466_v32 }
  0xf0   :  { %1159 = vmatpush.msrb.mxu3 %v4471_v58  ;;  %1114 = vmatpush.msrb.mxu1 %v4480_v36 }
  0xf2   :  { %1160 = vmatpush.msrb.mxu3 %v4485_v59  ;;  %1115 = vmatpush.msrb.mxu1 %v4494_v61 }
  0xf4   :  { %1161 = vmatpush.msrb.mxu3 %v4499_v62  ;;  %1116 = vmatpush.msrb.mxu1 %v4508_v7 }
  0xf6   :  { %1162 = vmatpush.msrb.mxu3 %v4513_v8 }
 0x10a   :  { %v739_v28 = vpop.f32.mrf.mxu0  ;;  %v753_v2 = vpop.f32.mrf.mxu1 }
 0x10b   :  { %v754_v4 = vadd.f32 %v753_v2, %v739_v28 }
 0x10d   :  { %v768_v53 = vadd.f32 %v767_v55, %v754_v4 }
 0x10f   :  { %v782_v10 = vadd.f32 %v781_v24, %v768_v53 }
 0x111   :  { %v823_v54 = vpop.f32.mrf.mxu2  ;;  %v837_v13 = vpop.f32.mrf.mxu3 }
 0x112   :  { %v741_v5 = vpop.f32.mrf.mxu0  ;;  %v755_v6 = vpop.f32.mrf.mxu1  ;;  %v838_v26 = vadd.f32 %v837_v13, %v823_v54 }
 0x113   :  { %v756_v9 = vadd.f32 %v755_v6, %v741_v5 }
 0x115   :  { %v770_v15 = vadd.f32 %v769_v60, %v756_v9 }
 0x117   :  { %v784_v17 = vadd.f32 %v783_v63, %v770_v15 }
 0x119   :  { %v825_v21 = vpop.f32.mrf.mxu2  ;;  %v839_v23 = vpop.f32.mrf.mxu3 }
 0x11a   :  { %v795_v11 = vpop.f32.mrf.mxu0  ;;  %v809_v12 = vpop.f32.mrf.mxu1  ;;  %v840_v37 = vadd.f32 %v839_v23, %v825_v21 }
 0x11b   :  { %v796_v14 = vadd.f32 %v795_v11, %v782_v10 }
 0x11d   :  { %v4536_v16 = vadd.f32 %v809_v12, %v796_v14 }
 0x11f   :  { %978 = vmatmul.f32.vlgmr.msra.gmra.mxu0 %v4536_v16  ;;  %1024 = vmatmul.f32.vlgmr.msra.gmra.mxu2 %v4536_v16 }
 0x121   :  { %v879_v31 = vpop.f32.mrf.mxu2  ;;  %v893_v34 = vpop.f32.mrf.mxu3 }
 0x122   :  { %v797_v18 = vpop.f32.mrf.mxu0  ;;  %v811_v19 = vpop.f32.mrf.mxu1 }
 0x123   :  { %v798_v22 = vadd.f32 %v797_v18, %v784_v17 }
 0x125   :  { %v4553_v25 = vadd.f32 %v811_v19, %v798_v22 }
 0x127   :  { %981 = vmatmul.f32.gmra.mxu0 %v4553_v25  ;;  %1027 = vmatmul.f32.gmra.mxu2 %v4553_v25 }
 0x129   :  { %v881_v43 = vpop.f32.mrf.mxu2  ;;  %v895_v45 = vpop.f32.mrf.mxu3 }
 0x12b   :  { %v851_v27 = vpop.f32.mrf.mxu0  ;;  %v865_v29 = vpop.f32.mrf.mxu1 }
 0x12c   :  { %v852_v30 = vadd.f32 %v851_v27, %v838_v26 }
 0x12e   :  { %v866_v33 = vadd.f32 %v865_v29, %v852_v30 }
 0x130   :  { %v880_v35 = vadd.f32 %v879_v31, %v866_v33 }
 0x132   :  { %v894_v38 = vadd.f32 %v893_v34, %v880_v35 }
 0x133   :  { %v853_v39 = vpop.f32.mrf.mxu0  ;;  %v867_v41 = vpop.f32.mrf.mxu1 }
 0x134   :  { %v854_v40 = vadd.f32 %v853_v39, %v840_v37  ;;  %1001 = vmatmul.f32.vlgmr.msra.gmra.mxu1 %v894_v38  ;;  %1047 = vmatmul.f32.vlgmr.msra.gmra.mxu3 %v894_v38 }
 0x136   :  { %v868_v42 = vadd.f32 %v867_v41, %v854_v40 }
 0x138   :  { %v882_v44 = vadd.f32 %v881_v43, %v868_v42 }
 0x13a   :  { %v896_v46 = vadd.f32 %v895_v45, %v882_v44 }
 0x13c   :  { %1004 = vmatmul.f32.gmra.mxu1 %v896_v46  ;;  %1050 = vmatmul.f32.gmra.mxu3 %v896_v46 }
 0x19c   :  { %v979_v47 = vpop.f32.mrf.mxu0 }
 0x1a2   :  { %v1025_v49 = vpop.f32.mrf.mxu2 }
 0x1a4   :  { %v982_v51 = vpop.f32.mrf.mxu0 }
 0x1aa   :  { %v1028_v57 = vpop.f32.mrf.mxu2 }
 0x1b1   :  { %v1002_v48 = vpop.f32.mrf.mxu1 }
 0x1b2   :  { %v1003_v55 = vadd.f32 %v1002_v48, %v979_v47 }
 0x1b7   :  { %v1048_v50 = vpop.f32.mrf.mxu3 }
 0x1b8   :  { %v1049_v28 = vadd.f32 %v1048_v50, %v1025_v49 }
 0x1b9   :  { %v1005_v52 = vpop.f32.mrf.mxu1 }
 0x1ba   :  { %v1006_v20 = vadd.f32 %v1005_v52, %v982_v51 }
 0x1bc   :  { %v1054_v56 = vadd.f32 %v1006_v20, %v1003_v55 }
 0x1be   :  { %v1055_v24 = vrot.slane %v1054_v56, 4 }
 0x1bf   :  { %v1051_v0 = vpop.f32.mrf.mxu3 }
 0x1c0   :  { %v1056_v2 = vadd.f32 %v1055_v24, %v1054_v56  ;;  %v1052_v1 = vadd.f32 %v1051_v0, %v1028_v57 }
 0x1c2   :  { %v1057_v3 = vrot.slane %v1056_v2, 2  ;;  %v1061_v32 = vadd.f32 %v1052_v1, %v1049_v28 }
 0x1c4   :  { %v1058_v58 = vadd.f32 %v1057_v3, %v1056_v2  ;;  %v1062_v36 = vrot.slane %v1061_v32, 4 }
 0x1c6   :  { %v1059_v59 = vrot.slane %v1058_v58, 1  ;;  %v1063_v60 = vadd.f32 %v1062_v36, %v1061_v32  ;;  %v1186_v32 = vld [vmem:[%s5681_s4] sm:$0x3] }
 0x1c8   :  { %v1060_v61 = vadd.f32 %v1059_v59, %v1058_v58  ;;  %v1064_v62 = vrot.slane %v1063_v60, 2  ;;  %v1225_v59 = vld [vmem:[%s5682_s5] sm:$0x3] }
 0x1ca   :  { %v1068_v63 = vmul.f32 0.0078125, %v1060_v61  ;;  %v1065_v4 = vadd.f32 %v1064_v62, %v1063_v60  ;;  %v1227_v62 = vperm.slane %v1225_v59, 0 }
 0x1cc   :  { %v1066_v5 = vrot.slane %v1065_v4, 1  ;;  %v4573_v6 = vsub.f32 %v4536_v16, %v1068_v63  ;;  %v4580_v9 = vsub.f32 %v4553_v25, %v1068_v63 }
 0x1ce   :  { %v1067_v7 = vadd.f32 %v1066_v5, %v1065_v4  ;;  %v1074_v8 = vmul.f32 %v4573_v6, %v4573_v6  ;;  %v1076_v11 = vmul.f32 %v4580_v9, %v4580_v9  ;;  %v1228_v4 = vperm.slane %v1225_v59, 1  ;;  %v2923_v59 = vld [vmem:[%s5683_s6 + $0x130] sm:$0xf] }
 0x1d0   :  { %v1069_v53 = vmul.f32 0.0078125, %v1067_v7  ;;  %1094 = vmatmul.f32.vlgmr.msrb.gmra.mxu0 %v1074_v8  ;;  %1140 = vmatmul.f32.vlgmr.msrb.gmra.mxu2 %v1074_v8 }
 0x1d2   :  { %v4577_v54 = vsub.f32 %v894_v38, %v1069_v53  ;;  %v4586_v12 = vsub.f32 %v896_v46, %v1069_v53 }
 0x1d4   :  { %v1075_v10 = vmul.f32 %v4577_v54, %v4577_v54  ;;  %v1077_v13 = vmul.f32 %v4586_v12, %v4586_v12 }
 0x1d6   :  { %1117 = vmatmul.f32.vlgmr.msrb.gmra.mxu1 %v1075_v10  ;;  %1163 = vmatmul.f32.vlgmr.msrb.gmra.mxu3 %v1075_v10 }
 0x1d8   :  { %1097 = vmatmul.f32.gmra.mxu0 %v1076_v11  ;;  %1143 = vmatmul.f32.gmra.mxu2 %v1076_v11 }
 0x1de   :  { %1120 = vmatmul.f32.gmra.mxu1 %v1077_v13  ;;  %1166 = vmatmul.f32.gmra.mxu3 %v1077_v13 }
 0x24d   :  { %v1095_v14 = vpop.f32.mrf.mxu0 }
 0x253   :  { %v1118_v15 = vpop.f32.mrf.mxu1  ;;  %v1141_v16 = vpop.f32.mrf.mxu2 }
 0x254   :  { %v1119_v21 = vadd.f32 %v1118_v15, %v1095_v14  ;;  %v2955_v15 = vld [vmem:[%s5683_s6 + $0x170] sm:$0xf] }
 0x255   :  { %v1098_v18 = vpop.f32.mrf.mxu0 }
 0x259   :  { %v1164_v17 = vpop.f32.mrf.mxu3 }
 0x25a   :  { %v1165_v29 = vadd.f32 %v1164_v17, %v1141_v16  ;;  %v3296_v16 = vld [vmem:[%s5683_s6 + $0x174] sm:$0xf0] }
 0x25b   :  { %v1121_v19 = vpop.f32.mrf.mxu1  ;;  %v1144_v26 = vpop.f32.mrf.mxu2 }
 0x25c   :  { %v1122_v22 = vadd.f32 %v1121_v19, %v1098_v18  ;;  %v2956_v19 = vor.u32 %v3296_v16, %v2955_v15  ;;  %v3286_v15 = vld [vmem:[%s5683_s6 + $0x124] sm:$0xf0]  ;;  %v2979_v16 = vld [vmem:[%s5683_s6 + $0x1a0] sm:$0xf] }
 0x25e   :  { %v1170_v23 = vadd.f32 %v1122_v22, %v1119_v21  ;;  %v2947_v22 = vld [vmem:[%s5683_s6 + $0x160] sm:$0xf] }
 0x260   :  { %v1171_v25 = vrot.slane %v1170_v23, 4 }
 0x261   :  { %v1167_v27 = vpop.f32.mrf.mxu3 }
 0x262   :  { %v1172_v30 = vadd.f32 %v1171_v25, %v1170_v23  ;;  %v1168_v31 = vadd.f32 %v1167_v27, %v1144_v26  ;;  %v3294_v23 = vld [vmem:[%s5683_s6 + $0x164] sm:$0xf0]  ;;  %v3011_v25 = vld [vmem:[%s5683_s6 + $0x1e0] sm:$0xf] }
 0x263   :  { %v3310_v26 = vld [vmem:[%s5683_s6 + $0x1e4] sm:$0xf0]  ;;  %v3353_v27 = vld [vmem:[%s5677_s1] sm:$0xff] }
 0x264   :  { %v1173_v33 = vrot.slane %v1172_v30, 2  ;;  %v1177_v34 = vadd.f32 %v1168_v31, %v1165_v29  ;;  %v2939_v29 = vld [vmem:[%s5683_s6 + $0x150] sm:$0xf]  ;;  %v3264_v31 = vld [vmem:[%s5683_s6 + $0x74] sm:$0xf0] }
 0x266   :  { %v1174_v35 = vadd.f32 %v1173_v33, %v1172_v30  ;;  %v1178_v37 = vrot.slane %v1177_v34, 4  ;;  %v2827_v30 = vld [vmem:[%s5683_s6 + $0x70] sm:$0xf] }
 0x267   :  { %v2891_v33 = vld [vmem:[%s5683_s6 + $0xf0] sm:$0xf] }
 0x268   :  { %v1175_v38 = vrot.slane %v1174_v35, 1  ;;  %v1179_v39 = vadd.f32 %v1178_v37, %v1177_v34  ;;  %v2948_v34 = vor.u32 %v3294_v23, %v2947_v22  ;;  %v2828_v37 = vor.u32 %v3264_v31, %v2827_v30  ;;  %v3272_v22 = vld [vmem:[%s5683_s6 + $0xb4] sm:$0xf0]  ;;  %v2787_v23 = vld [vmem:[%s5683_s6 + $0x20] sm:$0xf] }
 0x269   :  { %v3284_v30 = vld [vmem:[%s5683_s6 + $0x114] sm:$0xf0]  ;;  %v2971_v31 = vld [vmem:[%s5683_s6 + $0x190] sm:$0xf] }
 0x26a   :  { %v1176_v40 = vadd.f32 %v1175_v38, %v1174_v35  ;;  %v1180_v41 = vrot.slane %v1179_v39, 2  ;;  %v3012_v35 = vor.u32 %v3310_v26, %v3011_v25  ;;  %v3280_v38 = vld [vmem:[%s5683_s6 + $0xf4] sm:$0xf0]  ;;  %v3254_v25 = vld [vmem:[%s5683_s6 + $0x24] sm:$0xf0] }
 0x26c   :  { %v1184_v42 = vmul.f32 0.0078125, %v1176_v40  ;;  %v1181_v43 = vadd.f32 %v1180_v41, %v1179_v39  ;;  %v2819_v39 = vld [vmem:[%s5683_s6 + $0x60] sm:$0xf]  ;;  %v3262_v40 = vld [vmem:[%s5683_s6 + $0x64] sm:$0xf0] }
 0x26d   :  { %v3292_v41 = vld [vmem:[%s5683_s6 + $0x154] sm:$0xf0] }
 0x26e   :  { %v1187_v44 = vadd.f32 1e-05, %v1184_v42  ;;  %v1182_v45 = vrot.slane %v1181_v43, 1  ;;  %v3003_v42 = vld [vmem:[%s5683_s6 + $0x1d0] sm:$0xf] }
 0x270   :  { %3345 = vrsqrt.f32 %v1187_v44  ;;  %v1183_v46 = vadd.f32 %v1182_v45, %v1181_v43  ;;  %vm1195_vm5 = vweird.f32 %v1187_v44  ;;  %v3308_v43 = vld [vmem:[%s5683_s6 + $0x1d4] sm:$0xf0]  ;;  %v2892_v45 = vor.u32 %v3280_v38, %v2891_v33  ;;  %v3270_v38 = vld [vmem:[%s5683_s6 + $0xa4] sm:$0xf0] }
 0x271   :  { %v3300_v33 = vld [vmem:[%s5683_s6 + $0x194] sm:$0xf0] }
 0x272   :  { %v1185_v47 = vmul.f32 0.0078125, %v1183_v46  ;;  %v2820_v46 = vor.u32 %v3262_v40, %v2819_v39  ;;  %v2779_v39 = vld [vmem:[%s5683_s6 + $0x10] sm:$0xf]  ;;  %v3252_v40 = vld [vmem:[%s5683_s6 + $0x14] sm:$0xf0] }
 0x274   :  { %v1188_v48 = vadd.f32 1e-05, %v1185_v47  ;;  %v2883_v47 = vld [vmem:[%s5683_s6 + $0xe0] sm:$0xf] }
 0x276   :  { %v3346_v49 = vpop.eup %3345  ;;  %3347 = vrsqrt.f32 %v1188_v48  ;;  %vm1205_vm3 = vweird.f32 %v1188_v48 }
 0x277   :  { %v1190_v50 = vmul.f32 %v3346_v49, %v1187_v44  ;;  %vm1196_vm2 = vweird.f32 %v3346_v49  ;;  %v3354_v44 = vld [vmem:[%s5678_s2] sm:$0xff] }
 0x278   :  { %vm1197_vm7 = vmor %vm1195_vm5, %vm1196_vm2 }
 0x279   :  { %v1191_v51 = vmul.f32 %v3346_v49, %v1190_v50  ;;  %v3260_v50 = vld [vmem:[%s5683_s6 + $0x54] sm:$0xf0] }
 0x27b   :  { %v1192_v55 = vmul.f32 0.5, %v1191_v51  ;;  %v2940_v51 = vor.u32 %v3292_v41, %v2939_v29  ;;  %v2907_v29 = vld [vmem:[%s5683_s6 + $0x110] sm:$0xf] }
 0x27c   :  { %v3348_v52 = vpop.eup %3347  ;;  %v2908_v41 = vor.u32 %v3284_v30, %v2907_v29  ;;  %v3273_v29 = vld [vmem:[%s5683_s6 + $0xc4] sm:$0xf]  ;;  %v2869_v30 = vld [vmem:[%s5683_s6 + $0xc8] sm:$0xf0] }
 0x27d   :  { %v1200_v20 = vmul.f32 %v3348_v52, %v1188_v48  ;;  %v1193_v24 = vsub.f32 1.5, %v1192_v55  ;;  %vm1206_vm1 = vweird.f32 %v3348_v52  ;;  %v3278_v48 = vld [vmem:[%s5683_s6 + $0xe4] sm:$0xf0]  ;;  %v2931_v55 = vld [vmem:[%s5683_s6 + $0x140] sm:$0xf] }
 0x27e   :  { %vm1207_vm4 = vmor %vm1205_vm3, %vm1206_vm1 }
 0x27f   :  { %v1201_v56 = vmul.f32 %v3348_v52, %v1200_v20  ;;  %v1194_v28 = vmul.f32 %v3346_v49, %v1193_v24  ;;  %v3290_v20 = vld [vmem:[%s5683_s6 + $0x144] sm:$0xf0] }
 0x280   :  { %v3306_v24 = vld [vmem:[%s5683_s6 + $0x1c4] sm:$0xf0] }
 0x281   :  { %v1202_v57 = vmul.f32 0.5, %v1201_v56  ;;  %v1198_v58 = vsel %vm1197_vm7, %v3346_v49, %v1194_v28  ;;  %v2811_v49 = vld [vmem:[%s5683_s6 + $0x50] sm:$0xf]  ;;  %v2995_v56 = vld [vmem:[%s5683_s6 + $0x1c0] sm:$0xf] }
 0x282   :  { %v2875_v28 = vld [vmem:[%s5683_s6 + $0xd0] sm:$0xf] }
 0x283   :  { %v1203_v0 = vsub.f32 1.5, %v1202_v57  ;;  %v2884_v57 = vor.u32 %v3278_v48, %v2883_v47  ;;  %v3263_v47 = vld [vmem:[%s5683_s6 + $0x74] sm:$0xf]  ;;  %v2829_v48 = vld [vmem:[%s5683_s6 + $0x78] sm:$0xf0] }
 0x285   :  { %v1204_v2 = vmul.f32 %v3348_v52, %v1203_v0  ;;  %v2812_v0 = vor.u32 %v3260_v50, %v2811_v49  ;;  %v3279_v49 = vld [vmem:[%s5683_s6 + $0xf4] sm:$0xf]  ;;  %v2893_v50 = vld [vmem:[%s5683_s6 + $0xf8] sm:$0xf0] }
 0x287   :  { %v1208_v1 = vsel %vm1207_vm4, %v3348_v52, %v1204_v2  ;;  %v3004_v52 = vor.u32 %v3308_v43, %v3003_v42  ;;  %v3355_v2 = vld [vmem:[%s5677_s1 + $0x8] sm:$0xff]  ;;  %v2972_v42 = vor.u32 %v3300_v33, %v2971_v31  ;;  %v2899_v43 = vld [vmem:[%s5683_s6 + $0x100] sm:$0xf] }
 0x288   :  { %v1211_v3 = vrot.slane %v1208_v1, 7  ;;  %v3276_v1 = vld [vmem:[%s5683_s6 + $0xd4] sm:$0xf0] }
 0x28a   :  { %v1213_v36 = vsel %vm1212_vm6, %v1198_v58, %v1211_v3  ;;  %v2803_v3 = vld [vmem:[%s5683_s6 + $0x40] sm:$0xf]  ;;  %v2932_v58 = vor.u32 %v3290_v20, %v2931_v55  ;;  %v2843_v55 = vld [vmem:[%s5683_s6 + $0x90] sm:$0xf]  ;;  %v3268_v20 = vld [vmem:[%s5683_s6 + $0x94] sm:$0xf0] }
 0x28b   :  { %v1215_v60 = vmul.f32 %v1213_v36, %v1186_v32  ;;  %v3258_v32 = vld [vmem:[%s5683_s6 + $0x44] sm:$0xf0]  ;;  %v2996_v36 = vor.u32 %v3306_v24, %v2995_v56  ;;  %v2771_v56 = vld [vmem:[%s5683_s6] sm:$0xf] }
 0x28c   :  { %v3250_v24 = vld [vmem:[%s5683_s6 + $0x4] sm:$0xf0] }
 0x28d   :  { %v1217_v61 = vperm.slane %v1215_v60, 0  ;;  %v1218_v63 = vperm.slane %v1215_v60, 1  ;;  %v3288_v60 = vld [vmem:[%s5683_s6 + $0x134] sm:$0xf0] }
 0x28f   :  { %v1223_v5 = vmul.f32 %v1217_v61, %v4580_v9  ;;  %v1224_v7 = vmul.f32 %v1218_v63, %v4586_v12  ;;  %v1221_v8 = vmul.f32 %v1217_v61, %v4573_v6  ;;  %v1222_v53 = vmul.f32 %v1218_v63, %v4577_v54  ;;  %v3019_v6 = vld [vmem:[%s5683_s6 + $0x1f0] sm:$0xf]  ;;  %v3312_v54 = vld [vmem:[%s5683_s6 + $0x1f4] sm:$0xf0]  ;;  %v3356_v63 = vld [vmem:[%s5678_s2 + $0x8] sm:$0xff] }
 0x290   :  { %v3020_v21 = vor.u32 %v3312_v54, %v3019_v6  ;;  %v2987_v61 = vld [vmem:[%s5683_s6 + $0x1b0] sm:$0xf]  ;;  %v3302_v6 = vld [vmem:[%s5683_s6 + $0x1a4] sm:$0xf0] }
 0x291   :  { %v1233_v10 = vadd.f32 %v1227_v62, %v1223_v5  ;;  %v1234_v11 = vadd.f32 %v1228_v4, %v1224_v7  ;;  %v1231_v13 = vadd.f32 %v1227_v62, %v1221_v8  ;;  %v1232_v14 = vadd.f32 %v1228_v4, %v1222_v53  ;;  %v3304_v62 = vld [vmem:[%s5683_s6 + $0x1b4] sm:$0xf0]  ;;  %v2867_v7 = vld [vmem:[%s5683_s6 + $0xc0] sm:$0xf]  ;;  %v3274_v8 = vld [vmem:[%s5683_s6 + $0xc4] sm:$0xf0] }
 0x292   :  { %v2876_v4 = vor.u32 %v3276_v1, %v2875_v28  ;;  %v2804_v5 = vor.u32 %v3258_v32, %v2803_v3  ;;  %v2795_v53 = vld [vmem:[%s5683_s6 + $0x30] sm:$0xf]  ;;  %v2868_v54 = vor.u32 %v3274_v8, %v2867_v7  ;;  %v2832_v28 = vor.u32 %v3263_v47, %v2829_v48  ;;  %v3261_v1 = vld [vmem:[%s5683_s6 + $0x64] sm:$0xf]  ;;  %v3328_v32 = vld [vmem:[%s5683_s6 + $0x274] sm:$0xf0] }
 0x293   :  { %v4607_v17 = vmax.f32 %v1233_v10, 0.0  ;;  %v4609_v9 = vmax.f32 %v1234_v11, 0.0  ;;  %v4619_v12 = vmax.f32 %v1231_v13, 0.0  ;;  %v4621_v18 = vmax.f32 %v1232_v14, 0.0  ;;  %v3256_v10 = vld [vmem:[%s5683_s6 + $0x34] sm:$0xf0] }
 0x294   :  { %v2924_v11 = vor.u32 %v3288_v60, %v2923_v59  ;;  %v2988_v13 = vor.u32 %v3304_v62, %v2987_v61  ;;  %v2915_v14 = vld [vmem:[%s5683_s6 + $0x120] sm:$0xf]  ;;  %v3083_v3 = vld [vmem:[%s5683_s6 + $0x270] sm:$0xf]  ;;  %v2885_v59 = vld [vmem:[%s5683_s6 + $0xe8] sm:$0xf0]  ;;  %v2844_v60 = vor.u32 %v3268_v20, %v2843_v55  ;;  %v2772_v61 = vor.u32 %v3250_v24, %v2771_v56 }
 0x295   :  { %1253 = vmatpush.msra.mxu0 %v4607_v17  ;;  %1276 = vmatpush.msra.mxu1 %v4609_v9  ;;  %v2916_v26 = vor.u32 %v3286_v15, %v2915_v14  ;;  %v2835_v62 = vld [vmem:[%s5683_s6 + $0x80] sm:$0xf]  ;;  %v3147_v7 = vld [vmem:[%s5683_s6 + $0x2f0] sm:$0xf]  ;;  %v3344_v8 = vld [vmem:[%s5683_s6 + $0x2f4] sm:$0xf0] }
 0x296   :  { %1299 = vmatpush.msra.mxu2 %v4607_v17  ;;  %1322 = vmatpush.msra.mxu3 %v4609_v9  ;;  %v2877_v14 = vld [vmem:[%s5683_s6 + $0xd8] sm:$0xf0]  ;;  %v3123_v47 = vld [vmem:[%s5683_s6 + $0x2c0] sm:$0xf]  ;;  %v3338_v48 = vld [vmem:[%s5683_s6 + $0x2c4] sm:$0xf0] }
 0x297   :  { %1254 = vmatpush.msra.mxu0 %v4619_v12  ;;  %1277 = vmatpush.msra.mxu1 %v4621_v18  ;;  %v3320_v55 = vld [vmem:[%s5683_s6 + $0x234] sm:$0xf0]  ;;  %v2789_v20 = vld [vmem:[%s5683_s6 + $0x28] sm:$0xf0]  ;;  %v3269_v56 = vld [vmem:[%s5683_s6 + $0xa4] sm:$0xf] }
 0x298   :  { %1300 = vmatpush.msra.mxu2 %v4619_v12  ;;  %1323 = vmatpush.msra.mxu3 %v4621_v18  ;;  %v2853_v24 = vld [vmem:[%s5683_s6 + $0xa8] sm:$0xf0] }
 0x299   :  { %2761 = vmatmul.msk.f32.vlgmr.msra.gmra.mxu0 %vm41_vm0, %v3353_v27  ;;  %2763 = vmatmul.msk.f32.vlgmr.msra.gmra.mxu1 %vm41_vm0, %v3353_v27  ;;  %v2980_v27 = vor.u32 %v3302_v6, %v2979_v16  ;;  %v3148_v16 = vor.u32 %v3344_v8, %v3147_v7  ;;  %v3265_v7 = vld [vmem:[%s5683_s6 + $0x84] sm:$0xf]  ;;  %v2837_v8 = vld [vmem:[%s5683_s6 + $0x88] sm:$0xf0] }
 0x29a   :  { %1941 = vmatpush.bf16.msrb.mxu2 %v2956_v19  ;;  %1955 = vmatpush.bf16.msrb.mxu3 %v3020_v21  ;;  %v2796_v19 = vor.u32 %v3256_v10, %v2795_v53  ;;  %v2859_v21 = vld [vmem:[%s5683_s6 + $0xb0] sm:$0xf]  ;;  %v4871_v53 = vpack.c.bf16 %v4609_v9, %v4621_v18  ;;  %v2813_v9 = vld [vmem:[%s5683_s6 + $0x58] sm:$0xf0]  ;;  %v3275_v18 = vld [vmem:[%s5683_s6 + $0xd4] sm:$0xf] }
 0x29b   :  { %2765 = vmatmul.msk.f32.vlgmr.msra.gmra.mxu2 %vm41_vm0, %v3354_v44  ;;  %2767 = vmatmul.msk.f32.vlgmr.msra.gmra.mxu3 %vm41_vm0, %v3354_v44  ;;  %v3282_v44 = vld [vmem:[%s5683_s6 + $0x104] sm:$0xf0] }
 0x29c   :  { %1913 = vmatpush.bf16.msrb.mxu0 %v2828_v37  ;;  %1927 = vmatpush.bf16.msrb.mxu1 %v2892_v45  ;;  %v2851_v37 = vld [vmem:[%s5683_s6 + $0xa0] sm:$0xf] }
 0x29d   :  { %v2963_v45 = vld [vmem:[%s5683_s6 + $0x180] sm:$0xf] }
 0x29e   :  { %1942 = vmatpush.bf16.msrb.mxu2 %v2948_v34  ;;  %1956 = vmatpush.bf16.msrb.mxu3 %v3012_v35  ;;  %v2860_v34 = vor.u32 %v3272_v22, %v2859_v21  ;;  %v2788_v35 = vor.u32 %v3254_v25, %v2787_v23  ;;  %v2880_v22 = vor.u32 %v3275_v18, %v2877_v14  ;;  %v3257_v23 = vld [vmem:[%s5683_s6 + $0x44] sm:$0xf]  ;;  %v3067_v25 = vld [vmem:[%s5683_s6 + $0x250] sm:$0xf] }
 0x2a0   :  { %1914 = vmatpush.bf16.msrb.mxu0 %v2820_v46  ;;  %1928 = vmatpush.bf16.msrb.mxu1 %v2884_v57  ;;  %v3298_v46 = vld [vmem:[%s5683_s6 + $0x184] sm:$0xf0]  ;;  %v2900_v57 = vor.u32 %v3282_v44, %v2899_v43  ;;  %v3271_v43 = vld [vmem:[%s5683_s6 + $0xb4] sm:$0xf]  ;;  %v2861_v44 = vld [vmem:[%s5683_s6 + $0xb8] sm:$0xf0] }
 0x2a1   :  { %2762 = vmatmul.msk.f32.gmra.mxu0 %vm41_vm0, %v3355_v2  ;;  %2764 = vmatmul.msk.f32.gmra.mxu1 %vm41_vm0, %v3355_v2  ;;  %v2896_v2 = vor.u32 %v3279_v49, %v2893_v50  ;;  %v2864_v50 = vor.u32 %v3271_v43, %v2861_v44  ;;  %v3321_v44 = vld [vmem:[%s5683_s6 + $0x244] sm:$0xf] }
 0x2a2   :  { %1943 = vmatpush.bf16.msrb.mxu2 %v2940_v51  ;;  %1957 = vmatpush.bf16.msrb.mxu3 %v3004_v52  ;;  %v2852_v51 = vor.u32 %v3270_v38, %v2851_v37  ;;  %v2780_v52 = vor.u32 %v3252_v40, %v2779_v39  ;;  %v2872_v38 = vor.u32 %v3273_v29, %v2869_v30  ;;  %v3255_v39 = vld [vmem:[%s5683_s6 + $0x34] sm:$0xf]  ;;  %v3059_v40 = vld [vmem:[%s5683_s6 + $0x240] sm:$0xf]  ;;  %v3069_v30 = vld [vmem:[%s5683_s6 + $0x258] sm:$0xf0] }
 0x2a3   :  { %2766 = vmatmul.msk.f32.gmra.mxu2 %vm41_vm0, %v3356_v63  ;;  %2768 = vmatmul.msk.f32.gmra.mxu3 %vm41_vm0, %v3356_v63  ;;  %v3266_v63 = vld [vmem:[%s5683_s6 + $0x84] sm:$0xf0]  ;;  %v3323_v29 = vld [vmem:[%s5683_s6 + $0x254] sm:$0xf] }
 0x2a4   :  { %1915 = vmatpush.bf16.msrb.mxu0 %v2812_v0  ;;  %1929 = vmatpush.bf16.msrb.mxu1 %v2876_v4  ;;  %v2964_v0 = vor.u32 %v3298_v46, %v2963_v45  ;;  %v4861_v4 = vpack.c.bf16 %v4607_v17, %v4619_v12  ;;  %v3259_v17 = vld [vmem:[%s5683_s6 + $0x54] sm:$0xf]  ;;  %v3075_v12 = vld [vmem:[%s5683_s6 + $0x260] sm:$0xf]  ;;  %v2836_v15 = vor.u32 %v3266_v63, %v2835_v62  ;;  %v3249_v63 = vld [vmem:[%s5683_s6 + $0x4] sm:$0xf] }
 0x2a5   :  { %v2816_v21 = vor.u32 %v3259_v17, %v2813_v9  ;;  %v3343_v17 = vld [vmem:[%s5683_s6 + $0x2f4] sm:$0xf]  ;;  %v2840_v9 = vor.u32 %v3265_v7, %v2837_v8 }
 0x2a6   :  { %1944 = vmatpush.bf16.msrb.mxu2 %v2932_v58  ;;  %1958 = vmatpush.bf16.msrb.mxu3 %v2996_v36  ;;  %v2821_v58 = vld [vmem:[%s5683_s6 + $0x68] sm:$0xf0]  ;;  %v3277_v36 = vld [vmem:[%s5683_s6 + $0xe4] sm:$0xf] }
 0x2a7   :  { %v2824_v10 = vor.u32 %v3261_v1, %v2821_v58  ;;  %v2781_v58 = vld [vmem:[%s5683_s6 + $0x18] sm:$0xf0] }
 0x2a8   :  { %1916 = vmatpush.bf16.msrb.mxu0 %v2804_v5  ;;  %1930 = vmatpush.bf16.msrb.mxu1 %v2868_v54  ;;  %v3084_v5 = vor.u32 %v3328_v32, %v3083_v3  ;;  %v3139_v54 = vld [vmem:[%s5683_s6 + $0x2e0] sm:$0xf]  ;;  %v2856_v3 = vor.u32 %v3269_v56, %v2853_v24  ;;  %v3251_v32 = vld [vmem:[%s5683_s6 + $0x14] sm:$0xf] }
 0x2a9   :  { %v3319_v24 = vld [vmem:[%s5683_s6 + $0x234] sm:$0xf] }
 0x2aa   :  { %1945 = vmatpush.bf16.msrb.mxu2 %v2924_v11  ;;  %1959 = vmatpush.bf16.msrb.mxu3 %v2988_v13  ;;  %v2888_v11 = vor.u32 %v3277_v36, %v2885_v59  ;;  %v3326_v13 = vld [vmem:[%s5683_s6 + $0x264] sm:$0xf0]  ;;  %v3267_v36 = vld [vmem:[%s5683_s6 + $0x94] sm:$0xf]  ;;  %v2845_v59 = vld [vmem:[%s5683_s6 + $0x98] sm:$0xf0] }
 0x2ab   :  { %v3076_v6 = vor.u32 %v3326_v13, %v3075_v12  ;;  %v2848_v62 = vor.u32 %v3267_v36, %v2845_v59  ;;  %v3149_v12 = vld [vmem:[%s5683_s6 + $0x2f8] sm:$0xf0]  ;;  %v3109_v36 = vld [vmem:[%s5683_s6 + $0x2a8] sm:$0xf0] }
 0x2ac   :  { %1917 = vmatpush.bf16.msrb.mxu0 %v2796_v19  ;;  %1931 = vmatpush.bf16.msrb.mxu1 %v2860_v34  ;;  %v3342_v19 = vld [vmem:[%s5683_s6 + $0x2e4] sm:$0xf0]  ;;  %v3131_v34 = vld [vmem:[%s5683_s6 + $0x2d0] sm:$0xf]  ;;  %v3152_v14 = vor.u32 %v3343_v17, %v3149_v12  ;;  %v3329_v17 = vld [vmem:[%s5683_s6 + $0x284] sm:$0xf] }
 0x2ad   :  { %v3140_v31 = vor.u32 %v3342_v19, %v3139_v54  ;;  %v3141_v19 = vld [vmem:[%s5683_s6 + $0x2e8] sm:$0xf0] }
 0x2ae   :  { %1946 = vmatpush.bf16.msrb.mxu2 %v2916_v26  ;;  %1960 = vmatpush.bf16.msrb.mxu3 %v2980_v27  ;;  %v3324_v26 = vld [vmem:[%s5683_s6 + $0x254] sm:$0xf0]  ;;  %v2805_v27 = vld [vmem:[%s5683_s6 + $0x48] sm:$0xf0] }
 0x2af   :  { %v3068_v33 = vor.u32 %v3324_v26, %v3067_v25  ;;  %v2808_v37 = vor.u32 %v3257_v23, %v2805_v27  ;;  %v3318_v23 = vld [vmem:[%s5683_s6 + $0x224] sm:$0xf0]  ;;  %v3107_v25 = vld [vmem:[%s5683_s6 + $0x2a0] sm:$0xf]  ;;  %v3093_v12 = vld [vmem:[%s5683_s6 + $0x288] sm:$0xf0] }
 0x2b0   :  { %1918 = vmatpush.bf16.msrb.mxu0 %v2788_v35  ;;  %1932 = vmatpush.bf16.msrb.mxu1 %v2852_v51  ;;  %v3340_v35 = vld [vmem:[%s5683_s6 + $0x2d4] sm:$0xf0]  ;;  %v3253_v51 = vld [vmem:[%s5683_s6 + $0x24] sm:$0xf]  ;;  %v3334_v27 = vld [vmem:[%s5683_s6 + $0x2a4] sm:$0xf0] }
 0x2b1   :  { %v3132_v45 = vor.u32 %v3340_v35, %v3131_v34  ;;  %v2792_v1 = vor.u32 %v3253_v51, %v2789_v20  ;;  %v3339_v34 = vld [vmem:[%s5683_s6 + $0x2d4] sm:$0xf]  ;;  %v3133_v35 = vld [vmem:[%s5683_s6 + $0x2d8] sm:$0xf0]  ;;  %v3314_v51 = vld [vmem:[%s5683_s6 + $0x204] sm:$0xf0] }
 0x2b2   :  { %1947 = vmatpush.bf16.msrb.mxu2 %v2908_v41  ;;  %1961 = vmatpush.bf16.msrb.mxu3 %v2972_v42  ;;  %v3322_v41 = vld [vmem:[%s5683_s6 + $0x244] sm:$0xf0]  ;;  %v2797_v42 = vld [vmem:[%s5683_s6 + $0x38] sm:$0xf0] }
 0x2b3   :  { %v3060_v46 = vor.u32 %v3322_v41, %v3059_v40  ;;  %v2800_v49 = vor.u32 %v3255_v39, %v2797_v42  ;;  %v3316_v39 = vld [vmem:[%s5683_s6 + $0x214] sm:$0xf0]  ;;  %v3099_v40 = vld [vmem:[%s5683_s6 + $0x290] sm:$0xf]  ;;  %v3330_v20 = vld [vmem:[%s5683_s6 + $0x284] sm:$0xf0] }
 0x2b4   :  { %1919 = vmatpush.bf16.msrb.mxu0 %v2780_v52  ;;  %1933 = vmatpush.bf16.msrb.mxu1 %v2844_v60  ;;  %v3051_v52 = vld [vmem:[%s5683_s6 + $0x230] sm:$0xf]  ;;  %v3332_v41 = vld [vmem:[%s5683_s6 + $0x294] sm:$0xf0] }
 0x2b5   :  { %v3100_v43 = vor.u32 %v3332_v41, %v3099_v40  ;;  %v3307_v40 = vld [vmem:[%s5683_s6 + $0x1d4] sm:$0xf]  ;;  %v3005_v41 = vld [vmem:[%s5683_s6 + $0x1d8] sm:$0xf0] }
 0x2b6   :  { %1948 = vmatpush.bf16.msrb.mxu2 %v2900_v57  ;;  %1962 = vmatpush.bf16.msrb.mxu3 %v2964_v0  ;;  %v3124_v57 = vor.u32 %v3338_v48, %v3123_v47  ;;  %v3052_v0 = vor.u32 %v3320_v55, %v3051_v52  ;;  %v3125_v48 = vld [vmem:[%s5683_s6 + $0x2c8] sm:$0xf0]  ;;  %v3091_v52 = vld [vmem:[%s5683_s6 + $0x280] sm:$0xf] }
 0x2b7   :  { %v3092_v56 = vor.u32 %v3330_v20, %v3091_v52  ;;  %v5202_v52 = vld [vmem:[%s5680_s9 + $0xd8] sm:$0xff]  ;;  %v5214_v20 = vld [vmem:[%s5680_s9 + $0xc8] sm:$0xff] }
 0x2b8   :  { %1920 = vmatpush.bf16.msrb.mxu0 %v2772_v61  ;;  %1934 = vmatpush.bf16.msrb.mxu1 %v2836_v15  ;;  %v2784_v61 = vor.u32 %v3251_v32, %v2781_v58  ;;  %v3325_v15 = vld [vmem:[%s5683_s6 + $0x264] sm:$0xf]  ;;  %v3045_v32 = vld [vmem:[%s5683_s6 + $0x228] sm:$0xf0] }
 0x2b9   :  { %1949 = vmatmul.bf16.vlgmr.msrb.gmra.mxu2 %v4861_v4  ;;  %1963 = vmatmul.bf16.vlgmr.msrb.gmra.mxu3 %v4871_v53  ;;  %v3333_v58 = vld [vmem:[%s5683_s6 + $0x2a4] sm:$0xf] }
 0x2ba   :  { %1997 = vmatpush.bf16.msra.mxu2 %v2832_v28  ;;  %2011 = vmatpush.bf16.msra.mxu3 %v2896_v2  ;;  %v3115_v28 = vld [vmem:[%s5683_s6 + $0x2b0] sm:$0xf]  ;;  %v3336_v2 = vld [vmem:[%s5683_s6 + $0x2b4] sm:$0xf0] }
 0x2bb   :  { %v3116_v60 = vor.u32 %v3336_v2, %v3115_v28  ;;  %v3117_v28 = vld [vmem:[%s5683_s6 + $0x2b8] sm:$0xf0] }
 0x2bc   :  { %1969 = vmatpush.bf16.msra.mxu0 %v3084_v5  ;;  %1983 = vmatpush.bf16.msra.mxu1 %v3148_v16  ;;  %v2773_v5 = vld [vmem:[%s5683_s6 + $0x8] sm:$0xf0] }
 0x2bd   :  { %v2776_v13 = vor.u32 %v3249_v63, %v2773_v5  ;;  %v3077_v16 = vld [vmem:[%s5683_s6 + $0x268] sm:$0xf0]  ;;  %v3331_v63 = vld [vmem:[%s5683_s6 + $0x294] sm:$0xf]  ;;  %v3101_v5 = vld [vmem:[%s5683_s6 + $0x298] sm:$0xf0] }
 0x2be   :  { %1998 = vmatpush.bf16.msra.mxu2 %v2824_v10  ;;  %2012 = vmatpush.bf16.msra.mxu3 %v2888_v11  ;;  %v3327_v10 = vld [vmem:[%s5683_s6 + $0x274] sm:$0xf]  ;;  %v3085_v11 = vld [vmem:[%s5683_s6 + $0x278] sm:$0xf0]  ;;  %v3080_v54 = vor.u32 %v3325_v15, %v3077_v16  ;;  %v3104_v8 = vor.u32 %v3331_v63, %v3101_v5 }
 0x2bf   :  { %v3088_v18 = vor.u32 %v3327_v10, %v3085_v11  ;;  %v3313_v10 = vld [vmem:[%s5683_s6 + $0x204] sm:$0xf]  ;;  %v3029_v11 = vld [vmem:[%s5683_s6 + $0x208] sm:$0xf0]  ;;  %v3295_v15 = vld [vmem:[%s5683_s6 + $0x174] sm:$0xf] }
 0x2c0   :  { %1970 = vmatpush.bf16.msra.mxu0 %v3076_v6  ;;  %1984 = vmatpush.bf16.msra.mxu1 %v3140_v31  ;;  %v3341_v6 = vld [vmem:[%s5683_s6 + $0x2e4] sm:$0xf]  ;;  %v3108_v31 = vor.u32 %v3334_v27, %v3107_v25  ;;  %v2957_v16 = vld [vmem:[%s5683_s6 + $0x178] sm:$0xf0] }
 0x2c1   :  { %v2960_v25 = vor.u32 %v3295_v15, %v2957_v16  ;;  %v3293_v27 = vld [vmem:[%s5683_s6 + $0x164] sm:$0xf]  ;;  %v3299_v15 = vld [vmem:[%s5683_s6 + $0x194] sm:$0xf]  ;;  %v2973_v16 = vld [vmem:[%s5683_s6 + $0x198] sm:$0xf0] }
 0x2c2   :  { %1999 = vmatpush.bf16.msra.mxu2 %v2816_v21  ;;  %2013 = vmatpush.bf16.msra.mxu3 %v2880_v22  ;;  %v3144_v21 = vor.u32 %v3341_v6, %v3141_v19  ;;  %v3043_v22 = vld [vmem:[%s5683_s6 + $0x220] sm:$0xf]  ;;  %v3311_v6 = vld [vmem:[%s5683_s6 + $0x1f4] sm:$0xf] }
 0x2c3   :  { %v3044_v26 = vor.u32 %v3318_v23, %v3043_v22 }
 0x2c4   :  { %1971 = vmatpush.bf16.msra.mxu0 %v3068_v33  ;;  %1985 = vmatpush.bf16.msra.mxu1 %v3132_v45  ;;  %v3072_v33 = vor.u32 %v3323_v29, %v3069_v30  ;;  %v3061_v45 = vld [vmem:[%s5683_s6 + $0x248] sm:$0xf0]  ;;  %v3309_v30 = vld [vmem:[%s5683_s6 + $0x1e4] sm:$0xf] }
 0x2c5   :  { %v3064_v47 = vor.u32 %v3321_v44, %v3061_v45  ;;  %v2949_v29 = vld [vmem:[%s5683_s6 + $0x168] sm:$0xf0] }
 0x2c6   :  { %2000 = vmatpush.bf16.msra.mxu2 %v2808_v37  ;;  %2014 = vmatpush.bf16.msra.mxu3 %v2872_v38  ;;  %v3035_v37 = vld [vmem:[%s5683_s6 + $0x210] sm:$0xf]  ;;  %v3136_v38 = vor.u32 %v3339_v34, %v3133_v35  ;;  %v2952_v35 = vor.u32 %v3293_v27, %v2949_v29  ;;  %v5178_v44 = vld [vmem:[%s5680_s9 + $0xe8] sm:$0xff]  ;;  %v3297_v27 = vld [vmem:[%s5683_s6 + $0x184] sm:$0xf] }
 0x2c7   :  { %v3036_v42 = vor.u32 %v3316_v39, %v3035_v37  ;;  %v2941_v39 = vld [vmem:[%s5683_s6 + $0x158] sm:$0xf0]  ;;  %v5184_v45 = vld [vmem:[%s5680_s9 + $0x1e8] sm:$0xff] }
 0x2c8   :  { %1972 = vmatpush.bf16.msra.mxu0 %v3060_v46  ;;  %1986 = vmatpush.bf16.msra.mxu1 %v3124_v57  ;;  %v3337_v46 = vld [vmem:[%s5683_s6 + $0x2c4] sm:$0xf]  ;;  %v3053_v57 = vld [vmem:[%s5683_s6 + $0x238] sm:$0xf0]  ;;  %v2965_v29 = vld [vmem:[%s5683_s6 + $0x188] sm:$0xf0] }
 0x2c9   :  { %v3056_v2 = vor.u32 %v3319_v24, %v3053_v57 }
 0x2ca   :  { %2001 = vmatpush.bf16.msra.mxu2 %v2800_v49  ;;  %2015 = vmatpush.bf16.msra.mxu3 %v2864_v50  ;;  %v3128_v49 = vor.u32 %v3337_v46, %v3125_v48  ;;  %v3027_v50 = vld [vmem:[%s5683_s6 + $0x200] sm:$0xf]  ;;  %v3289_v48 = vld [vmem:[%s5683_s6 + $0x144] sm:$0xf] }
 0x2cb   :  { %v3028_v55 = vor.u32 %v3314_v51, %v3027_v50  ;;  %v3305_v50 = vld [vmem:[%s5683_s6 + $0x1c4] sm:$0xf]  ;;  %v2997_v51 = vld [vmem:[%s5683_s6 + $0x1c8] sm:$0xf0] }
 0x2cc   :  { %1973 = vmatpush.bf16.msra.mxu0 %v3052_v0  ;;  %1987 = vmatpush.bf16.msra.mxu1 %v3116_v60  ;;  %v3335_v0 = vld [vmem:[%s5683_s6 + $0x2b4] sm:$0xf]  ;;  %v3112_v60 = vor.u32 %v3333_v58, %v3109_v36  ;;  %v3000_v57 = vor.u32 %v3305_v50, %v2997_v51  ;;  %v5238_v58 = vld [vmem:[%s5680_s9 + $0xb8] sm:$0xff]  ;;  %v5408_v50 = vld [vmem:[%s5680_s9 + $0xe0] sm:$0xff] }
 0x2cd   :  { %v5244_v36 = vld [vmem:[%s5680_s9 + $0x1b8] sm:$0xff]  ;;  %v5414_v51 = vld [vmem:[%s5680_s9 + $0x1e0] sm:$0xff] }
 0x2ce   :  { %2002 = vmatpush.bf16.msra.mxu2 %v2792_v1  ;;  %2016 = vmatpush.bf16.msra.mxu3 %v2856_v3  ;;  %v3120_v1 = vor.u32 %v3335_v0, %v3117_v28  ;;  %v3317_v3 = vld [vmem:[%s5683_s6 + $0x224] sm:$0xf]  ;;  %v3287_v0 = vld [vmem:[%s5683_s6 + $0x134] sm:$0xf]  ;;  %v2925_v28 = vld [vmem:[%s5683_s6 + $0x138] sm:$0xf0] }
 0x2cf   :  { %v3048_v59 = vor.u32 %v3317_v3, %v3045_v32  ;;  %v3303_v3 = vld [vmem:[%s5683_s6 + $0x1b4] sm:$0xf]  ;;  %v2989_v32 = vld [vmem:[%s5683_s6 + $0x1b8] sm:$0xf0] }
 0x2d0   :  { %1974 = vmatpush.bf16.msra.mxu0 %v3044_v26  ;;  %1988 = vmatpush.bf16.msra.mxu1 %v3108_v31  ;;  %v3013_v31 = vld [vmem:[%s5683_s6 + $0x1e8] sm:$0xf0]  ;;  %v2992_v5 = vor.u32 %v3303_v3, %v2989_v32  ;;  %v5470_v3 = vld [vmem:[%s5680_s9 + $0xb0] sm:$0xff] }
 0x2d1   :  { %v3016_v37 = vor.u32 %v3309_v30, %v3013_v31  ;;  %v5334_v30 = vld [vmem:[%s5680_s9 + $0x68] sm:$0xff]  ;;  %v5476_v32 = vld [vmem:[%s5680_s9 + $0x1b0] sm:$0xff] }
 0x2d2   :  { %2003 = vmatpush.bf16.msra.mxu2 %v2784_v61  ;;  %2017 = vmatpush.bf16.msra.mxu3 %v2848_v62  ;;  %v3315_v61 = vld [vmem:[%s5683_s6 + $0x214] sm:$0xf]  ;;  %v3037_v62 = vld [vmem:[%s5683_s6 + $0x218] sm:$0xf0]  ;;  %v5340_v31 = vld [vmem:[%s5680_s9 + $0x168] sm:$0xff] }
 0x2d3   :  { %v3040_v7 = vor.u32 %v3315_v61, %v3037_v62  ;;  %v5256_v61 = vld [vmem:[%s5680_s9 + $0x1a8] sm:$0xff] }
 0x2d4   :  { %1975 = vmatpush.bf16.msra.mxu0 %v3036_v42  ;;  %1989 = vmatpush.bf16.msra.mxu1 %v3100_v43  ;;  %v5166_v42 = vld [vmem:[%s5680_s9 + $0xf8] sm:$0xff] }
 0x2d5   :  { %v5172_v43 = vld [vmem:[%s5680_s9 + $0x1f8] sm:$0xff] }
 0x2d6   :  { %2004 = vmatpush.bf16.msra.mxu2 %v2776_v13  ;;  %2018 = vmatpush.bf16.msra.mxu3 %v2840_v9  ;;  %v3032_v13 = vor.u32 %v3313_v10, %v3029_v11  ;;  %v3096_v9 = vor.u32 %v3329_v17, %v3093_v12  ;;  %v3301_v10 = vld [vmem:[%s5683_s6 + $0x1a4] sm:$0xf]  ;;  %v2981_v11 = vld [vmem:[%s5683_s6 + $0x1a8] sm:$0xf0]  ;;  %v5274_v17 = vld [vmem:[%s5680_s9 + $0x98] sm:$0xff] }
 0x2d7   :  { %v5280_v12 = vld [vmem:[%s5680_s9 + $0x198] sm:$0xff] }
 0x2d8   :  { %1976 = vmatpush.bf16.msra.mxu0 %v3028_v55  ;;  %1990 = vmatpush.bf16.msra.mxu1 %v3092_v56  ;;  %v5208_v55 = vld [vmem:[%s5680_s9 + $0x1d8] sm:$0xff]  ;;  %v5220_v56 = vld [vmem:[%s5680_s9 + $0x1c8] sm:$0xff] }
 0x2da   :  { %2053 = vmatpush.bf16.msrb.mxu2 %v3088_v18  ;;  %2067 = vmatpush.bf16.msrb.mxu3 %v3152_v14 }
 0x2de   :  { %2054 = vmatpush.bf16.msrb.mxu2 %v3080_v54  ;;  %2068 = vmatpush.bf16.msrb.mxu3 %v3144_v21  ;;  %v3021_v54 = vld [vmem:[%s5683_s6 + $0x1f8] sm:$0xf0] }
 0x2df   :  { %v3024_v26 = vor.u32 %v3311_v6, %v3021_v54  ;;  %v5298_v6 = vld [vmem:[%s5680_s9 + $0x88] sm:$0xff] }
 0x2e0   :  { %v5304_v54 = vld [vmem:[%s5680_s9 + $0x188] sm:$0xff] }
 0x2e2   :  { %2055 = vmatpush.bf16.msrb.mxu2 %v3072_v33  ;;  %2069 = vmatpush.bf16.msrb.mxu3 %v3136_v38  ;;  %v3291_v38 = vld [vmem:[%s5683_s6 + $0x154] sm:$0xf] }
 0x2e3   :  { %v2944_v46 = vor.u32 %v3291_v38, %v2941_v39  ;;  %v5358_v38 = vld [vmem:[%s5680_s9 + $0x48] sm:$0xff] }
 0x2e4   :  { %v5364_v39 = vld [vmem:[%s5680_s9 + $0x148] sm:$0xff] }
 0x2e6   :  { %2056 = vmatpush.bf16.msrb.mxu2 %v3064_v47  ;;  %2070 = vmatpush.bf16.msrb.mxu3 %v3128_v49  ;;  %v3008_v47 = vor.u32 %v3307_v40, %v3005_v41  ;;  %v2933_v49 = vld [vmem:[%s5683_s6 + $0x148] sm:$0xf0]  ;;  %v5370_v40 = vld [vmem:[%s5680_s9 + $0x38] sm:$0xff] }
 0x2e7   :  { %v2936_v24 = vor.u32 %v3289_v48, %v2933_v49  ;;  %v5376_v41 = vld [vmem:[%s5680_s9 + $0x138] sm:$0xff]  ;;  %v5394_v48 = vld [vmem:[%s5680_s9 + $0x28] sm:$0xff] }
 0x2e8   :  { %v5400_v49 = vld [vmem:[%s5680_s9 + $0x128] sm:$0xff] }
 0x2ea   :  { %2057 = vmatpush.bf16.msrb.mxu2 %v3056_v2  ;;  %2071 = vmatpush.bf16.msrb.mxu3 %v3120_v1 }
 0x2ee   :  { %2058 = vmatpush.bf16.msrb.mxu2 %v3048_v59  ;;  %2072 = vmatpush.bf16.msrb.mxu3 %v3112_v60  ;;  %v2928_v59 = vor.u32 %v3287_v0, %v2925_v28  ;;  %v5250_v60 = vld [vmem:[%s5680_s9 + $0xa8] sm:$0xff] }
 0x2ef   :  { %v5444_v0 = vld [vmem:[%s5680_s9 + $0x8] sm:$0xff] }
 0x2f0   :  { %v5450_v28 = vld [vmem:[%s5680_s9 + $0x108] sm:$0xff] }
 0x2f2   :  { %2059 = vmatpush.bf16.msrb.mxu2 %v3040_v7  ;;  %2073 = vmatpush.bf16.msrb.mxu3 %v3104_v8  ;;  %v3285_v7 = vld [vmem:[%s5683_s6 + $0x124] sm:$0xf]  ;;  %v2917_v8 = vld [vmem:[%s5683_s6 + $0x128] sm:$0xf0] }
 0x2f6   :  { %2060 = vmatpush.bf16.msrb.mxu2 %v3032_v13  ;;  %2074 = vmatpush.bf16.msrb.mxu3 %v3096_v9  ;;  %v2920_v13 = vor.u32 %v3285_v7, %v2917_v8  ;;  %v2984_v9 = vor.u32 %v3301_v10, %v2981_v11  ;;  %v3415_v7 = vld [vmem:[%s5680_s9 + $0x20] sm:$0xff]  ;;  %v3417_v10 = vld [vmem:[%s5680_s9 + $0x10] sm:$0xff] }
 0x2f7   :  { %v3416_v8 = vld [vmem:[%s5680_s9 + $0x120] sm:$0xff]  ;;  %v3418_v11 = vld [vmem:[%s5680_s9 + $0x110] sm:$0xff] }
 0x316   :  { %v1256_v18 = vpop.f32.mrf.mxu0  ;;  %v1279_v14 = vpop.f32.mrf.mxu1 }
 0x31e   :  { %v1259_v19 = vpop.f32.mrf.mxu0  ;;  %v1282_v21 = vpop.f32.mrf.mxu1 }
 0x31f   :  { %v1331_v22 = vpack.c.bf16 %v1259_v19, %v1256_v18  ;;  %v1332_v23 = vpack.c.bf16 %v1282_v21, %v1279_v14  ;;  %v1302_v33 = vpop.f32.mrf.mxu2  ;;  %v1325_v34 = vpop.f32.mrf.mxu3  ;;  %v3283_v18 = vld [vmem:[%s5683_s6 + $0x114] sm:$0xf]  ;;  %v2909_v14 = vld [vmem:[%s5683_s6 + $0x118] sm:$0xf0] }
 0x320   :  { %v5310_v19 = vld [vmem:[%s5680_s9 + $0x78] sm:$0xff] }
 0x321   :  { %1921 = vmatmul.bf16.vlgmr.msrb.gmra.mxu0 %v1331_v22  ;;  %1935 = vmatmul.bf16.vlgmr.msrb.gmra.mxu1 %v1332_v23  ;;  %v5316_v21 = vld [vmem:[%s5680_s9 + $0x178] sm:$0xff] }
 0x322   :  { %2005 = vmatmul.bf16.vlgmr.msra.gmra.mxu2 %v1331_v22  ;;  %2019 = vmatmul.bf16.vlgmr.msra.gmra.mxu3 %v1332_v23  ;;  %v2912_v22 = vor.u32 %v3283_v18, %v2909_v14  ;;  %v2976_v23 = vor.u32 %v3299_v15, %v2973_v16 }
 0x323   :  { %2025 = vmatpush.bf16.msrb.mxu0 %v2960_v25  ;;  %2039 = vmatpush.bf16.msrb.mxu1 %v3024_v26  ;;  %v3281_v25 = vld [vmem:[%s5683_s6 + $0x104] sm:$0xf]  ;;  %v2901_v26 = vld [vmem:[%s5683_s6 + $0x108] sm:$0xf0] }
 0x324   :  { %2127 = vmatpush.msra.mxu2 %v5166_v42  ;;  %2150 = vmatpush.msra.mxu3 %v5172_v43 }
 0x326   :  { %2128 = vmatpush.msra.mxu2 %v5178_v44  ;;  %2151 = vmatpush.msra.mxu3 %v5184_v45 }
 0x327   :  { %2026 = vmatpush.bf16.msrb.mxu0 %v2952_v35  ;;  %2040 = vmatpush.bf16.msrb.mxu1 %v3016_v37  ;;  %v1305_v2 = vpop.f32.mrf.mxu2  ;;  %v1328_v1 = vpop.f32.mrf.mxu3  ;;  %v2904_v35 = vor.u32 %v3281_v25, %v2901_v26  ;;  %v2968_v37 = vor.u32 %v3297_v27, %v2965_v29 }
 0x328   :  { %2129 = vmatpush.msra.mxu2 %v5202_v52  ;;  %2152 = vmatpush.msra.mxu3 %v5208_v55  ;;  %v1335_v62 = vpack.c.bf16 %v1305_v2, %v1302_v33  ;;  %v1336_v63 = vpack.c.bf16 %v1328_v1, %v1325_v34  ;;  %v5346_v33 = vld [vmem:[%s5680_s9 + $0x58] sm:$0xff]  ;;  %v5456_v2 = vld [vmem:[%s5680_s9 + $0xc0] sm:$0xff] }
 0x329   :  { %v5352_v34 = vld [vmem:[%s5680_s9 + $0x158] sm:$0xff]  ;;  %v5462_v1 = vld [vmem:[%s5680_s9 + $0x1c0] sm:$0xff] }
 0x32a   :  { %2130 = vmatpush.msra.mxu2 %v5214_v20  ;;  %2153 = vmatpush.msra.mxu3 %v5220_v56 }
 0x32b   :  { %2027 = vmatpush.bf16.msrb.mxu0 %v2944_v46  ;;  %2041 = vmatpush.bf16.msrb.mxu1 %v3008_v47  ;;  %v5382_v46 = vld [vmem:[%s5680_s9 + $0xf0] sm:$0xff] }
 0x32c   :  { %2131 = vmatpush.msra.mxu2 %v5238_v58  ;;  %2154 = vmatpush.msra.mxu3 %v5244_v36  ;;  %v5388_v47 = vld [vmem:[%s5680_s9 + $0x1f0] sm:$0xff] }
 0x32e   :  { %2132 = vmatpush.msra.mxu2 %v5250_v60  ;;  %2155 = vmatpush.msra.mxu3 %v5256_v61 }
 0x32f   :  { %2028 = vmatpush.bf16.msrb.mxu0 %v2936_v24  ;;  %2042 = vmatpush.bf16.msrb.mxu1 %v3000_v57  ;;  %v5432_v24 = vld [vmem:[%s5680_s9 + $0xd0] sm:$0xff] }
 0x330   :  { %2133 = vmatpush.msra.mxu2 %v5274_v17  ;;  %2156 = vmatpush.msra.mxu3 %v5280_v12  ;;  %v5438_v57 = vld [vmem:[%s5680_s9 + $0x1d0] sm:$0xff] }
 0x331   :  { %1977 = vmatmul.bf16.vlgmr.msra.gmra.mxu0 %v1335_v62  ;;  %1991 = vmatmul.bf16.vlgmr.msra.gmra.mxu1 %v1336_v63 }
 0x332   :  { %2061 = vmatmul.bf16.vlgmr.msrb.gmra.mxu2 %v1335_v62  ;;  %2075 = vmatmul.bf16.vlgmr.msrb.gmra.mxu3 %v1336_v63  ;;  %v3412_v62 = vld [vmem:[%s5680_s9 + $0x140] sm:$0xff]  ;;  %v3413_v63 = vld [vmem:[%s5680_s9 + $0x30] sm:$0xff] }
 0x333   :  { %2029 = vmatpush.bf16.msrb.mxu0 %v2928_v59  ;;  %2043 = vmatpush.bf16.msrb.mxu1 %v2992_v5  ;;  %v3409_v59 = vld [vmem:[%s5680_s9 + $0x50] sm:$0xff] }
 0x334   :  { %2134 = vmatpush.msra.mxu2 %v5298_v6  ;;  %2157 = vmatpush.msra.mxu3 %v5304_v54  ;;  %v3414_v5 = vld [vmem:[%s5680_s9 + $0x130] sm:$0xff] }
 0x336   :  { %2135 = vmatpush.msra.mxu2 %v5310_v19  ;;  %2158 = vmatpush.msra.mxu3 %v5316_v21 }
 0x337   :  { %2030 = vmatpush.bf16.msrb.mxu0 %v2920_v13  ;;  %2044 = vmatpush.bf16.msrb.mxu1 %v2984_v9 }
 0x338   :  { %2136 = vmatpush.msra.mxu2 %v5334_v30  ;;  %2159 = vmatpush.msra.mxu3 %v5340_v31 }
 0x33a   :  { %2137 = vmatpush.msra.mxu2 %v5346_v33  ;;  %2160 = vmatpush.msra.mxu3 %v5352_v34 }
 0x33b   :  { %2031 = vmatpush.bf16.msrb.mxu0 %v2912_v22  ;;  %2045 = vmatpush.bf16.msrb.mxu1 %v2976_v23 }
 0x33c   :  { %2138 = vmatpush.msra.mxu2 %v5358_v38  ;;  %2161 = vmatpush.msra.mxu3 %v5364_v39  ;;  %v1950_v13 = vpop.f32.mrf.mxu2  ;;  %v1964_v9 = vpop.f32.mrf.mxu3 }
 0x33e   :  { %2139 = vmatpush.msra.mxu2 %v5370_v40  ;;  %2162 = vmatpush.msra.mxu3 %v5376_v41 }
 0x33f   :  { %2032 = vmatpush.bf16.msrb.mxu0 %v2904_v35  ;;  %2046 = vmatpush.bf16.msrb.mxu1 %v2968_v37 }
 0x340   :  { %2140 = vmatpush.msra.mxu2 %v5394_v48  ;;  %2163 = vmatpush.msra.mxu3 %v5400_v49 }
 0x342   :  { %2033 = vmatmul.bf16.vlgmr.msrb.gmra.mxu0 %v4861_v4  ;;  %2047 = vmatmul.bf16.vlgmr.msrb.gmra.mxu1 %v4871_v53  ;;  %v5420_v4 = vld [vmem:[%s5680_s9 + $0x18] sm:$0xff] }
 0x343   :  { %2081 = vmatpush.msra.mxu0 %v5382_v46  ;;  %2104 = vmatpush.msra.mxu1 %v5388_v47  ;;  %v5426_v53 = vld [vmem:[%s5680_s9 + $0x118] sm:$0xff] }
 0x344   :  { %2141 = vmatpush.msra.mxu2 %v5420_v4  ;;  %2164 = vmatpush.msra.mxu3 %v5426_v53  ;;  %v1952_v15 = vpop.f32.mrf.mxu2 }
 0x345   :  { %2082 = vmatpush.msra.mxu0 %v5408_v50  ;;  %2105 = vmatpush.msra.mxu1 %v5414_v51 }
 0x346   :  { %2142 = vmatpush.msra.mxu2 %v5444_v0  ;;  %2165 = vmatpush.msra.mxu3 %v5450_v28 }
 0x347   :  { %2083 = vmatpush.msra.mxu0 %v5432_v24  ;;  %2106 = vmatpush.msra.mxu1 %v5438_v57 }
 0x348   :  { %2243 = vmatpush.msrb.mxu2 %v5166_v42  ;;  %2266 = vmatpush.msrb.mxu3 %v5172_v43  ;;  %v5484_v42 = vld [vmem:[%s5680_s9 + $0xa0] sm:$0xff] }
 0x349   :  { %2084 = vmatpush.msra.mxu0 %v5456_v2  ;;  %2107 = vmatpush.msra.mxu1 %v5462_v1  ;;  %v5490_v43 = vld [vmem:[%s5680_s9 + $0x1a0] sm:$0xff] }
 0x34a   :  { %2244 = vmatpush.msrb.mxu2 %v5178_v44  ;;  %2267 = vmatpush.msrb.mxu3 %v5184_v45  ;;  %v5498_v44 = vld [vmem:[%s5680_s9 + $0x90] sm:$0xff] }
 0x34b   :  { %2085 = vmatpush.msra.mxu0 %v5470_v3  ;;  %2108 = vmatpush.msra.mxu1 %v5476_v32  ;;  %v5504_v45 = vld [vmem:[%s5680_s9 + $0x190] sm:$0xff] }
 0x34c   :  { %2245 = vmatpush.msrb.mxu2 %v5202_v52  ;;  %2268 = vmatpush.msrb.mxu3 %v5208_v55  ;;  %v5512_v52 = vld [vmem:[%s5680_s9 + $0x80] sm:$0xff] }
 0x34d   :  { %2086 = vmatpush.msra.mxu0 %v5484_v42  ;;  %2109 = vmatpush.msra.mxu1 %v5490_v43  ;;  %v5518_v55 = vld [vmem:[%s5680_s9 + $0x180] sm:$0xff] }
 0x34e   :  { %2246 = vmatpush.msrb.mxu2 %v5214_v20  ;;  %2269 = vmatpush.msrb.mxu3 %v5220_v56  ;;  %v5526_v20 = vld [vmem:[%s5680_s9 + $0x70] sm:$0xff] }
 0x34f   :  { %2087 = vmatpush.msra.mxu0 %v5498_v44  ;;  %2110 = vmatpush.msra.mxu1 %v5504_v45  ;;  %v5532_v56 = vld [vmem:[%s5680_s9 + $0x170] sm:$0xff] }
 0x350   :  { %2247 = vmatpush.msrb.mxu2 %v5238_v58  ;;  %2270 = vmatpush.msrb.mxu3 %v5244_v36  ;;  %v5540_v58 = vld [vmem:[%s5680_s9 + $0x60] sm:$0xff] }
 0x351   :  { %2088 = vmatpush.msra.mxu0 %v5512_v52  ;;  %2111 = vmatpush.msra.mxu1 %v5518_v55  ;;  %v5546_v36 = vld [vmem:[%s5680_s9 + $0x160] sm:$0xff] }
 0x352   :  { %2248 = vmatpush.msrb.mxu2 %v5250_v60  ;;  %2271 = vmatpush.msrb.mxu3 %v5256_v61  ;;  %v3410_v60 = vld [vmem:[%s5680_s9 + $0x150] sm:$0xff]  ;;  %v3411_v61 = vld [vmem:[%s5680_s9 + $0x40] sm:$0xff] }
 0x353   :  { %2089 = vmatpush.msra.mxu0 %v5526_v20  ;;  %2112 = vmatpush.msra.mxu1 %v5532_v56 }
 0x354   :  { %2249 = vmatpush.msrb.mxu2 %v5274_v17  ;;  %2272 = vmatpush.msrb.mxu3 %v5280_v12  ;;  %v3419_v17 = vld [vmem:[%s5680_s9] sm:$0xff] }
 0x355   :  { %2090 = vmatpush.msra.mxu0 %v5540_v58  ;;  %2113 = vmatpush.msra.mxu1 %v5546_v36  ;;  %v3420_v12 = vld [vmem:[%s5680_s9 + $0x100] sm:$0xff] }
 0x356   :  { %2250 = vmatpush.msrb.mxu2 %v5298_v6  ;;  %2273 = vmatpush.msrb.mxu3 %v5304_v54 }
 0x357   :  { %2091 = vmatpush.msra.mxu0 %v3409_v59  ;;  %2114 = vmatpush.msra.mxu1 %v3410_v60 }
 0x358   :  { %2251 = vmatpush.msrb.mxu2 %v5310_v19  ;;  %2274 = vmatpush.msrb.mxu3 %v5316_v21  ;;  %v1966_v19 = vpop.f32.mrf.mxu3 }
 0x359   :  { %2092 = vmatpush.msra.mxu0 %v3411_v61  ;;  %2115 = vmatpush.msra.mxu1 %v3412_v62 }
 0x35a   :  { %2252 = vmatpush.msrb.mxu2 %v5334_v30  ;;  %2275 = vmatpush.msrb.mxu3 %v5340_v31 }
 0x35b   :  { %2093 = vmatpush.msra.mxu0 %v3413_v63  ;;  %2116 = vmatpush.msra.mxu1 %v3414_v5 }
 0x35c   :  { %2253 = vmatpush.msrb.mxu2 %v5346_v33  ;;  %2276 = vmatpush.msrb.mxu3 %v5352_v34 }
 0x35d   :  { %2094 = vmatpush.msra.mxu0 %v3415_v7  ;;  %2117 = vmatpush.msra.mxu1 %v3416_v8 }
 0x35e   :  { %2254 = vmatpush.msrb.mxu2 %v5358_v38  ;;  %2277 = vmatpush.msrb.mxu3 %v5364_v39 }
 0x35f   :  { %2095 = vmatpush.msra.mxu0 %v3417_v10  ;;  %2118 = vmatpush.msra.mxu1 %v3418_v11 }
 0x360   :  { %2255 = vmatpush.msrb.mxu2 %v5370_v40  ;;  %2278 = vmatpush.msrb.mxu3 %v5376_v41 }
 0x361   :  { %2096 = vmatpush.msra.mxu0 %v3419_v17  ;;  %2119 = vmatpush.msra.mxu1 %v3420_v12 }
 0x362   :  { %2256 = vmatpush.msrb.mxu2 %v5394_v48  ;;  %2279 = vmatpush.msrb.mxu3 %v5400_v49 }
 0x363   :  { %2197 = vmatpush.msrb.mxu0 %v5382_v46  ;;  %2220 = vmatpush.msrb.mxu1 %v5388_v47 }
 0x364   :  { %2257 = vmatpush.msrb.mxu2 %v5420_v4  ;;  %2280 = vmatpush.msrb.mxu3 %v5426_v53 }
 0x365   :  { %2198 = vmatpush.msrb.mxu0 %v5408_v50  ;;  %2221 = vmatpush.msrb.mxu1 %v5414_v51 }
 0x366   :  { %2258 = vmatpush.msrb.mxu2 %v5444_v0  ;;  %2281 = vmatpush.msrb.mxu3 %v5450_v28 }
 0x367   :  { %2199 = vmatpush.msrb.mxu0 %v5432_v24  ;;  %2222 = vmatpush.msrb.mxu1 %v5438_v57 }
 0x369   :  { %2200 = vmatpush.msrb.mxu0 %v5456_v2  ;;  %2223 = vmatpush.msrb.mxu1 %v5462_v1 }
 0x36b   :  { %2201 = vmatpush.msrb.mxu0 %v5470_v3  ;;  %2224 = vmatpush.msrb.mxu1 %v5476_v32 }
 0x36d   :  { %2202 = vmatpush.msrb.mxu0 %v5484_v42  ;;  %2225 = vmatpush.msrb.mxu1 %v5490_v43 }
 0x36f   :  { %2203 = vmatpush.msrb.mxu0 %v5498_v44  ;;  %2226 = vmatpush.msrb.mxu1 %v5504_v45 }
 0x371   :  { %2204 = vmatpush.msrb.mxu0 %v5512_v52  ;;  %2227 = vmatpush.msrb.mxu1 %v5518_v55 }
 0x373   :  { %2205 = vmatpush.msrb.mxu0 %v5526_v20  ;;  %2228 = vmatpush.msrb.mxu1 %v5532_v56 }
 0x375   :  { %2206 = vmatpush.msrb.mxu0 %v5540_v58  ;;  %2229 = vmatpush.msrb.mxu1 %v5546_v36 }
 0x377   :  { %2207 = vmatpush.msrb.mxu0 %v3409_v59  ;;  %2230 = vmatpush.msrb.mxu1 %v3410_v60 }
 0x379   :  { %2208 = vmatpush.msrb.mxu0 %v3411_v61  ;;  %2231 = vmatpush.msrb.mxu1 %v3412_v62 }
 0x37b   :  { %2209 = vmatpush.msrb.mxu0 %v3413_v63  ;;  %2232 = vmatpush.msrb.mxu1 %v3414_v5 }
 0x37d   :  { %2210 = vmatpush.msrb.mxu0 %v3415_v7  ;;  %2233 = vmatpush.msrb.mxu1 %v3416_v8 }
 0x37f   :  { %2211 = vmatpush.msrb.mxu0 %v3417_v10  ;;  %2234 = vmatpush.msrb.mxu1 %v3418_v11 }
 0x381   :  { %2212 = vmatpush.msrb.mxu0 %v3419_v17  ;;  %2235 = vmatpush.msrb.mxu1 %v3420_v12 }
 0x39e   :  { %v1922_v18 = vpop.f32.mrf.mxu0  ;;  %v1936_v14 = vpop.f32.mrf.mxu1 }
 0x39f   :  { %v1937_v16 = vadd.f32 %v1936_v14, %v1922_v18 }
 0x3a1   :  { %v1951_v21 = vadd.f32 %v1950_v13, %v1937_v16 }
 0x3a3   :  { %v1965_v25 = vadd.f32 %v1964_v9, %v1951_v21 }
 0x3a5   :  { %v2006_v22 = vpop.f32.mrf.mxu2  ;;  %v2020_v29 = vpop.f32.mrf.mxu3 }
 0x3a6   :  { %v1924_v6 = vpop.f32.mrf.mxu0  ;;  %v1938_v54 = vpop.f32.mrf.mxu1  ;;  %v2021_v46 = vadd.f32 %v2020_v29, %v2006_v22 }
 0x3a7   :  { %v1939_v23 = vadd.f32 %v1938_v54, %v1924_v6 }
 0x3a9   :  { %v1953_v31 = vadd.f32 %v1952_v15, %v1939_v23 }
 0x3ab   :  { %v1967_v34 = vadd.f32 %v1966_v19, %v1953_v31 }
 0x3ad   :  { %v2008_v38 = vpop.f32.mrf.mxu2  ;;  %v2022_v40 = vpop.f32.mrf.mxu3 }
 0x3ae   :  { %v1978_v26 = vpop.f32.mrf.mxu0  ;;  %v1992_v27 = vpop.f32.mrf.mxu1  ;;  %v2023_v24 = vadd.f32 %v2022_v40, %v2008_v38 }
 0x3af   :  { %v1979_v30 = vadd.f32 %v1978_v26, %v1965_v25 }
 0x3b1   :  { %v1993_v33 = vadd.f32 %v1992_v27, %v1979_v30 }
 0x3b3   :  { %2097 = vmatmul.f32.vlgmr.msra.gmra.mxu0 %v1993_v33  ;;  %2143 = vmatmul.f32.vlgmr.msra.gmra.mxu2 %v1993_v33 }
 0x3b5   :  { %v2062_v50 = vpop.f32.mrf.mxu2  ;;  %v2076_v4 = vpop.f32.mrf.mxu3 }
 0x3b6   :  { %v1980_v35 = vpop.f32.mrf.mxu0  ;;  %v1994_v37 = vpop.f32.mrf.mxu1 }
 0x3b7   :  { %v1981_v39 = vadd.f32 %v1980_v35, %v1967_v34 }
 0x3b9   :  { %v1995_v41 = vadd.f32 %v1994_v37, %v1981_v39 }
 0x3bb   :  { %2100 = vmatmul.f32.gmra.mxu0 %v1995_v41  ;;  %2146 = vmatmul.f32.gmra.mxu2 %v1995_v41 }
 0x3bd   :  { %v2064_v3 = vpop.f32.mrf.mxu2  ;;  %v2078_v42 = vpop.f32.mrf.mxu3 }
 0x3bf   :  { %v2034_v47 = vpop.f32.mrf.mxu0  ;;  %v2048_v48 = vpop.f32.mrf.mxu1 }
 0x3c0   :  { %v2035_v49 = vadd.f32 %v2034_v47, %v2021_v46 }
 0x3c2   :  { %v2049_v51 = vadd.f32 %v2048_v48, %v2035_v49 }
 0x3c4   :  { %v2063_v53 = vadd.f32 %v2062_v50, %v2049_v51 }
 0x3c6   :  { %v2077_v57 = vadd.f32 %v2076_v4, %v2063_v53 }
 0x3c7   :  { %v2036_v0 = vpop.f32.mrf.mxu0  ;;  %v2050_v2 = vpop.f32.mrf.mxu1 }
 0x3c8   :  { %v2037_v28 = vadd.f32 %v2036_v0, %v2023_v24  ;;  %2120 = vmatmul.f32.vlgmr.msra.gmra.mxu1 %v2077_v57  ;;  %2166 = vmatmul.f32.vlgmr.msra.gmra.mxu3 %v2077_v57 }
 0x3ca   :  { %v2051_v1 = vadd.f32 %v2050_v2, %v2037_v28 }
 0x3cc   :  { %v2065_v32 = vadd.f32 %v2064_v3, %v2051_v1 }
 0x3ce   :  { %v2079_v43 = vadd.f32 %v2078_v42, %v2065_v32 }
 0x3d0   :  { %2123 = vmatmul.f32.gmra.mxu1 %v2079_v43  ;;  %2169 = vmatmul.f32.gmra.mxu3 %v2079_v43 }
 0x430   :  { %v2098_v44 = vpop.f32.mrf.mxu0 }
 0x436   :  { %v2144_v52 = vpop.f32.mrf.mxu2 }
 0x438   :  { %v2101_v20 = vpop.f32.mrf.mxu0 }
 0x43e   :  { %v2147_v61 = vpop.f32.mrf.mxu2 }
 0x445   :  { %v2121_v45 = vpop.f32.mrf.mxu1 }
 0x446   :  { %v2122_v58 = vadd.f32 %v2121_v45, %v2098_v44 }
 0x44b   :  { %v2167_v55 = vpop.f32.mrf.mxu3 }
 0x44c   :  { %v2168_v63 = vadd.f32 %v2167_v55, %v2144_v52 }
 0x44d   :  { %v2124_v56 = vpop.f32.mrf.mxu1 }
 0x44e   :  { %v2125_v36 = vadd.f32 %v2124_v56, %v2101_v20 }
 0x450   :  { %v2173_v59 = vadd.f32 %v2125_v36, %v2122_v58 }
 0x452   :  { %v2174_v60 = vrot.slane %v2173_v59, 4 }
 0x453   :  { %v2170_v62 = vpop.f32.mrf.mxu3 }
 0x454   :  { %v2175_v5 = vadd.f32 %v2174_v60, %v2173_v59  ;;  %v2171_v7 = vadd.f32 %v2170_v62, %v2147_v61 }
 0x456   :  { %v2176_v8 = vrot.slane %v2175_v5, 2  ;;  %v2180_v10 = vadd.f32 %v2171_v7, %v2168_v63 }
 0x458   :  { %v2177_v11 = vadd.f32 %v2176_v8, %v2175_v5  ;;  %v2181_v17 = vrot.slane %v2180_v10, 4  ;;  %v2305_v8 = vld [vmem:[%s5684_s7] sm:$0x3] }
 0x45a   :  { %v2178_v12 = vrot.slane %v2177_v11, 1  ;;  %v2182_v13 = vadd.f32 %v2181_v17, %v2180_v10 }
 0x45c   :  { %v2179_v9 = vadd.f32 %v2178_v12, %v2177_v11  ;;  %v2183_v18 = vrot.slane %v2182_v13, 2  ;;  %v2343_v12 = vld [vmem:[%s5685_s8] sm:$0x3] }
 0x45e   :  { %v2187_v14 = vmul.f32 0.0078125, %v2179_v9  ;;  %v2184_v15 = vadd.f32 %v2183_v18, %v2182_v13 }
 0x460   :  { %v2185_v16 = vrot.slane %v2184_v15, 1  ;;  %v5625_v6 = vsub.f32 %v1993_v33, %v2187_v14  ;;  %v5631_v23 = vsub.f32 %v1995_v41, %v2187_v14  ;;  %v2345_v14 = vperm.slane %v2343_v12, 0 }
 0x462   :  { %v2186_v54 = vadd.f32 %v2185_v16, %v2184_v15  ;;  %v2193_v19 = vmul.f32 %v5625_v6, %v5625_v6  ;;  %v2195_v26 = vmul.f32 %v5631_v23, %v5631_v23  ;;  %v2346_v15 = vperm.slane %v2343_v12, 1 }
 0x464   :  { %v2188_v21 = vmul.f32 0.0078125, %v2186_v54  ;;  %2213 = vmatmul.f32.vlgmr.msrb.gmra.mxu0 %v2193_v19  ;;  %2259 = vmatmul.f32.vlgmr.msrb.gmra.mxu2 %v2193_v19 }
 0x466   :  { %v5629_v22 = vsub.f32 %v2077_v57, %v2188_v21  ;;  %v5637_v27 = vsub.f32 %v2079_v43, %v2188_v21 }
 0x468   :  { %v2194_v25 = vmul.f32 %v5629_v22, %v5629_v22  ;;  %v2196_v29 = vmul.f32 %v5637_v27, %v5637_v27 }
 0x46a   :  { %2236 = vmatmul.f32.vlgmr.msrb.gmra.mxu1 %v2194_v25  ;;  %2282 = vmatmul.f32.vlgmr.msrb.gmra.mxu3 %v2194_v25 }
 0x46c   :  { %2216 = vmatmul.f32.gmra.mxu0 %v2195_v26  ;;  %2262 = vmatmul.f32.gmra.mxu2 %v2195_v26 }
 0x472   :  { %2239 = vmatmul.f32.gmra.mxu1 %v2196_v29  ;;  %2285 = vmatmul.f32.gmra.mxu3 %v2196_v29 }
 0x4e1   :  { %v2214_v30 = vpop.f32.mrf.mxu0 }
 0x4e7   :  { %v2237_v31 = vpop.f32.mrf.mxu1  ;;  %v2260_v33 = vpop.f32.mrf.mxu2 }
 0x4e8   :  { %v2238_v38 = vadd.f32 %v2237_v31, %v2214_v30  ;;  %v3421_v31 = vld [vmem:[%s5676_s0] sm:$0xff] }
 0x4e9   :  { %v2217_v35 = vpop.f32.mrf.mxu0 }
 0x4ed   :  { %v2283_v34 = vpop.f32.mrf.mxu3 }
 0x4ee   :  { %v2284_v48 = vadd.f32 %v2283_v34, %v2260_v33  ;;  %v3422_v34 = vld [vmem:[%s5676_s0 + $0x8] sm:$0xff] }
 0x4ef   :  { %v2240_v37 = vpop.f32.mrf.mxu1  ;;  %v2263_v46 = vpop.f32.mrf.mxu2 }
 0x4f0   :  { %v2241_v39 = vadd.f32 %v2240_v37, %v2217_v35 }
 0x4f2   :  { %v2289_v40 = vadd.f32 %v2241_v39, %v2238_v38 }
 0x4f4   :  { %v2290_v41 = vrot.slane %v2289_v40, 4 }
 0x4f5   :  { %v2286_v47 = vpop.f32.mrf.mxu3 }
 0x4f6   :  { %v2291_v49 = vadd.f32 %v2290_v41, %v2289_v40  ;;  %v2287_v50 = vadd.f32 %v2286_v47, %v2263_v46 }
 0x4f8   :  { %v2292_v51 = vrot.slane %v2291_v49, 2  ;;  %v2296_v4 = vadd.f32 %v2287_v50, %v2284_v48 }
 0x4fa   :  { %v2293_v53 = vadd.f32 %v2292_v51, %v2291_v49  ;;  %v2297_v24 = vrot.slane %v2296_v4, 4 }
 0x4fc   :  { %v2294_v57 = vrot.slane %v2293_v53, 1  ;;  %v2298_v0 = vadd.f32 %v2297_v24, %v2296_v4 }
 0x4fe   :  { %v2295_v28 = vadd.f32 %v2294_v57, %v2293_v53  ;;  %v2299_v2 = vrot.slane %v2298_v0, 2 }
 0x500   :  { %v2303_v1 = vmul.f32 0.0078125, %v2295_v28  ;;  %v2300_v3 = vadd.f32 %v2299_v2, %v2298_v0 }
 0x502   :  { %v2306_v32 = vadd.f32 1e-05, %v2303_v1  ;;  %v2301_v42 = vrot.slane %v2300_v3, 1 }
 0x504   :  { %3349 = vrsqrt.f32 %v2306_v32  ;;  %v2302_v43 = vadd.f32 %v2301_v42, %v2300_v3  ;;  %vm2314_vm12 = vweird.f32 %v2306_v32 }
 0x506   :  { %v2304_v44 = vmul.f32 0.0078125, %v2302_v43 }
 0x508   :  { %v2307_v45 = vadd.f32 1e-05, %v2304_v44 }
 0x50a   :  { %v3350_v52 = vpop.eup %3349  ;;  %3351 = vrsqrt.f32 %v2307_v45  ;;  %vm2324_vm10 = vweird.f32 %v2307_v45 }
 0x50b   :  { %v2309_v55 = vmul.f32 %v3350_v52, %v2306_v32  ;;  %vm2315_vm9 = vweird.f32 %v3350_v52 }
 0x50c   :  { %vm2316_vm13 = vmor %vm2314_vm12, %vm2315_vm9 }
 0x50d   :  { %v2310_v20 = vmul.f32 %v3350_v52, %v2309_v55 }
 0x50f   :  { %v2311_v58 = vmul.f32 0.5, %v2310_v20 }
 0x510   :  { %v3352_v56 = vpop.eup %3351 }
 0x511   :  { %v2319_v36 = vmul.f32 %v3352_v56, %v2307_v45  ;;  %v2312_v60 = vsub.f32 1.5, %v2311_v58  ;;  %vm2325_vm8 = vweird.f32 %v3352_v56 }
 0x512   :  { %vm2326_vm11 = vmor %vm2324_vm10, %vm2325_vm8 }
 0x513   :  { %v2320_v59 = vmul.f32 %v3352_v56, %v2319_v36  ;;  %v2313_v63 = vmul.f32 %v3350_v52, %v2312_v60 }
 0x515   :  { %v2321_v61 = vmul.f32 0.5, %v2320_v59  ;;  %v2317_v11 = vsel %vm2316_vm13, %v3350_v52, %v2313_v63 }
 0x517   :  { %v2322_v62 = vsub.f32 1.5, %v2321_v61 }
 0x519   :  { %v2323_v5 = vmul.f32 %v3352_v56, %v2322_v62 }
 0x51b   :  { %v2327_v7 = vsel %vm2326_vm11, %v3352_v56, %v2323_v5 }
 0x51c   :  { %v2330_v10 = vrot.slane %v2327_v7, 7 }
 0x51e   :  { %v2331_v17 = vsel %vm1212_vm6, %v2317_v11, %v2330_v10 }
 0x51f   :  { %v2333_v13 = vmul.f32 %v2331_v17, %v2305_v8 }
 0x521   :  { %v2335_v9 = vperm.slane %v2333_v13, 0  ;;  %v2336_v18 = vperm.slane %v2333_v13, 1 }
 0x523   :  { %v2339_v16 = vmul.f32 %v2335_v9, %v5625_v6  ;;  %v2340_v54 = vmul.f32 %v2336_v18, %v5629_v22  ;;  %v2341_v19 = vmul.f32 %v2335_v9, %v5631_v23  ;;  %v2342_v21 = vmul.f32 %v2336_v18, %v5637_v27  ;;  %v3423_v22 = vld [vmem:[%s5676_s0 + $0x10] sm:$0xff]  ;;  %v3424_v27 = vld [vmem:[%s5676_s0 + $0x18] sm:$0xff] }
 0x525   :  { %v2349_v25 = vadd.f32 %v2345_v14, %v2339_v16  ;;  %v2350_v26 = vadd.f32 %v2346_v15, %v2340_v54  ;;  %v2351_v29 = vadd.f32 %v2345_v14, %v2341_v19  ;;  %v2352_v30 = vadd.f32 %v2346_v15, %v2342_v21 }
 0x527   :  { %v2353_v33 = vadd.f32 %v3421_v31, %v2349_v25  ;;  %v2354_v6 = vadd.f32 %v3422_v34, %v2350_v26  ;;  %v2355_v23 = vadd.f32 %v3423_v22, %v2351_v29  ;;  %v2356_v35 = vadd.f32 %v3424_v27, %v2352_v30 }
 0x529   :  { %v2357_v37 = vmax.f32 %v2353_v33, 0.0  ;;  %v2358_v38 = vmax.f32 %v2354_v6, 0.0  ;;  %v2359_v39 = vmax.f32 %v2355_v23, 0.0  ;;  %v2360_v40 = vmax.f32 %v2356_v35, 0.0 }
 0x52b   :  { %2361 = vst [vmem:[%s5686_s10] sm:$0xff] %v2357_v37 }
 0x52c   :  { %2362 = vst [vmem:[%s5686_s10 + $0x8] sm:$0xff] %v2358_v38 }
 0x52d   :  { %2363 = vst [vmem:[%s5686_s10 + $0x10] sm:$0xff] %v2359_v39 }
 0x52e   :  { %2364 = vst [vmem:[%s5686_s10 + $0x18] sm:$0xff] %v2360_v40 }

</bundles_post_ra>
